<compile_context>
chip_gen: v5e
topology: v5e:2x2
jax: 0.10.0
libtpu: 0.0.40
codegen_flags: <defaults>
</compile_context>

<pallas_src>
import math
import functools

import jax
import jax.numpy as jnp
from jax.experimental import pallas as pl
from jax.experimental.pallas import tpu as pltpu


DOT_DTYPE = jnp.bfloat16            # MXU operand dtype (accumulation stays f32)


def _rup(x, m):
    return ((x + m - 1) // m) * m


@functools.lru_cache(maxsize=None)
def _vmem_limit_bytes():
    """Generation-aware scoped-VMEM budget (~3/4 of physical), safe fallback."""
    try:
        info = pltpu.get_tpu_info()
        cap = None
        for name in ("vmem_capacity_bytes", "vmem_bytes", "vmem_size_bytes"):
            cap = getattr(info, name, None)
            if cap:
                break
        if cap:
            return int(min(cap * 3 // 4, 110 * 1024 * 1024))
    except Exception:
        pass
    return 48 * 1024 * 1024


def _cparams(*sem):
    return pltpu.CompilerParams(dimension_semantics=sem,
                                vmem_limit_bytes=_vmem_limit_bytes())


def _pad2(a, rows, cols):
    if rows or cols:
        a = jnp.pad(a, ((0, rows), (0, cols)))
    return a


def _apply_act(y, act):
    if act == "swish":
        return y * jax.nn.sigmoid(y)
    if act == "relu":
        return jnp.maximum(y, 0.0)
    return y


def _tile(dim, single_max, tile_size):
    """(tile, padded_dim): single un-padded tile when it fits, else fixed tiles."""
    if dim <= single_max:
        return dim, dim
    return tile_size, _rup(dim, tile_size)


# ----------------------------------------------------------------------------- tiled linear

@functools.lru_cache(maxsize=None)
def _linear_kernel(act, has_bias, has_res, out_scale):
    def kernel(*refs):
        idx = 2
        x_ref, w_ref = refs[0], refs[1]
        b_ref = refs[idx] if has_bias else None
        idx += 1 if has_bias else 0
        res_ref = refs[idx] if has_res else None
        idx += 1 if has_res else 0
        o_ref, acc_ref = refs[idx], refs[idx + 1]

        @pl.when(pl.program_id(2) == 0)
        def _():
            acc_ref[...] = jnp.zeros_like(acc_ref)

        acc_ref[...] += jnp.dot(x_ref[...], w_ref[...],
                                preferred_element_type=jnp.float32)

        @pl.when(pl.program_id(2) == pl.num_programs(2) - 1)
        def _():
            y = acc_ref[...]
            if has_bias:
                y = y + b_ref[...]
            y = _apply_act(y, act)
            if out_scale != 1.0:
                y = y * out_scale
            if has_res:
                y = y + res_ref[...]
            o_ref[...] = y.astype(o_ref.dtype)
    return kernel


def linear(x, w, b=None, act="none", res=None, out_scale=1.0,
           out_dtype=jnp.float32, tm_max=256, single_max=1024, tile_kn=512):
    """y = act(x @ w (+ b)) * out_scale (+ res), bf16 MXU operands, f32 accumulator."""
    shp = x.shape
    K = shp[-1]
    M = math.prod(shp[:-1])
    N = w.shape[1]

    x2 = x.reshape(M, K).astype(DOT_DTYPE)
    wq = w.astype(DOT_DTYPE)

    tm = min(_rup(M, 8), tm_max)
    tk, Kp = _tile(K, single_max, tile_kn)
    tn, Np = _tile(N, single_max, tile_kn)
    Mp = _rup(M, tm)

    x2 = _pad2(x2, Mp - M, Kp - K)
    wq = _pad2(wq, Kp - K, Np - N)

    has_bias = b is not None
    has_res = res is not None

    args = [x2, wq]
    in_specs = [pl.BlockSpec((tm, tk), lambda i, j, k: (i, k)),
                pl.BlockSpec((tk, tn), lambda i, j, k: (k, j))]
    if has_bias:
        args.append(_pad2(b.astype(jnp.float32).reshape(1, N), 0, Np - N))
        in_specs.append(pl.BlockSpec((1, tn), lambda i, j, k: (0, j)))
    if has_res:
        r2 = res.reshape(M, N).astype(jnp.float32)
        args.append(_pad2(r2, Mp - M, Np - N))
        in_specs.append(pl.BlockSpec((tm, tn), lambda i, j, k: (i, j)))

    out = pl.pallas_call(
        _linear_kernel(act, has_bias, has_res, float(out_scale)),
        out_shape=jax.ShapeDtypeStruct((Mp, Np), out_dtype),
        grid=(Mp // tm, Np // tn, Kp // tk),
        in_specs=in_specs,
        out_specs=pl.BlockSpec((tm, tn), lambda i, j, k: (i, j)),
        scratch_shapes=[pltpu.VMEM((tm, tn), jnp.float32)],
        compiler_params=_cparams("parallel", "parallel", "arbitrary"),
    )(*args)
    return out[:M, :N].reshape(shp[:-1] + (N,))


# ----------------------------------------------------------------------------- fused LN + linear

@functools.lru_cache(maxsize=None)
def _ln_linear_kernel(act, has_bias, eps):
    def kernel(*refs):
        if has_bias:
            x_ref, g_ref, b_ref, w_ref, bias_ref, o_ref, xn_ref = refs
        else:
            x_ref, g_ref, b_ref, w_ref, o_ref, xn_ref = refs

        # LayerNorm hoisted out of the N-tile loop: normalize once per row block.
        @pl.when(pl.program_id(1) == 0)
        def _():
            x = x_ref[...]
            mu = jnp.mean(x, axis=-1, keepdims=True)
            var = jnp.mean(jnp.square(x - mu), axis=-1, keepdims=True)
            xn = (x - mu) * jax.lax.rsqrt(var + eps) * g_ref[...] + b_ref[...]
            xn_ref[...] = xn.astype(DOT_DTYPE)

        y = jnp.dot(xn_ref[...], w_ref[...], preferred_element_type=jnp.float32)
        if has_bias:
            y = y + bias_ref[...]
        o_ref[...] = _apply_act(y, act).astype(o_ref.dtype)
    return kernel


def ln_linear(x, g, b, w, bias=None, act="none", out_dtype=jnp.float32, eps=1e-5,
              tm_max=256, single_max=1024, tile_n=512):
    """Fused LayerNorm(x) @ w (+ bias) (+ activation); LN over last dim (un-tiled)."""
    shp = x.shape
    D = shp[-1]
    M = math.prod(shp[:-1])
    N = w.shape[1]
    x2 = x.reshape(M, D).astype(jnp.float32)
    wq = w.astype(DOT_DTYPE)

    tm = min(_rup(M, 8), tm_max)
    tn, Np = _tile(N, single_max, tile_n)
    Mp = _rup(M, tm)

    x2 = _pad2(x2, Mp - M, 0)
    wq = _pad2(wq, 0, Np - N)

    has_bias = bias is not None
    args = [x2, g.reshape(1, D), b.reshape(1, D), wq]
    in_specs = [pl.BlockSpec((tm, D), lambda i, j: (i, 0)),
                pl.BlockSpec((1, D), lambda i, j: (0, 0)),
                pl.BlockSpec((1, D), lambda i, j: (0, 0)),
                pl.BlockSpec((D, tn), lambda i, j: (0, j))]
    if has_bias:
        args.append(_pad2(bias.astype(jnp.float32).reshape(1, N), 0, Np - N))
        in_specs.append(pl.BlockSpec((1, tn), lambda i, j: (0, j)))

    out = pl.pallas_call(
        _ln_linear_kernel(act, has_bias, float(eps)),
        out_shape=jax.ShapeDtypeStruct((Mp, Np), out_dtype),
        grid=(Mp // tm, Np // tn),
        in_specs=in_specs,
        out_specs=pl.BlockSpec((tm, tn), lambda i, j: (i, j)),
        scratch_shapes=[pltpu.VMEM((tm, D), DOT_DTYPE)],
        compiler_params=_cparams("parallel", "arbitrary"),
    )(*args)
    return out[:M, :N].reshape(shp[:-1] + (N,))


# ----------------------------------------------------------------------------- layernorm

@functools.lru_cache(maxsize=None)
def _layernorm_kernel(eps):
    def kernel(x_ref, g_ref, b_ref, o_ref):
        x = x_ref[...]
        mu = jnp.mean(x, axis=-1, keepdims=True)
        var = jnp.mean(jnp.square(x - mu), axis=-1, keepdims=True)
        o_ref[...] = (x - mu) * jax.lax.rsqrt(var + eps) * g_ref[...] + b_ref[...]
    return kernel


def layernorm(x, g, b, eps=1e-5, tm_max=256):
    shp = x.shape
    D = shp[-1]
    M = math.prod(shp[:-1])
    x2 = x.reshape(M, D).astype(jnp.float32)
    tm = min(_rup(M, 8), tm_max)
    Mp = _rup(M, tm)
    x2 = _pad2(x2, Mp - M, 0)
    out = pl.pallas_call(
        _layernorm_kernel(float(eps)),
        out_shape=jax.ShapeDtypeStruct((Mp, D), jnp.float32),
        grid=(Mp // tm,),
        in_specs=[pl.BlockSpec((tm, D), lambda i: (i, 0)),
                  pl.BlockSpec((1, D), lambda i: (0, 0)),
                  pl.BlockSpec((1, D), lambda i: (0, 0))],
        out_specs=pl.BlockSpec((tm, D), lambda i: (i, 0)),
        compiler_params=_cparams("parallel"),
    )(x2, g.reshape(1, D), b.reshape(1, D))
    return out[:M].reshape(shp)


# ----------------------------------------------------------------------------- attention kernels

@functools.lru_cache(maxsize=None)
def _rel_attn_kernel(scale):
    def kernel(q_ref, k_ref, v_ref, bias_ref, o_ref):
        q = q_ref[0, 0]                                            # (tq, dh) bf16
        k = k_ref[0, 0]                                            # (T,  dh) bf16
        v = v_ref[0, 0]                                            # (T,  dh) bf16
        dots = jax.lax.dot_general(q, k, (((1,), (1,)), ((), ())),
                                   preferred_element_type=jnp.float32)
        logits = (dots + bias_ref[0, 0].astype(jnp.float32)) * scale
        logits = logits - jnp.max(logits, axis=-1, keepdims=True)
        p = jnp.exp(logits)
        attn = p / jnp.sum(p, axis=-1, keepdims=True)
        o_ref[0, 0] = jnp.dot(attn.astype(DOT_DTYPE), v,
                              preferred_element_type=jnp.float32).astype(o_ref.dtype)
    return kernel


@functools.lru_cache(maxsize=None)
def _mha_kernel(scale, causal):
    def kernel(q_ref, k_ref, v_ref, o_ref):
        q = q_ref[0, 0]                                            # (Tq, dh) bf16
        k = k_ref[0, 0]                                            # (Tk, dh) bf16
        v = v_ref[0, 0]
        logits = jax.lax.dot_general(q, k, (((1,), (1,)), ((), ())),
                                     preferred_element_type=jnp.float32) * scale
        if causal:
            tq, tk = logits.shape
            qi = jax.lax.broadcasted_iota(jnp.int32, (tq, tk), 0)
            ki = jax.lax.broadcasted_iota(jnp.int32, (tq, tk), 1)
            logits = jnp.where(ki > qi, -1e30, logits)
        logits = logits - jnp.max(logits, axis=-1, keepdims=True)
        p = jnp.exp(logits)
        attn = p / jnp.sum(p, axis=-1, keepdims=True)
        o_ref[0, 0] = jnp.dot(attn.astype(DOT_DTYPE), v,
                              preferred_element_type=jnp.float32).astype(o_ref.dtype)
    return kernel


def mha(q, k, v, heads, causal=False):
    """q: [B,Tq,D], k/v: [B,Tk,D] -> [B,Tq,D] (bf16); grid over (batch, head)."""
    B, Tq, D = q.shape
    Tk = k.shape[1]
    dh = D // heads
    scale = 1.0 / math.sqrt(dh)

    def split(t, T):
        return t.reshape(B, T, heads, dh).transpose(0, 2, 1, 3).astype(DOT_DTYPE)

    qh, kh, vh = split(q, Tq), split(k, Tk), split(v, Tk)

    out = pl.pallas_call(
        _mha_kernel(scale, bool(causal)),
        out_shape=jax.ShapeDtypeStruct((B, heads, Tq, dh), DOT_DTYPE),
        grid=(B, heads),
        in_specs=[pl.BlockSpec((1, 1, Tq, dh), lambda b, h: (b, h, 0, 0)),
                  pl.BlockSpec((1, 1, Tk, dh), lambda b, h: (b, h, 0, 0)),
                  pl.BlockSpec((1, 1, Tk, dh), lambda b, h: (b, h, 0, 0))],
        out_specs=pl.BlockSpec((1, 1, Tq, dh), lambda b, h: (b, h, 0, 0)),
        compiler_params=_cparams("parallel", "parallel"),
    )(qh, kh, vh)
    return out.transpose(0, 2, 1, 3).reshape(B, Tq, D)


# ----------------------------------------------------------------------------- GLU + depthwise conv

@functools.lru_cache(maxsize=None)
def _dwconv_kernel(K, C, T_out):
    def kernel(x_ref, w_ref, scale_ref, shift_ref, o_ref):
        xr = x_ref[0].astype(jnp.float32)                          # (Tp, 2C)
        u = xr[:, :C] * jax.nn.sigmoid(xr[:, C:])                  # fused GLU
        w = w_ref[...]                                             # (K, C)
        acc = u[0:T_out, :] * w[0:1, :]
        for k in range(1, K):
            acc = acc + u[k:k + T_out, :] * w[k:k + 1, :]
        y = acc * scale_ref[...] + shift_ref[...]                  # conv bias + BN(eval) affine
        o_ref[0] = (y * jax.nn.sigmoid(y)).astype(o_ref.dtype)     # fused swish
    return kernel


def glu_dwconv_bn_swish(x_pad, w, scale, shift, K):
    """x_pad: [B, Tp, 2C] pre-GLU (time already padded) -> [B, Tp-K+1, C] bf16."""
    B, Tp, C2 = x_pad.shape
    C = C2 // 2
    T_out = Tp - K + 1
    return pl.pallas_call(
        _dwconv_kernel(K, C, T_out),
        out_shape=jax.ShapeDtypeStruct((B, T_out, C), DOT_DTYPE),
        grid=(B,),
        in_specs=[pl.BlockSpec((1, Tp, C2), lambda bi: (bi, 0, 0)),
                  pl.BlockSpec((K, C), lambda bi: (0, 0)),
                  pl.BlockSpec((1, C), lambda bi: (0, 0)),
                  pl.BlockSpec((1, C), lambda bi: (0, 0))],
        out_specs=pl.BlockSpec((1, T_out, C), lambda bi: (bi, 0, 0)),
        compiler_params=_cparams("parallel"),
    )(x_pad, w, scale.reshape(1, C), shift.reshape(1, C))


# ----------------------------------------------------------------------------- model pieces

def conformer_attention(x, p, cfg):
    B, T, D = x.shape
    H, dh = cfg["heads"], cfg["dim_head"]
    inner = H * dh
    P = cfg["max_pos_emb"]
    scale = dh ** -0.5

    # fused pre-LN + packed (no-bias) QKV projection, bf16 out
    qkv = ln_linear(x, p["ln_g"], p["ln_b"], p["wqkv"], out_dtype=DOT_DTYPE)
    qkv = qkv.reshape(B, T, 3, H, dh)
    q = qkv[:, :, 0].transpose(0, 2, 1, 3)                         # [B,H,T,dh]
    k = qkv[:, :, 1].transpose(0, 2, 1, 3)
    v = qkv[:, :, 2].transpose(0, 2, 1, 3)

    # Shaw relative-position bias against a tight (2T-1, dh) window of the table
    # (clipping folded into the window gather -> no 2P+1 padding waste).
    # TODO(synk): fold this relative-shift gather into the attention kernel so the
    #             (B,H,T,T) bf16 bias never round-trips through HBM.
    rel_idx = jnp.clip(jnp.arange(2 * T - 1) - (T - 1), -P, P) + P
    rel_window = jnp.take(p["rel_emb"], rel_idx, axis=0)           # (2T-1, dh)
    pos_win = linear(q, rel_window.T, out_dtype=jnp.float32)       # [B,H,T,2T-1]
    seq = jnp.arange(T)
    shift = (seq[:, None] - seq[None, :]) + (T - 1)                # values in [0, 2T-2]
    idx = jnp.broadcast_to(shift[None, None], (B, H, T, T))
    pos_bias = jnp.take_along_axis(pos_win, idx, axis=-1).astype(DOT_DTYPE)

    # query tiling: bounds VMEM per step and adds parallel blocks (v7x megacore)
    if T <= 128:
        tq, Tqp = T, T
    else:
        tq, Tqp = 128, _rup(T, 128)
    if Tqp != T:
        q = jnp.pad(q, ((0, 0), (0, 0), (0, Tqp - T), (0, 0)))
        pos_bias = jnp.pad(pos_bias, ((0, 0), (0, 0), (0, Tqp - T), (0, 0)))

    out = pl.pallas_call(
        _rel_attn_kernel(float(scale)),
        out_shape=jax.ShapeDtypeStruct((B, H, Tqp, dh), DOT_DTYPE),
        grid=(B, H, Tqp // tq),
        in_specs=[pl.BlockSpec((1, 1, tq, dh), lambda b, h, qi: (b, h, qi, 0)),
                  pl.BlockSpec((1, 1, T, dh), lambda b, h, qi: (b, h, 0, 0)),
                  pl.BlockSpec((1, 1, T, dh), lambda b, h, qi: (b, h, 0, 0)),
                  pl.BlockSpec((1, 1, tq, T), lambda b, h, qi: (b, h, qi, 0))],
        out_specs=pl.BlockSpec((1, 1, tq, dh), lambda b, h, qi: (b, h, qi, 0)),
        compiler_params=_cparams("parallel", "parallel", "parallel"),
    )(q, k, v, pos_bias)

    out = out[:, :, :T].transpose(0, 2, 1, 3).reshape(B, T, inner)
    return linear(out, p["wo"], p["bo"], res=x)                    # residual fused in epilogue


def feed_forward(x, ln_g, ln_b, p):
    h = ln_linear(x, ln_g, ln_b, p["w1"], p["b1"], act="swish", out_dtype=DOT_DTYPE)
    return linear(h, p["w2"], p["b2"], res=x, out_scale=0.5)        # x + 0.5 * ff(x)


def conv_module(x, p, cfg):
    K = cfg["conv_kernel_size"]
    h = ln_linear(x, p["ln_g"], p["ln_b"], p["pw1_w"], p["pw1_b"],
                  out_dtype=DOT_DTYPE)                               # LN + pointwise conv1 [B,T,2C]
    pad_l = K // 2
    pad_r = K // 2 - (K + 1) % 2                                     # calc_same_padding
    h = jnp.pad(h, ((0, 0), (pad_l, pad_r), (0, 0)))                 # pad along time (GLU(0)=0)

    # fold conv bias + BatchNorm(eval) into a per-channel affine; GLU+conv+swish fused in kernel
    a_bn = p["bn_g"] * jax.lax.rsqrt(p["bn_var"] + 1e-5)
    shift = (p["dw_b"] - p["bn_mean"]) * a_bn + p["bn_b"]
    h = glu_dwconv_bn_swish(h, p["dw_w"], a_bn, shift, K)            # [B,T,C] bf16
    return linear(h, p["pw2_w"], p["pw2_b"], res=x)                  # pointwise conv2 + residual


def conformer_block(x, p, cfg):
    x = feed_forward(x, p["ff1_ln_g"], p["ff1_ln_b"], p["ff1"])
    x = conformer_attention(x, p["attn"], cfg)
    x = conv_module(x, p["conv"], cfg)
    x = feed_forward(x, p["ff2_ln_g"], p["ff2_ln_b"], p["ff2"])
    return layernorm(x, p["post_ln_g"], p["post_ln_b"])


def sinusoidal_pe(L, d_model):
    position = jnp.arange(L, dtype=jnp.float32)[:, None]
    div_term = jnp.exp(jnp.arange(0, d_model, 2, dtype=jnp.float32) * (-math.log(10000.0) / d_model))
    pe = jnp.zeros((L, d_model), jnp.float32)
    pe = pe.at[:, 0::2].set(jnp.sin(position * div_term))
    pe = pe.at[:, 1::2].set(jnp.cos(position * div_term))
    return pe


def forward(params, x, targets, cfg, mode="joint"):
    # ------------------------------------------------- encoder (Conformer)
    h = linear(x, params["input_w"], params["input_b"])
    for blk in params["encoder"]:
        h = conformer_block(h, blk, cfg)
    enc_out = h

    if mode == "ctc":
        return linear(enc_out, params["ctc_w"], params["ctc_b"])

    # ------------------------------------------------- attention decoder (post-LN, eval)
    B, T_out = targets.shape
    D = cfg["encoder_dim"]
    heads = cfg["decoder_heads"]
    bos = cfg["num_classes"] - 1
    tgt_shift = jnp.concatenate(
        [jnp.full((B, 1), bos, dtype=targets.dtype), targets[:, :-1]], axis=1)

    dec = jnp.take(params["tok_emb"], tgt_shift, axis=0)            # [B, T_out, D]
    dec = dec + sinusoidal_pe(T_out, D)[None]

    for lyr in params["decoder"]:
        # self-attention: packed QKV projection, causal mask built in-kernel
        qkv = linear(dec, lyr["sa_wqkv"], lyr["sa_bqkv"], out_dtype=DOT_DTYPE)
        sa = mha(qkv[..., :D], qkv[..., D:2 * D], qkv[..., 2 * D:], heads, causal=True)
        dec = layernorm(linear(sa, lyr["sa_wo"], lyr["sa_bo"], res=dec),
                        lyr["ln1_g"], lyr["ln1_b"])

        # cross-attention: packed KV projection of the encoder memory
        q = linear(dec, lyr["ca_wq"], lyr["ca_bq"], out_dtype=DOT_DTYPE)
        kv = linear(enc_out, lyr["ca_wkv"], lyr["ca_bkv"], out_dtype=DOT_DTYPE)
        ca = mha(q, kv[..., :D], kv[..., D:], heads, causal=False)
        dec = layernorm(linear(ca, lyr["ca_wo"], lyr["ca_bo"], res=dec),
                        lyr["ln2_g"], lyr["ln2_b"])

        ffh = linear(dec, lyr["ff1_w"], lyr["ff1_b"], act="relu", out_dtype=DOT_DTYPE)
        dec = layernorm(linear(ffh, lyr["ff2_w"], lyr["ff2_b"], res=dec),
                        lyr["ln3_g"], lyr["ln3_b"])

    attn_logits = linear(dec, params["attn_out_w"], params["attn_out_b"])

    if mode == "attn":
        return attn_logits
    elif mode == "joint":
        logits_ctc = linear(enc_out, params["ctc_w"], params["ctc_b"])
        return logits_ctc, attn_logits
    else:
        raise ValueError(f"Unsupported mode: {mode}")


# ----------------------------------------------------------------------------- params

class KeyGen:
    def __init__(self, seed=0):
        self.key = jax.random.PRNGKey(seed)
        self.i = 0

    def __call__(self):
        self.i += 1
        return jax.random.fold_in(self.key, self.i)


def init_params(cfg, seed=1234):
    kg = KeyGen(seed)
    D = cfg["encoder_dim"]
    H, dh = cfg["heads"], cfg["dim_head"]
    inner_attn = H * dh
    ff_hidden = D * cfg["ff_mult"]
    inner_conv = D * cfg["conv_expansion_factor"]
    K = cfg["conv_kernel_size"]
    nc = cfg["num_classes"]

    def lin(fi, fo):
        bound = 1.0 / math.sqrt(fi)
        w = jax.random.uniform(kg(), (fi, fo), minval=-bound, maxval=bound,
                               dtype=jnp.float32).astype(DOT_DTYPE)    # bf16 weight storage
        b = jax.random.uniform(kg(), (fo,), minval=-bound, maxval=bound, dtype=jnp.float32)
        return w, b

    def lin_nb(fi, fo):
        bound = 1.0 / math.sqrt(fi)
        return jax.random.uniform(kg(), (fi, fo), minval=-bound, maxval=bound,
                                  dtype=jnp.float32).astype(DOT_DTYPE)

    ones = lambda n: jnp.ones((n,), jnp.float32)
    zeros = lambda n: jnp.zeros((n,), jnp.float32)

    params = {}
    params["input_w"], params["input_b"] = lin(cfg["input_dim"], D)

    enc = []
    for _ in range(cfg["depth"]):
        blk = {}
        blk["ff1_ln_g"], blk["ff1_ln_b"] = ones(D), zeros(D)
        w1, b1 = lin(D, ff_hidden); w2, b2 = lin(ff_hidden, D)
        blk["ff1"] = dict(w1=w1, b1=b1, w2=w2, b2=b2)

        wo, bo = lin(inner_attn, D)
        blk["attn"] = dict(
            ln_g=ones(D), ln_b=zeros(D),
            wqkv=lin_nb(D, 3 * inner_attn),       # packed [to_q | to_k | to_v], no bias
            wo=wo, bo=bo,
            rel_emb=0.02 * jax.random.normal(kg(), (2 * cfg["max_pos_emb"] + 1, dh), jnp.float32),
        )

        pw1_w, pw1_b = lin(D, 2 * inner_conv)
        pw2_w, pw2_b = lin(inner_conv, D)
        bnd = 1.0 / math.sqrt(K)
        blk["conv"] = dict(
            ln_g=ones(D), ln_b=zeros(D),
            pw1_w=pw1_w, pw1_b=pw1_b,
            dw_w=jax.random.uniform(kg(), (K, inner_conv), minval=-bnd, maxval=bnd, dtype=jnp.float32),
            dw_b=jax.random.uniform(kg(), (inner_conv,), minval=-bnd, maxval=bnd, dtype=jnp.float32),
            bn_mean=zeros(inner_conv), bn_var=ones(inner_conv),
            bn_g=ones(inner_conv), bn_b=zeros(inner_conv),
            pw2_w=pw2_w, pw2_b=pw2_b,
        )

        blk["ff2_ln_g"], blk["ff2_ln_b"] = ones(D), zeros(D)
        w1, b1 = lin(D, ff_hidden); w2, b2 = lin(ff_hidden, D)
        blk["ff2"] = dict(w1=w1, b1=b1, w2=w2, b2=b2)
        blk["post_ln_g"], blk["post_ln_b"] = ones(D), zeros(D)
        enc.append(blk)
    params["encoder"] = enc

    params["ctc_w"], params["ctc_b"] = lin(D, nc)
    params["tok_emb"] = 0.02 * jax.random.normal(kg(), (nc, D), jnp.float32)

    dec = []
    for _ in range(cfg["decoder_layers"]):
        lyr = {}
        lyr["sa_wqkv"], lyr["sa_bqkv"] = lin(D, 3 * D)        # packed in_proj (self-attn)
        lyr["sa_wo"], lyr["sa_bo"] = lin(D, D)
        lyr["ca_wq"], lyr["ca_bq"] = lin(D, D)
        lyr["ca_wkv"], lyr["ca_bkv"] = lin(D, 2 * D)          # packed K|V (cross-attn)
        lyr["ca_wo"], lyr["ca_bo"] = lin(D, D)
        lyr["ln1_g"], lyr["ln1_b"] = ones(D), zeros(D)
        lyr["ln2_g"], lyr["ln2_b"] = ones(D), zeros(D)
        lyr["ff1_w"], lyr["ff1_b"] = lin(D, cfg["decoder_ff_dim"])
        lyr["ff2_w"], lyr["ff2_b"] = lin(cfg["decoder_ff_dim"], D)
        lyr["ln3_g"], lyr["ln3_b"] = ones(D), zeros(D)
        dec.append(lyr)
    params["decoder"] = dec

    params["attn_out_w"], params["attn_out_b"] = lin(D, nc)
    return params


# ----------------------------------------------------------------------------- main

if __name__ == "__main__":
    cfg = dict(
        input_dim=16, num_classes=11, encoder_dim=32, depth=2,
        dim_head=8, heads=4, ff_mult=4,
        conv_expansion_factor=2, conv_kernel_size=7,
        decoder_layers=2, decoder_heads=4, decoder_ff_dim=128,
        max_pos_emb=512,
    )
    params = init_params(cfg)

    key = jax.random.PRNGKey(0)
    kx, kt = jax.random.split(key)
    B, T_enc, T_out = 2, 12, 6
    x = jax.random.normal(kx, (B, T_enc, cfg["input_dim"]), dtype=jnp.float32)
    targets = jax.random.randint(kt, (B, T_out), 0, cfg["num_classes"] - 1, dtype=jnp.int32)

    fwd = jax.jit(lambda p, xx, tt: forward(p, xx, tt, cfg, mode="joint"))
    logits_ctc, attn_logits = jax.block_until_ready(fwd(params, x, targets))

    assert logits_ctc.shape == (B, T_enc, cfg["num_classes"])
    assert attn_logits.shape == (B, T_out, cfg["num_classes"])
    assert bool(jnp.isfinite(logits_ctc).all()) and bool(jnp.isfinite(attn_logits).all())
    print("KERNEL_OK")
</pallas_src>

<mosaic_0001>
module attributes {stable_mosaic.version = 11 : i64} {
  func.func @kernel(%arg0: i32, %arg1: i32, %arg2: i32, %arg3: memref<24x16xbf16, #tpu.memory_space<vmem>>, %arg4: memref<16x32xbf16, #tpu.memory_space<vmem>>, %arg5: memref<1x32xf32, #tpu.memory_space<vmem>>, %arg6: memref<24x32xf32, #tpu.memory_space<vmem>>, %arg7: memref<24x32xf32, #tpu.memory_space<vmem>>) attributes {dimension_semantics = [#tpu.dimension_semantics<parallel>, #tpu.dimension_semantics<parallel>, #tpu.dimension_semantics<arbitrary>], iteration_bounds = array<i64: 1, 1, 1>, scalar_prefetch = 0 : i64, scratch_operands = 1 : i64, tpu.core_type = #tpu.core_type<tc>, window_params = [{transform_indices = @transform_0, window_bounds = array<i64: 24, 16>}, {transform_indices = @transform_1, window_bounds = array<i64: 16, 32>}, {transform_indices = @transform_2, window_bounds = array<i64: 1, 32>}, {transform_indices = @transform_3, window_bounds = array<i64: 24, 32>}]} {
    %c0_i32 = arith.constant 0 : i32
    %0 = arith.cmpi eq, %arg2, %c0_i32 : i32
    %1 = arith.extui %0 : i1 to i32
    %c0_i32_0 = arith.constant 0 : i32
    %2 = arith.cmpi ne, %1, %c0_i32_0 : i32
    scf.if %2 {
      %cst_10 = arith.constant 0.000000e+00 : f32
      %12 = vector.broadcast %cst_10 : f32 to vector<24x32xf32>
      %c0_11 = arith.constant 0 : index
      %c0_12 = arith.constant 0 : index
      %13 = vector.load %arg7[%c0_11, %c0_12] : memref<24x32xf32, #tpu.memory_space<vmem>>, vector<24x32xf32>
      tpu.vector_store %arg7[%c0_11, %c0_12], %12 {strides = array<i32>} : memref<24x32xf32, #tpu.memory_space<vmem>>, vector<24x32xf32>,
    } else {
    }
    %c0 = arith.constant 0 : index
    %c0_1 = arith.constant 0 : index
    %3 = vector.load %arg7[%c0, %c0_1] : memref<24x32xf32, #tpu.memory_space<vmem>>, vector<24x32xf32>
    %c0_2 = arith.constant 0 : index
    %c0_3 = arith.constant 0 : index
    %4 = vector.load %arg3[%c0_2, %c0_3] : memref<24x16xbf16, #tpu.memory_space<vmem>>, vector<24x16xbf16>
    %c0_4 = arith.constant 0 : index
    %c0_5 = arith.constant 0 : index
    %5 = vector.load %arg4[%c0_4, %c0_5] : memref<16x32xbf16, #tpu.memory_space<vmem>>, vector<16x32xbf16>
    %cst = arith.constant dense<0.000000e+00> : vector<24x32xf32>
    %6 = tpu.matmul %4, %5, %cst {dimension_numbers = #tpu.dot_dimension_numbers<[1], [0], [0], [1], [0, 0, 1, 1], [], []>} : vector<24x16xbf16>, vector<16x32xbf16>, vector<24x32xf32> -> vector<24x32xf32>
    %7 = arith.addf %3, %6 : vector<24x32xf32>
    %c0_6 = arith.constant 0 : index
    %c0_7 = arith.constant 0 : index
    %8 = vector.load %arg7[%c0_6, %c0_7] : memref<24x32xf32, #tpu.memory_space<vmem>>, vector<24x32xf32>
    tpu.vector_store %arg7[%c0_6, %c0_7], %7 {strides = array<i32>} : memref<24x32xf32, #tpu.memory_space<vmem>>, vector<24x32xf32>,
    %c0_i32_8 = arith.constant 0 : i32
    %9 = arith.cmpi eq, %arg2, %c0_i32_8 : i32
    %10 = arith.extui %9 : i1 to i32
    %c0_i32_9 = arith.constant 0 : i32
    %11 = arith.cmpi ne, %10, %c0_i32_9 : i32
    scf.if %11 {
      %c0_10 = arith.constant 0 : index
      %c0_11 = arith.constant 0 : index
      %12 = vector.load %arg7[%c0_10, %c0_11] : memref<24x32xf32, #tpu.memory_space<vmem>>, vector<24x32xf32>
      %c0_12 = arith.constant 0 : index
      %c0_13 = arith.constant 0 : index
      %13 = vector.load %arg5[%c0_12, %c0_13] : memref<1x32xf32, #tpu.memory_space<vmem>>, vector<1x32xf32>
      %14 = vector.broadcast %13 : vector<1x32xf32> to vector<24x32xf32>
      %15 = arith.addf %12, %14 : vector<24x32xf32>
      %c0_14 = arith.constant 0 : index
      %c0_15 = arith.constant 0 : index
      %16 = vector.load %arg6[%c0_14, %c0_15] : memref<24x32xf32, #tpu.memory_space<vmem>>, vector<24x32xf32>
      tpu.vector_store %arg6[%c0_14, %c0_15], %15 {strides = array<i32>} : memref<24x32xf32, #tpu.memory_space<vmem>>, vector<24x32xf32>,
    } else {
    }
    return
  }
  func.func @transform_0(%arg0: i32, %arg1: i32, %arg2: i32) -> (i32, i32) {
    %c0_i32 = arith.constant 0 : i32
    return %arg0, %arg2 : i32, i32
  }
  func.func @transform_1(%arg0: i32, %arg1: i32, %arg2: i32) -> (i32, i32) {
    %c0_i32 = arith.constant 0 : i32
    return %arg2, %arg1 : i32, i32
  }
  func.func @transform_2(%arg0: i32, %arg1: i32, %arg2: i32) -> (i32, i32) {
    %c0_i32 = arith.constant 0 : i32
    %c0_i32_0 = arith.constant 0 : i32
    return %c0_i32, %arg1 : i32, i32
  }
  func.func @transform_3(%arg0: i32, %arg1: i32, %arg2: i32) -> (i32, i32) {
    %c0_i32 = arith.constant 0 : i32
    return %arg0, %arg1 : i32, i32
  }
}

module attributes {stable_mosaic.version = 11 : i64} {
  func.func @kernel(%arg0: i32, %arg1: i32, %arg2: memref<24x32xf32, #tpu.memory_space<vmem>>, %arg3: memref<1x32xf32, #tpu.memory_space<vmem>>, %arg4: memref<1x32xf32, #tpu.memory_space<vmem>>, %arg5: memref<32x128xbf16, #tpu.memory_space<vmem>>, %arg6: memref<1x128xf32, #tpu.memory_space<vmem>>, %arg7: memref<24x128xbf16, #tpu.memory_space<vmem>>, %arg8: memref<24x32xbf16, #tpu.memory_space<vmem>>) attributes {dimension_semantics = [#tpu.dimension_semantics<parallel>, #tpu.dimension_semantics<arbitrary>], iteration_bounds = array<i64: 1, 1>, scalar_prefetch = 0 : i64, scratch_operands = 1 : i64, tpu.core_type = #tpu.core_type<tc>, window_params = [{transform_indices = @transform_0, window_bounds = array<i64: 24, 32>}, {pipeline_mode = #tpu.pipeline_mode<synchronous>, transform_indices = @transform_1, window_bounds = array<i64: 1, 32>}, {pipeline_mode = #tpu.pipeline_mode<synchronous>, transform_indices = @transform_2, window_bounds = array<i64: 1, 32>}, {transform_indices = @transform_3, window_bounds = array<i64: 32, 128>}, {transform_indices = @transform_4, window_bounds = array<i64: 1, 128>}, {transform_indices = @transform_5, window_bounds = array<i64: 24, 128>}]} {
    %c0_i32 = arith.constant 0 : i32
    %0 = arith.cmpi eq, %arg1, %c0_i32 : i32
    %1 = arith.extui %0 : i1 to i32
    %c0_i32_0 = arith.constant 0 : i32
    %2 = arith.cmpi ne, %1, %c0_i32_0 : i32
    scf.if %2 {
      %c0_9 = arith.constant 0 : index
      %c0_10 = arith.constant 0 : index
      %17 = vector.load %arg2[%c0_9, %c0_10] : memref<24x32xf32, #tpu.memory_space<vmem>>, vector<24x32xf32>
      %cst_11 = arith.constant dense<0.000000e+00> : vector<24xf32>
      %18 = vector.multi_reduction <add>, %17, %cst_11 [1] : vector<24x32xf32> to vector<24xf32>
      %19 = vector.shape_cast %18 : vector<24xf32> to vector<24x1xf32>
      %cst_12 = arith.constant 3.200000e+01 : f32
      %20 = vector.broadcast %cst_12 : f32 to vector<24x1xf32>
      %21 = arith.divf %19, %20 : vector<24x1xf32>
      %22 = vector.broadcast %21 : vector<24x1xf32> to vector<24x32xf32>
      %23 = arith.subf %17, %22 : vector<24x32xf32>
      %24 = arith.mulf %23, %23 : vector<24x32xf32>
      %cst_13 = arith.constant dense<0.000000e+00> : vector<24xf32>
      %25 = vector.multi_reduction <add>, %24, %cst_13 [1] : vector<24x32xf32> to vector<24xf32>
      %26 = vector.shape_cast %25 : vector<24xf32> to vector<24x1xf32>
      %cst_14 = arith.constant 3.200000e+01 : f32
      %27 = vector.broadcast %cst_14 : f32 to vector<24x1xf32>
      %28 = arith.divf %26, %27 : vector<24x1xf32>
      %29 = vector.broadcast %21 : vector<24x1xf32> to vector<24x32xf32>
      %30 = arith.subf %17, %29 : vector<24x32xf32>
      %cst_15 = arith.constant 9.99999974E-6 : f32
      %31 = vector.broadcast %cst_15 : f32 to vector<24x1xf32>
      %32 = arith.addf %28, %31 : vector<24x1xf32>
      %33 = math.rsqrt %32 : vector<24x1xf32>
      %34 = vector.broadcast %33 : vector<24x1xf32> to vector<24x32xf32>
      %35 = arith.mulf %30, %34 : vector<24x32xf32>
      %c0_16 = arith.constant 0 : index
      %c0_17 = arith.constant 0 : index
      %36 = vector.load %arg3[%c0_16, %c0_17] : memref<1x32xf32, #tpu.memory_space<vmem>>, vector<1x32xf32>
      %37 = vector.broadcast %36 : vector<1x32xf32> to vector<24x32xf32>
      %38 = arith.mulf %35, %37 : vector<24x32xf32>
      %c0_18 = arith.constant 0 : index
      %c0_19 = arith.constant 0 : index
      %39 = vector.load %arg4[%c0_18, %c0_19] : memref<1x32xf32, #tpu.memory_space<vmem>>, vector<1x32xf32>
      %40 = vector.broadcast %39 : vector<1x32xf32> to vector<24x32xf32>
      %41 = arith.addf %38, %40 : vector<24x32xf32>
      %42 = arith.truncf %41 : vector<24x32xf32> to vector<24x32xbf16>
      %c0_20 = arith.constant 0 : index
      %c0_21 = arith.constant 0 : index
      %43 = vector.load %arg8[%c0_20, %c0_21] : memref<24x32xbf16, #tpu.memory_space<vmem>>, vector<24x32xbf16>
      tpu.vector_store %arg8[%c0_20, %c0_21], %42 {strides = array<i32>} : memref<24x32xbf16, #tpu.memory_space<vmem>>, vector<24x32xbf16>,
    } else {
    }
    %c0 = arith.constant 0 : index
    %c0_1 = arith.constant 0 : index
    %3 = vector.load %arg8[%c0, %c0_1] : memref<24x32xbf16, #tpu.memory_space<vmem>>, vector<24x32xbf16>
    %c0_2 = arith.constant 0 : index
    %c0_3 = arith.constant 0 : index
    %4 = vector.load %arg5[%c0_2, %c0_3] : memref<32x128xbf16, #tpu.memory_space<vmem>>, vector<32x128xbf16>
    %cst = arith.constant dense<0.000000e+00> : vector<24x128xf32>
    %5 = tpu.matmul %3, %4, %cst {dimension_numbers = #tpu.dot_dimension_numbers<[1], [0], [0], [1], [0, 0, 1, 1], [], []>} : vector<24x32xbf16>, vector<32x128xbf16>, vector<24x128xf32> -> vector<24x128xf32>
    %c0_4 = arith.constant 0 : index
    %c0_5 = arith.constant 0 : index
    %6 = vector.load %arg6[%c0_4, %c0_5] : memref<1x128xf32, #tpu.memory_space<vmem>>, vector<1x128xf32>
    %7 = vector.broadcast %6 : vector<1x128xf32> to vector<24x128xf32>
    %8 = arith.addf %5, %7 : vector<24x128xf32>
    %9 = arith.negf %8 : vector<24x128xf32>
    %10 = math.exp %9 : vector<24x128xf32>
    %cst_6 = arith.constant 1.000000e+00 : f32
    %11 = vector.broadcast %cst_6 : f32 to vector<24x128xf32>
    %12 = arith.addf %11, %10 : vector<24x128xf32>
    %13 = arith.divf %11, %12 : vector<24x128xf32>
    %14 = arith.mulf %8, %13 : vector<24x128xf32>
    %15 = arith.truncf %14 : vector<24x128xf32> to vector<24x128xbf16>
    %c0_7 = arith.constant 0 : index
    %c0_8 = arith.constant 0 : index
    %16 = vector.load %arg7[%c0_7, %c0_8] : memref<24x128xbf16, #tpu.memory_space<vmem>>, vector<24x128xbf16>
    tpu.vector_store %arg7[%c0_7, %c0_8], %15 {strides = array<i32>} : memref<24x128xbf16, #tpu.memory_space<vmem>>, vector<24x128xbf16>,
    return
  }
  func.func @transform_0(%arg0: i32, %arg1: i32) -> (i32, i32) {
    %c0_i32 = arith.constant 0 : i32
    %c0_i32_0 = arith.constant 0 : i32
    return %arg0, %c0_i32 : i32, i32
  }
  func.func @transform_1(%arg0: i32, %arg1: i32) -> (i32, i32) {
    %c0_i32 = arith.constant 0 : i32
    %c0_i32_0 = arith.constant 0 : i32
    %c0_i32_1 = arith.constant 0 : i32
    return %c0_i32, %c0_i32_0 : i32, i32
  }
  func.func @transform_2(%arg0: i32, %arg1: i32) -> (i32, i32) {
    %c0_i32 = arith.constant 0 : i32
    %c0_i32_0 = arith.constant 0 : i32
    %c0_i32_1 = arith.constant 0 : i32
    return %c0_i32, %c0_i32_0 : i32, i32
  }
  func.func @transform_3(%arg0: i32, %arg1: i32) -> (i32, i32) {
    %c0_i32 = arith.constant 0 : i32
    %c0_i32_0 = arith.constant 0 : i32
    return %c0_i32, %arg1 : i32, i32
  }
  func.func @transform_4(%arg0: i32, %arg1: i32) -> (i32, i32) {
    %c0_i32 = arith.constant 0 : i32
    %c0_i32_0 = arith.constant 0 : i32
    return %c0_i32, %arg1 : i32, i32
  }
  func.func @transform_5(%arg0: i32, %arg1: i32) -> (i32, i32) {
    %c0_i32 = arith.constant 0 : i32
    return %arg0, %arg1 : i32, i32
  }
}

module attributes {stable_mosaic.version = 11 : i64} {
  func.func @kernel(%arg0: i32, %arg1: i32, %arg2: memref<24x32xf32, #tpu.memory_space<vmem>>, %arg3: memref<1x32xf32, #tpu.memory_space<vmem>>, %arg4: memref<1x32xf32, #tpu.memory_space<vmem>>, %arg5: memref<32x96xbf16, #tpu.memory_space<vmem>>, %arg6: memref<24x96xbf16, #tpu.memory_space<vmem>>, %arg7: memref<24x32xbf16, #tpu.memory_space<vmem>>) attributes {dimension_semantics = [#tpu.dimension_semantics<parallel>, #tpu.dimension_semantics<arbitrary>], iteration_bounds = array<i64: 1, 1>, scalar_prefetch = 0 : i64, scratch_operands = 1 : i64, tpu.core_type = #tpu.core_type<tc>, window_params = [{transform_indices = @transform_0, window_bounds = array<i64: 24, 32>}, {pipeline_mode = #tpu.pipeline_mode<synchronous>, transform_indices = @transform_1, window_bounds = array<i64: 1, 32>}, {pipeline_mode = #tpu.pipeline_mode<synchronous>, transform_indices = @transform_2, window_bounds = array<i64: 1, 32>}, {transform_indices = @transform_3, window_bounds = array<i64: 32, 96>}, {transform_indices = @transform_4, window_bounds = array<i64: 24, 96>}]} {
    %c0_i32 = arith.constant 0 : i32
    %0 = arith.cmpi eq, %arg1, %c0_i32 : i32
    %1 = arith.extui %0 : i1 to i32
    %c0_i32_0 = arith.constant 0 : i32
    %2 = arith.cmpi ne, %1, %c0_i32_0 : i32
    scf.if %2 {
      %c0_6 = arith.constant 0 : index
      %c0_7 = arith.constant 0 : index
      %8 = vector.load %arg2[%c0_6, %c0_7] : memref<24x32xf32, #tpu.memory_space<vmem>>, vector<24x32xf32>
      %cst_8 = arith.constant dense<0.000000e+00> : vector<24xf32>
      %9 = vector.multi_reduction <add>, %8, %cst_8 [1] : vector<24x32xf32> to vector<24xf32>
      %10 = vector.shape_cast %9 : vector<24xf32> to vector<24x1xf32>
      %cst_9 = arith.constant 3.200000e+01 : f32
      %11 = vector.broadcast %cst_9 : f32 to vector<24x1xf32>
      %12 = arith.divf %10, %11 : vector<24x1xf32>
      %13 = vector.broadcast %12 : vector<24x1xf32> to vector<24x32xf32>
      %14 = arith.subf %8, %13 : vector<24x32xf32>
      %15 = arith.mulf %14, %14 : vector<24x32xf32>
      %cst_10 = arith.constant dense<0.000000e+00> : vector<24xf32>
      %16 = vector.multi_reduction <add>, %15, %cst_10 [1] : vector<24x32xf32> to vector<24xf32>
      %17 = vector.shape_cast %16 : vector<24xf32> to vector<24x1xf32>
      %cst_11 = arith.constant 3.200000e+01 : f32
      %18 = vector.broadcast %cst_11 : f32 to vector<24x1xf32>
      %19 = arith.divf %17, %18 : vector<24x1xf32>
      %20 = vector.broadcast %12 : vector<24x1xf32> to vector<24x32xf32>
      %21 = arith.subf %8, %20 : vector<24x32xf32>
      %cst_12 = arith.constant 9.99999974E-6 : f32
      %22 = vector.broadcast %cst_12 : f32 to vector<24x1xf32>
      %23 = arith.addf %19, %22 : vector<24x1xf32>
      %24 = math.rsqrt %23 : vector<24x1xf32>
      %25 = vector.broadcast %24 : vector<24x1xf32> to vector<24x32xf32>
      %26 = arith.mulf %21, %25 : vector<24x32xf32>
      %c0_13 = arith.constant 0 : index
      %c0_14 = arith.constant 0 : index
      %27 = vector.load %arg3[%c0_13, %c0_14] : memref<1x32xf32, #tpu.memory_space<vmem>>, vector<1x32xf32>
      %28 = vector.broadcast %27 : vector<1x32xf32> to vector<24x32xf32>
      %29 = arith.mulf %26, %28 : vector<24x32xf32>
      %c0_15 = arith.constant 0 : index
      %c0_16 = arith.constant 0 : index
      %30 = vector.load %arg4[%c0_15, %c0_16] : memref<1x32xf32, #tpu.memory_space<vmem>>, vector<1x32xf32>
      %31 = vector.broadcast %30 : vector<1x32xf32> to vector<24x32xf32>
      %32 = arith.addf %29, %31 : vector<24x32xf32>
      %33 = arith.truncf %32 : vector<24x32xf32> to vector<24x32xbf16>
      %c0_17 = arith.constant 0 : index
      %c0_18 = arith.constant 0 : index
      %34 = vector.load %arg7[%c0_17, %c0_18] : memref<24x32xbf16, #tpu.memory_space<vmem>>, vector<24x32xbf16>
      tpu.vector_store %arg7[%c0_17, %c0_18], %33 {strides = array<i32>} : memref<24x32xbf16, #tpu.memory_space<vmem>>, vector<24x32xbf16>,
    } else {
    }
    %c0 = arith.constant 0 : index
    %c0_1 = arith.constant 0 : index
    %3 = vector.load %arg7[%c0, %c0_1] : memref<24x32xbf16, #tpu.memory_space<vmem>>, vector<24x32xbf16>
    %c0_2 = arith.constant 0 : index
    %c0_3 = arith.constant 0 : index
    %4 = vector.load %arg5[%c0_2, %c0_3] : memref<32x96xbf16, #tpu.memory_space<vmem>>, vector<32x96xbf16>
    %cst = arith.constant dense<0.000000e+00> : vector<24x96xf32>
    %5 = tpu.matmul %3, %4, %cst {dimension_numbers = #tpu.dot_dimension_numbers<[1], [0], [0], [1], [0, 0, 1, 1], [], []>} : vector<24x32xbf16>, vector<32x96xbf16>, vector<24x96xf32> -> vector<24x96xf32>
    %6 = arith.truncf %5 : vector<24x96xf32> to vector<24x96xbf16>
    %c0_4 = arith.constant 0 : index
    %c0_5 = arith.constant 0 : index
    %7 = vector.load %arg6[%c0_4, %c0_5] : memref<24x96xbf16, #tpu.memory_space<vmem>>, vector<24x96xbf16>
    tpu.vector_store %arg6[%c0_4, %c0_5], %6 {strides = array<i32>} : memref<24x96xbf16, #tpu.memory_space<vmem>>, vector<24x96xbf16>,
    return
  }
  func.func @transform_0(%arg0: i32, %arg1: i32) -> (i32, i32) {
    %c0_i32 = arith.constant 0 : i32
    %c0_i32_0 = arith.constant 0 : i32
    return %arg0, %c0_i32 : i32, i32
  }
  func.func @transform_1(%arg0: i32, %arg1: i32) -> (i32, i32) {
    %c0_i32 = arith.constant 0 : i32
    %c0_i32_0 = arith.constant 0 : i32
    %c0_i32_1 = arith.constant 0 : i32
    return %c0_i32, %c0_i32_0 : i32, i32
  }
  func.func @transform_2(%arg0: i32, %arg1: i32) -> (i32, i32) {
    %c0_i32 = arith.constant 0 : i32
    %c0_i32_0 = arith.constant 0 : i32
    %c0_i32_1 = arith.constant 0 : i32
    return %c0_i32, %c0_i32_0 : i32, i32
  }
  func.func @transform_3(%arg0: i32, %arg1: i32) -> (i32, i32) {
    %c0_i32 = arith.constant 0 : i32
    %c0_i32_0 = arith.constant 0 : i32
    return %c0_i32, %arg1 : i32, i32
  }
  func.func @transform_4(%arg0: i32, %arg1: i32) -> (i32, i32) {
    %c0_i32 = arith.constant 0 : i32
    return %arg0, %arg1 : i32, i32
  }
}

module attributes {stable_mosaic.version = 11 : i64} {
  func.func @kernel(%arg0: i32, %arg1: i32, %arg2: i32, %arg3: memref<24x128xbf16, #tpu.memory_space<vmem>>, %arg4: memref<128x32xbf16, #tpu.memory_space<vmem>>, %arg5: memref<1x32xf32, #tpu.memory_space<vmem>>, %arg6: memref<24x32xf32, #tpu.memory_space<vmem>>, %arg7: memref<24x32xf32, #tpu.memory_space<vmem>>, %arg8: memref<24x32xf32, #tpu.memory_space<vmem>>) attributes {dimension_semantics = [#tpu.dimension_semantics<parallel>, #tpu.dimension_semantics<parallel>, #tpu.dimension_semantics<arbitrary>], iteration_bounds = array<i64: 1, 1, 1>, scalar_prefetch = 0 : i64, scratch_operands = 1 : i64, tpu.core_type = #tpu.core_type<tc>, window_params = [{transform_indices = @transform_0, window_bounds = array<i64: 24, 128>}, {transform_indices = @transform_1, window_bounds = array<i64: 128, 32>}, {transform_indices = @transform_2, window_bounds = array<i64: 1, 32>}, {transform_indices = @transform_3, window_bounds = array<i64: 24, 32>}, {transform_indices = @transform_4, window_bounds = array<i64: 24, 32>}]} {
    %c0_i32 = arith.constant 0 : i32
    %0 = arith.cmpi eq, %arg2, %c0_i32 : i32
    %1 = arith.extui %0 : i1 to i32
    %c0_i32_0 = arith.constant 0 : i32
    %2 = arith.cmpi ne, %1, %c0_i32_0 : i32
    scf.if %2 {
      %cst_10 = arith.constant 0.000000e+00 : f32
      %12 = vector.broadcast %cst_10 : f32 to vector<24x32xf32>
      %c0_11 = arith.constant 0 : index
      %c0_12 = arith.constant 0 : index
      %13 = vector.load %arg8[%c0_11, %c0_12] : memref<24x32xf32, #tpu.memory_space<vmem>>, vector<24x32xf32>
      tpu.vector_store %arg8[%c0_11, %c0_12], %12 {strides = array<i32>} : memref<24x32xf32, #tpu.memory_space<vmem>>, vector<24x32xf32>,
    } else {
    }
    %c0 = arith.constant 0 : index
    %c0_1 = arith.constant 0 : index
    %3 = vector.load %arg8[%c0, %c0_1] : memref<24x32xf32, #tpu.memory_space<vmem>>, vector<24x32xf32>
    %c0_2 = arith.constant 0 : index
    %c0_3 = arith.constant 0 : index
    %4 = vector.load %arg3[%c0_2, %c0_3] : memref<24x128xbf16, #tpu.memory_space<vmem>>, vector<24x128xbf16>
    %c0_4 = arith.constant 0 : index
    %c0_5 = arith.constant 0 : index
    %5 = vector.load %arg4[%c0_4, %c0_5] : memref<128x32xbf16, #tpu.memory_space<vmem>>, vector<128x32xbf16>
    %cst = arith.constant dense<0.000000e+00> : vector<24x32xf32>
    %6 = tpu.matmul %4, %5, %cst {dimension_numbers = #tpu.dot_dimension_numbers<[1], [0], [0], [1], [0, 0, 1, 1], [], []>} : vector<24x128xbf16>, vector<128x32xbf16>, vector<24x32xf32> -> vector<24x32xf32>
    %7 = arith.addf %3, %6 : vector<24x32xf32>
    %c0_6 = arith.constant 0 : index
    %c0_7 = arith.constant 0 : index
    %8 = vector.load %arg8[%c0_6, %c0_7] : memref<24x32xf32, #tpu.memory_space<vmem>>, vector<24x32xf32>
    tpu.vector_store %arg8[%c0_6, %c0_7], %7 {strides = array<i32>} : memref<24x32xf32, #tpu.memory_space<vmem>>, vector<24x32xf32>,
    %c0_i32_8 = arith.constant 0 : i32
    %9 = arith.cmpi eq, %arg2, %c0_i32_8 : i32
    %10 = arith.extui %9 : i1 to i32
    %c0_i32_9 = arith.constant 0 : i32
    %11 = arith.cmpi ne, %10, %c0_i32_9 : i32
    scf.if %11 {
      %c0_10 = arith.constant 0 : index
      %c0_11 = arith.constant 0 : index
      %12 = vector.load %arg8[%c0_10, %c0_11] : memref<24x32xf32, #tpu.memory_space<vmem>>, vector<24x32xf32>
      %c0_12 = arith.constant 0 : index
      %c0_13 = arith.constant 0 : index
      %13 = vector.load %arg5[%c0_12, %c0_13] : memref<1x32xf32, #tpu.memory_space<vmem>>, vector<1x32xf32>
      %14 = vector.broadcast %13 : vector<1x32xf32> to vector<24x32xf32>
      %15 = arith.addf %12, %14 : vector<24x32xf32>
      %cst_14 = arith.constant 5.000000e-01 : f32
      %16 = vector.broadcast %cst_14 : f32 to vector<24x32xf32>
      %17 = arith.mulf %15, %16 : vector<24x32xf32>
      %c0_15 = arith.constant 0 : index
      %c0_16 = arith.constant 0 : index
      %18 = vector.load %arg6[%c0_15, %c0_16] : memref<24x32xf32, #tpu.memory_space<vmem>>, vector<24x32xf32>
      %19 = arith.addf %17, %18 : vector<24x32xf32>
      %c0_17 = arith.constant 0 : index
      %c0_18 = arith.constant 0 : index
      %20 = vector.load %arg7[%c0_17, %c0_18] : memref<24x32xf32, #tpu.memory_space<vmem>>, vector<24x32xf32>
      tpu.vector_store %arg7[%c0_17, %c0_18], %19 {strides = array<i32>} : memref<24x32xf32, #tpu.memory_space<vmem>>, vector<24x32xf32>,
    } else {
    }
    return
  }
  func.func @transform_0(%arg0: i32, %arg1: i32, %arg2: i32) -> (i32, i32) {
    %c0_i32 = arith.constant 0 : i32
    return %arg0, %arg2 : i32, i32
  }
  func.func @transform_1(%arg0: i32, %arg1: i32, %arg2: i32) -> (i32, i32) {
    %c0_i32 = arith.constant 0 : i32
    return %arg2, %arg1 : i32, i32
  }
  func.func @transform_2(%arg0: i32, %arg1: i32, %arg2: i32) -> (i32, i32) {
    %c0_i32 = arith.constant 0 : i32
    %c0_i32_0 = arith.constant 0 : i32
    return %c0_i32, %arg1 : i32, i32
  }
  func.func @transform_3(%arg0: i32, %arg1: i32, %arg2: i32) -> (i32, i32) {
    %c0_i32 = arith.constant 0 : i32
    return %arg0, %arg1 : i32, i32
  }
  func.func @transform_4(%arg0: i32, %arg1: i32, %arg2: i32) -> (i32, i32) {
    %c0_i32 = arith.constant 0 : i32
    return %arg0, %arg1 : i32, i32
  }
}

module attributes {stable_mosaic.version = 11 : i64} {
  func.func @kernel(%arg0: i32, %arg1: i32, %arg2: i32, %arg3: memref<96x8xbf16, #tpu.memory_space<vmem>>, %arg4: memref<8x23xbf16, #tpu.memory_space<vmem>>, %arg5: memref<96x23xf32, #tpu.memory_space<vmem>>, %arg6: memref<96x23xf32, #tpu.memory_space<vmem>>) attributes {dimension_semantics = [#tpu.dimension_semantics<parallel>, #tpu.dimension_semantics<parallel>, #tpu.dimension_semantics<arbitrary>], iteration_bounds = array<i64: 1, 1, 1>, scalar_prefetch = 0 : i64, scratch_operands = 1 : i64, tpu.core_type = #tpu.core_type<tc>, window_params = [{transform_indices = @transform_0, window_bounds = array<i64: 96, 8>}, {transform_indices = @transform_1, window_bounds = array<i64: 8, 23>}, {transform_indices = @transform_2, window_bounds = array<i64: 96, 23>}]} {
    %c0_i32 = arith.constant 0 : i32
    %0 = arith.cmpi eq, %arg2, %c0_i32 : i32
    %1 = arith.extui %0 : i1 to i32
    %c0_i32_0 = arith.constant 0 : i32
    %2 = arith.cmpi ne, %1, %c0_i32_0 : i32
    scf.if %2 {
      %cst_10 = arith.constant 0.000000e+00 : f32
      %12 = vector.broadcast %cst_10 : f32 to vector<96x23xf32>
      %c0_11 = arith.constant 0 : index
      %c0_12 = arith.constant 0 : index
      %13 = vector.load %arg6[%c0_11, %c0_12] : memref<96x23xf32, #tpu.memory_space<vmem>>, vector<96x23xf32>
      tpu.vector_store %arg6[%c0_11, %c0_12], %12 {strides = array<i32>} : memref<96x23xf32, #tpu.memory_space<vmem>>, vector<96x23xf32>,
    } else {
    }
    %c0 = arith.constant 0 : index
    %c0_1 = arith.constant 0 : index
    %3 = vector.load %arg6[%c0, %c0_1] : memref<96x23xf32, #tpu.memory_space<vmem>>, vector<96x23xf32>
    %c0_2 = arith.constant 0 : index
    %c0_3 = arith.constant 0 : index
    %4 = vector.load %arg3[%c0_2, %c0_3] : memref<96x8xbf16, #tpu.memory_space<vmem>>, vector<96x8xbf16>
    %c0_4 = arith.constant 0 : index
    %c0_5 = arith.constant 0 : index
    %5 = vector.load %arg4[%c0_4, %c0_5] : memref<8x23xbf16, #tpu.memory_space<vmem>>, vector<8x23xbf16>
    %cst = arith.constant dense<0.000000e+00> : vector<96x23xf32>
    %6 = tpu.matmul %4, %5, %cst {dimension_numbers = #tpu.dot_dimension_numbers<[1], [0], [0], [1], [0, 0, 1, 1], [], []>} : vector<96x8xbf16>, vector<8x23xbf16>, vector<96x23xf32> -> vector<96x23xf32>
    %7 = arith.addf %3, %6 : vector<96x23xf32>
    %c0_6 = arith.constant 0 : index
    %c0_7 = arith.constant 0 : index
    %8 = vector.load %arg6[%c0_6, %c0_7] : memref<96x23xf32, #tpu.memory_space<vmem>>, vector<96x23xf32>
    tpu.vector_store %arg6[%c0_6, %c0_7], %7 {strides = array<i32>} : memref<96x23xf32, #tpu.memory_space<vmem>>, vector<96x23xf32>,
    %c0_i32_8 = arith.constant 0 : i32
    %9 = arith.cmpi eq, %arg2, %c0_i32_8 : i32
    %10 = arith.extui %9 : i1 to i32
    %c0_i32_9 = arith.constant 0 : i32
    %11 = arith.cmpi ne, %10, %c0_i32_9 : i32
    scf.if %11 {
      %c0_10 = arith.constant 0 : index
      %c0_11 = arith.constant 0 : index
      %12 = vector.load %arg6[%c0_10, %c0_11] : memref<96x23xf32, #tpu.memory_space<vmem>>, vector<96x23xf32>
      %c0_12 = arith.constant 0 : index
      %c0_13 = arith.constant 0 : index
      %13 = vector.load %arg5[%c0_12, %c0_13] : memref<96x23xf32, #tpu.memory_space<vmem>>, vector<96x23xf32>
      tpu.vector_store %arg5[%c0_12, %c0_13], %12 {strides = array<i32>} : memref<96x23xf32, #tpu.memory_space<vmem>>, vector<96x23xf32>,
    } else {
    }
    return
  }
  func.func @transform_0(%arg0: i32, %arg1: i32, %arg2: i32) -> (i32, i32) {
    %c0_i32 = arith.constant 0 : i32
    return %arg0, %arg2 : i32, i32
  }
  func.func @transform_1(%arg0: i32, %arg1: i32, %arg2: i32) -> (i32, i32) {
    %c0_i32 = arith.constant 0 : i32
    return %arg2, %arg1 : i32, i32
  }
  func.func @transform_2(%arg0: i32, %arg1: i32, %arg2: i32) -> (i32, i32) {
    %c0_i32 = arith.constant 0 : i32
    return %arg0, %arg1 : i32, i32
  }
}

module attributes {stable_mosaic.version = 11 : i64} {
  func.func @kernel(%arg0: i32, %arg1: i32, %arg2: i32, %arg3: memref<1x1x12x8xbf16, #tpu.memory_space<vmem>>, %arg4: memref<1x1x12x8xbf16, #tpu.memory_space<vmem>>, %arg5: memref<1x1x12x8xbf16, #tpu.memory_space<vmem>>, %arg6: memref<1x1x12x12xbf16, #tpu.memory_space<vmem>>, %arg7: memref<1x1x12x8xbf16, #tpu.memory_space<vmem>>) attributes {dimension_semantics = [#tpu.dimension_semantics<parallel>, #tpu.dimension_semantics<parallel>, #tpu.dimension_semantics<parallel>], iteration_bounds = array<i64: 2, 4, 1>, scalar_prefetch = 0 : i64, scratch_operands = 0 : i64, tpu.core_type = #tpu.core_type<tc>, window_params = [{transform_indices = @transform_0, window_bounds = array<i64: 1, 1, 12, 8>}, {transform_indices = @transform_1, window_bounds = array<i64: 1, 1, 12, 8>}, {transform_indices = @transform_2, window_bounds = array<i64: 1, 1, 12, 8>}, {transform_indices = @transform_3, window_bounds = array<i64: 1, 1, 12, 12>}, {transform_indices = @transform_4, window_bounds = array<i64: 1, 1, 12, 8>}]} {
    %c0 = arith.constant 0 : index
    %c0_0 = arith.constant 0 : index
    %c0_1 = arith.constant 0 : index
    %c0_2 = arith.constant 0 : index
    %0 = vector.load %arg3[%c0, %c0_0, %c0_1, %c0_2] : memref<1x1x12x8xbf16, #tpu.memory_space<vmem>>, vector<1x1x12x8xbf16>
    %1 = vector.shape_cast %0 : vector<1x1x12x8xbf16> to vector<12x8xbf16>
    %c0_3 = arith.constant 0 : index
    %c0_4 = arith.constant 0 : index
    %c0_5 = arith.constant 0 : index
    %c0_6 = arith.constant 0 : index
    %2 = vector.load %arg4[%c0_3, %c0_4, %c0_5, %c0_6] : memref<1x1x12x8xbf16, #tpu.memory_space<vmem>>, vector<1x1x12x8xbf16>
    %3 = vector.shape_cast %2 : vector<1x1x12x8xbf16> to vector<12x8xbf16>
    %c0_7 = arith.constant 0 : index
    %c0_8 = arith.constant 0 : index
    %c0_9 = arith.constant 0 : index
    %c0_10 = arith.constant 0 : index
    %4 = vector.load %arg5[%c0_7, %c0_8, %c0_9, %c0_10] : memref<1x1x12x8xbf16, #tpu.memory_space<vmem>>, vector<1x1x12x8xbf16>
    %5 = vector.shape_cast %4 : vector<1x1x12x8xbf16> to vector<12x8xbf16>
    %cst = arith.constant dense<0.000000e+00> : vector<12x12xf32>
    %6 = tpu.matmul %1, %3, %cst {dimension_numbers = #tpu.dot_dimension_numbers<[1], [1], [0], [0], [0, 0, 1, 0], [], []>} : vector<12x8xbf16>, vector<12x8xbf16>, vector<12x12xf32> -> vector<12x12xf32>
    %c0_11 = arith.constant 0 : index
    %c0_12 = arith.constant 0 : index
    %c0_13 = arith.constant 0 : index
    %c0_14 = arith.constant 0 : index
    %7 = vector.load %arg6[%c0_11, %c0_12, %c0_13, %c0_14] : memref<1x1x12x12xbf16, #tpu.memory_space<vmem>>, vector<1x1x12x12xbf16>
    %8 = vector.shape_cast %7 : vector<1x1x12x12xbf16> to vector<12x12xbf16>
    %9 = arith.extf %8 : vector<12x12xbf16> to vector<12x12xf32>
    %10 = arith.addf %6, %9 : vector<12x12xf32>
    %cst_15 = arith.constant 0.353553385 : f32
    %11 = vector.broadcast %cst_15 : f32 to vector<12x12xf32>
    %12 = arith.mulf %10, %11 : vector<12x12xf32>
    %cst_16 = arith.constant dense<0xFF800000> : vector<12xf32>
    %13 = vector.multi_reduction <maximumf>, %12, %cst_16 [1] : vector<12x12xf32> to vector<12xf32>
    %14 = vector.shape_cast %13 : vector<12xf32> to vector<12x1xf32>
    %15 = vector.broadcast %14 : vector<12x1xf32> to vector<12x12xf32>
    %16 = arith.subf %12, %15 : vector<12x12xf32>
    %17 = math.exp %16 : vector<12x12xf32>
    %cst_17 = arith.constant dense<0.000000e+00> : vector<12xf32>
    %18 = vector.multi_reduction <add>, %17, %cst_17 [1] : vector<12x12xf32> to vector<12xf32>
    %19 = vector.shape_cast %18 : vector<12xf32> to vector<12x1xf32>
    %20 = vector.broadcast %19 : vector<12x1xf32> to vector<12x12xf32>
    %21 = arith.divf %17, %20 : vector<12x12xf32>
    %22 = arith.truncf %21 : vector<12x12xf32> to vector<12x12xbf16>
    %cst_18 = arith.constant dense<0.000000e+00> : vector<12x8xf32>
    %23 = tpu.matmul %22, %5, %cst_18 {dimension_numbers = #tpu.dot_dimension_numbers<[1], [0], [0], [1], [0, 0, 1, 1], [], []>} : vector<12x12xbf16>, vector<12x8xbf16>, vector<12x8xf32> -> vector<12x8xf32>
    %24 = arith.truncf %23 : vector<12x8xf32> to vector<12x8xbf16>
    %c0_19 = arith.constant 0 : index
    %c0_20 = arith.constant 0 : index
    %c0_21 = arith.constant 0 : index
    %c0_22 = arith.constant 0 : index
    %25 = vector.load %arg7[%c0_19, %c0_20, %c0_21, %c0_22] : memref<1x1x12x8xbf16, #tpu.memory_space<vmem>>, vector<1x1x12x8xbf16>
    %26 = vector.shape_cast %25 : vector<1x1x12x8xbf16> to vector<12x8xbf16>
    %27 = vector.shape_cast %24 : vector<12x8xbf16> to vector<1x1x12x8xbf16>
    tpu.vector_store %arg7[%c0_19, %c0_20, %c0_21, %c0_22], %27 {strides = array<i32>} : memref<1x1x12x8xbf16, #tpu.memory_space<vmem>>, vector<1x1x12x8xbf16>,
    return
  }
  func.func @transform_0(%arg0: i32, %arg1: i32, %arg2: i32) -> (i32, i32, i32, i32) {
    %c0_i32 = arith.constant 0 : i32
    %c0_i32_0 = arith.constant 0 : i32
    return %arg0, %arg1, %arg2, %c0_i32 : i32, i32, i32, i32
  }
  func.func @transform_1(%arg0: i32, %arg1: i32, %arg2: i32) -> (i32, i32, i32, i32) {
    %c0_i32 = arith.constant 0 : i32
    %c0_i32_0 = arith.constant 0 : i32
    %c0_i32_1 = arith.constant 0 : i32
    return %arg0, %arg1, %c0_i32, %c0_i32_0 : i32, i32, i32, i32
  }
  func.func @transform_2(%arg0: i32, %arg1: i32, %arg2: i32) -> (i32, i32, i32, i32) {
    %c0_i32 = arith.constant 0 : i32
    %c0_i32_0 = arith.constant 0 : i32
    %c0_i32_1 = arith.constant 0 : i32
    return %arg0, %arg1, %c0_i32, %c0_i32_0 : i32, i32, i32, i32
  }
  func.func @transform_3(%arg0: i32, %arg1: i32, %arg2: i32) -> (i32, i32, i32, i32) {
    %c0_i32 = arith.constant 0 : i32
    %c0_i32_0 = arith.constant 0 : i32
    return %arg0, %arg1, %arg2, %c0_i32 : i32, i32, i32, i32
  }
  func.func @transform_4(%arg0: i32, %arg1: i32, %arg2: i32) -> (i32, i32, i32, i32) {
    %c0_i32 = arith.constant 0 : i32
    %c0_i32_0 = arith.constant 0 : i32
    return %arg0, %arg1, %arg2, %c0_i32 : i32, i32, i32, i32
  }
}

module attributes {stable_mosaic.version = 11 : i64} {
  func.func @kernel(%arg0: i32, %arg1: i32, %arg2: i32, %arg3: memref<24x32xbf16, #tpu.memory_space<vmem>>, %arg4: memref<32x32xbf16, #tpu.memory_space<vmem>>, %arg5: memref<1x32xf32, #tpu.memory_space<vmem>>, %arg6: memref<24x32xf32, #tpu.memory_space<vmem>>, %arg7: memref<24x32xf32, #tpu.memory_space<vmem>>, %arg8: memref<24x32xf32, #tpu.memory_space<vmem>>) attributes {dimension_semantics = [#tpu.dimension_semantics<parallel>, #tpu.dimension_semantics<parallel>, #tpu.dimension_semantics<arbitrary>], iteration_bounds = array<i64: 1, 1, 1>, scalar_prefetch = 0 : i64, scratch_operands = 1 : i64, tpu.core_type = #tpu.core_type<tc>, window_params = [{transform_indices = @transform_0, window_bounds = array<i64: 24, 32>}, {transform_indices = @transform_1, window_bounds = array<i64: 32, 32>}, {transform_indices = @transform_2, window_bounds = array<i64: 1, 32>}, {transform_indices = @transform_3, window_bounds = array<i64: 24, 32>}, {transform_indices = @transform_4, window_bounds = array<i64: 24, 32>}]} {
    %c0_i32 = arith.constant 0 : i32
    %0 = arith.cmpi eq, %arg2, %c0_i32 : i32
    %1 = arith.extui %0 : i1 to i32
    %c0_i32_0 = arith.constant 0 : i32
    %2 = arith.cmpi ne, %1, %c0_i32_0 : i32
    scf.if %2 {
      %cst_10 = arith.constant 0.000000e+00 : f32
      %12 = vector.broadcast %cst_10 : f32 to vector<24x32xf32>
      %c0_11 = arith.constant 0 : index
      %c0_12 = arith.constant 0 : index
      %13 = vector.load %arg8[%c0_11, %c0_12] : memref<24x32xf32, #tpu.memory_space<vmem>>, vector<24x32xf32>
      tpu.vector_store %arg8[%c0_11, %c0_12], %12 {strides = array<i32>} : memref<24x32xf32, #tpu.memory_space<vmem>>, vector<24x32xf32>,
    } else {
    }
    %c0 = arith.constant 0 : index
    %c0_1 = arith.constant 0 : index
    %3 = vector.load %arg8[%c0, %c0_1] : memref<24x32xf32, #tpu.memory_space<vmem>>, vector<24x32xf32>
    %c0_2 = arith.constant 0 : index
    %c0_3 = arith.constant 0 : index
    %4 = vector.load %arg3[%c0_2, %c0_3] : memref<24x32xbf16, #tpu.memory_space<vmem>>, vector<24x32xbf16>
    %c0_4 = arith.constant 0 : index
    %c0_5 = arith.constant 0 : index
    %5 = vector.load %arg4[%c0_4, %c0_5] : memref<32x32xbf16, #tpu.memory_space<vmem>>, vector<32x32xbf16>
    %cst = arith.constant dense<0.000000e+00> : vector<24x32xf32>
    %6 = tpu.matmul %4, %5, %cst {dimension_numbers = #tpu.dot_dimension_numbers<[1], [0], [0], [1], [0, 0, 1, 1], [], []>} : vector<24x32xbf16>, vector<32x32xbf16>, vector<24x32xf32> -> vector<24x32xf32>
    %7 = arith.addf %3, %6 : vector<24x32xf32>
    %c0_6 = arith.constant 0 : index
    %c0_7 = arith.constant 0 : index
    %8 = vector.load %arg8[%c0_6, %c0_7] : memref<24x32xf32, #tpu.memory_space<vmem>>, vector<24x32xf32>
    tpu.vector_store %arg8[%c0_6, %c0_7], %7 {strides = array<i32>} : memref<24x32xf32, #tpu.memory_space<vmem>>, vector<24x32xf32>,
    %c0_i32_8 = arith.constant 0 : i32
    %9 = arith.cmpi eq, %arg2, %c0_i32_8 : i32
    %10 = arith.extui %9 : i1 to i32
    %c0_i32_9 = arith.constant 0 : i32
    %11 = arith.cmpi ne, %10, %c0_i32_9 : i32
    scf.if %11 {
      %c0_10 = arith.constant 0 : index
      %c0_11 = arith.constant 0 : index
      %12 = vector.load %arg8[%c0_10, %c0_11] : memref<24x32xf32, #tpu.memory_space<vmem>>, vector<24x32xf32>
      %c0_12 = arith.constant 0 : index
      %c0_13 = arith.constant 0 : index
      %13 = vector.load %arg5[%c0_12, %c0_13] : memref<1x32xf32, #tpu.memory_space<vmem>>, vector<1x32xf32>
      %14 = vector.broadcast %13 : vector<1x32xf32> to vector<24x32xf32>
      %15 = arith.addf %12, %14 : vector<24x32xf32>
      %c0_14 = arith.constant 0 : index
      %c0_15 = arith.constant 0 : index
      %16 = vector.load %arg6[%c0_14, %c0_15] : memref<24x32xf32, #tpu.memory_space<vmem>>, vector<24x32xf32>
      %17 = arith.addf %15, %16 : vector<24x32xf32>
      %c0_16 = arith.constant 0 : index
      %c0_17 = arith.constant 0 : index
      %18 = vector.load %arg7[%c0_16, %c0_17] : memref<24x32xf32, #tpu.memory_space<vmem>>, vector<24x32xf32>
      tpu.vector_store %arg7[%c0_16, %c0_17], %17 {strides = array<i32>} : memref<24x32xf32, #tpu.memory_space<vmem>>, vector<24x32xf32>,
    } else {
    }
    return
  }
  func.func @transform_0(%arg0: i32, %arg1: i32, %arg2: i32) -> (i32, i32) {
    %c0_i32 = arith.constant 0 : i32
    return %arg0, %arg2 : i32, i32
  }
  func.func @transform_1(%arg0: i32, %arg1: i32, %arg2: i32) -> (i32, i32) {
    %c0_i32 = arith.constant 0 : i32
    return %arg2, %arg1 : i32, i32
  }
  func.func @transform_2(%arg0: i32, %arg1: i32, %arg2: i32) -> (i32, i32) {
    %c0_i32 = arith.constant 0 : i32
    %c0_i32_0 = arith.constant 0 : i32
    return %c0_i32, %arg1 : i32, i32
  }
  func.func @transform_3(%arg0: i32, %arg1: i32, %arg2: i32) -> (i32, i32) {
    %c0_i32 = arith.constant 0 : i32
    return %arg0, %arg1 : i32, i32
  }
  func.func @transform_4(%arg0: i32, %arg1: i32, %arg2: i32) -> (i32, i32) {
    %c0_i32 = arith.constant 0 : i32
    return %arg0, %arg1 : i32, i32
  }
}

module attributes {stable_mosaic.version = 11 : i64} {
  func.func @kernel(%arg0: i32, %arg1: i32, %arg2: memref<24x32xf32, #tpu.memory_space<vmem>>, %arg3: memref<1x32xf32, #tpu.memory_space<vmem>>, %arg4: memref<1x32xf32, #tpu.memory_space<vmem>>, %arg5: memref<32x128xbf16, #tpu.memory_space<vmem>>, %arg6: memref<1x128xf32, #tpu.memory_space<vmem>>, %arg7: memref<24x128xbf16, #tpu.memory_space<vmem>>, %arg8: memref<24x32xbf16, #tpu.memory_space<vmem>>) attributes {dimension_semantics = [#tpu.dimension_semantics<parallel>, #tpu.dimension_semantics<arbitrary>], iteration_bounds = array<i64: 1, 1>, scalar_prefetch = 0 : i64, scratch_operands = 1 : i64, tpu.core_type = #tpu.core_type<tc>, window_params = [{transform_indices = @transform_0, window_bounds = array<i64: 24, 32>}, {pipeline_mode = #tpu.pipeline_mode<synchronous>, transform_indices = @transform_1, window_bounds = array<i64: 1, 32>}, {pipeline_mode = #tpu.pipeline_mode<synchronous>, transform_indices = @transform_2, window_bounds = array<i64: 1, 32>}, {transform_indices = @transform_3, window_bounds = array<i64: 32, 128>}, {transform_indices = @transform_4, window_bounds = array<i64: 1, 128>}, {transform_indices = @transform_5, window_bounds = array<i64: 24, 128>}]} {
    %c0_i32 = arith.constant 0 : i32
    %0 = arith.cmpi eq, %arg1, %c0_i32 : i32
    %1 = arith.extui %0 : i1 to i32
    %c0_i32_0 = arith.constant 0 : i32
    %2 = arith.cmpi ne, %1, %c0_i32_0 : i32
    scf.if %2 {
      %c0_8 = arith.constant 0 : index
      %c0_9 = arith.constant 0 : index
      %11 = vector.load %arg2[%c0_8, %c0_9] : memref<24x32xf32, #tpu.memory_space<vmem>>, vector<24x32xf32>
      %cst_10 = arith.constant dense<0.000000e+00> : vector<24xf32>
      %12 = vector.multi_reduction <add>, %11, %cst_10 [1] : vector<24x32xf32> to vector<24xf32>
      %13 = vector.shape_cast %12 : vector<24xf32> to vector<24x1xf32>
      %cst_11 = arith.constant 3.200000e+01 : f32
      %14 = vector.broadcast %cst_11 : f32 to vector<24x1xf32>
      %15 = arith.divf %13, %14 : vector<24x1xf32>
      %16 = vector.broadcast %15 : vector<24x1xf32> to vector<24x32xf32>
      %17 = arith.subf %11, %16 : vector<24x32xf32>
      %18 = arith.mulf %17, %17 : vector<24x32xf32>
      %cst_12 = arith.constant dense<0.000000e+00> : vector<24xf32>
      %19 = vector.multi_reduction <add>, %18, %cst_12 [1] : vector<24x32xf32> to vector<24xf32>
      %20 = vector.shape_cast %19 : vector<24xf32> to vector<24x1xf32>
      %cst_13 = arith.constant 3.200000e+01 : f32
      %21 = vector.broadcast %cst_13 : f32 to vector<24x1xf32>
      %22 = arith.divf %20, %21 : vector<24x1xf32>
      %23 = vector.broadcast %15 : vector<24x1xf32> to vector<24x32xf32>
      %24 = arith.subf %11, %23 : vector<24x32xf32>
      %cst_14 = arith.constant 9.99999974E-6 : f32
      %25 = vector.broadcast %cst_14 : f32 to vector<24x1xf32>
      %26 = arith.addf %22, %25 : vector<24x1xf32>
      %27 = math.rsqrt %26 : vector<24x1xf32>
      %28 = vector.broadcast %27 : vector<24x1xf32> to vector<24x32xf32>
      %29 = arith.mulf %24, %28 : vector<24x32xf32>
      %c0_15 = arith.constant 0 : index
      %c0_16 = arith.constant 0 : index
      %30 = vector.load %arg3[%c0_15, %c0_16] : memref<1x32xf32, #tpu.memory_space<vmem>>, vector<1x32xf32>
      %31 = vector.broadcast %30 : vector<1x32xf32> to vector<24x32xf32>
      %32 = arith.mulf %29, %31 : vector<24x32xf32>
      %c0_17 = arith.constant 0 : index
      %c0_18 = arith.constant 0 : index
      %33 = vector.load %arg4[%c0_17, %c0_18] : memref<1x32xf32, #tpu.memory_space<vmem>>, vector<1x32xf32>
      %34 = vector.broadcast %33 : vector<1x32xf32> to vector<24x32xf32>
      %35 = arith.addf %32, %34 : vector<24x32xf32>
      %36 = arith.truncf %35 : vector<24x32xf32> to vector<24x32xbf16>
      %c0_19 = arith.constant 0 : index
      %c0_20 = arith.constant 0 : index
      %37 = vector.load %arg8[%c0_19, %c0_20] : memref<24x32xbf16, #tpu.memory_space<vmem>>, vector<24x32xbf16>
      tpu.vector_store %arg8[%c0_19, %c0_20], %36 {strides = array<i32>} : memref<24x32xbf16, #tpu.memory_space<vmem>>, vector<24x32xbf16>,
    } else {
    }
    %c0 = arith.constant 0 : index
    %c0_1 = arith.constant 0 : index
    %3 = vector.load %arg8[%c0, %c0_1] : memref<24x32xbf16, #tpu.memory_space<vmem>>, vector<24x32xbf16>
    %c0_2 = arith.constant 0 : index
    %c0_3 = arith.constant 0 : index
    %4 = vector.load %arg5[%c0_2, %c0_3] : memref<32x128xbf16, #tpu.memory_space<vmem>>, vector<32x128xbf16>
    %cst = arith.constant dense<0.000000e+00> : vector<24x128xf32>
    %5 = tpu.matmul %3, %4, %cst {dimension_numbers = #tpu.dot_dimension_numbers<[1], [0], [0], [1], [0, 0, 1, 1], [], []>} : vector<24x32xbf16>, vector<32x128xbf16>, vector<24x128xf32> -> vector<24x128xf32>
    %c0_4 = arith.constant 0 : index
    %c0_5 = arith.constant 0 : index
    %6 = vector.load %arg6[%c0_4, %c0_5] : memref<1x128xf32, #tpu.memory_space<vmem>>, vector<1x128xf32>
    %7 = vector.broadcast %6 : vector<1x128xf32> to vector<24x128xf32>
    %8 = arith.addf %5, %7 : vector<24x128xf32>
    %9 = arith.truncf %8 : vector<24x128xf32> to vector<24x128xbf16>
    %c0_6 = arith.constant 0 : index
    %c0_7 = arith.constant 0 : index
    %10 = vector.load %arg7[%c0_6, %c0_7] : memref<24x128xbf16, #tpu.memory_space<vmem>>, vector<24x128xbf16>
    tpu.vector_store %arg7[%c0_6, %c0_7], %9 {strides = array<i32>} : memref<24x128xbf16, #tpu.memory_space<vmem>>, vector<24x128xbf16>,
    return
  }
  func.func @transform_0(%arg0: i32, %arg1: i32) -> (i32, i32) {
    %c0_i32 = arith.constant 0 : i32
    %c0_i32_0 = arith.constant 0 : i32
    return %arg0, %c0_i32 : i32, i32
  }
  func.func @transform_1(%arg0: i32, %arg1: i32) -> (i32, i32) {
    %c0_i32 = arith.constant 0 : i32
    %c0_i32_0 = arith.constant 0 : i32
    %c0_i32_1 = arith.constant 0 : i32
    return %c0_i32, %c0_i32_0 : i32, i32
  }
  func.func @transform_2(%arg0: i32, %arg1: i32) -> (i32, i32) {
    %c0_i32 = arith.constant 0 : i32
    %c0_i32_0 = arith.constant 0 : i32
    %c0_i32_1 = arith.constant 0 : i32
    return %c0_i32, %c0_i32_0 : i32, i32
  }
  func.func @transform_3(%arg0: i32, %arg1: i32) -> (i32, i32) {
    %c0_i32 = arith.constant 0 : i32
    %c0_i32_0 = arith.constant 0 : i32
    return %c0_i32, %arg1 : i32, i32
  }
  func.func @transform_4(%arg0: i32, %arg1: i32) -> (i32, i32) {
    %c0_i32 = arith.constant 0 : i32
    %c0_i32_0 = arith.constant 0 : i32
    return %c0_i32, %arg1 : i32, i32
  }
  func.func @transform_5(%arg0: i32, %arg1: i32) -> (i32, i32) {
    %c0_i32 = arith.constant 0 : i32
    return %arg0, %arg1 : i32, i32
  }
}

module attributes {stable_mosaic.version = 11 : i64} {
  func.func @kernel(%arg0: i32, %arg1: memref<1x18x128xbf16, #tpu.memory_space<vmem>>, %arg2: memref<7x64xf32, #tpu.memory_space<vmem>>, %arg3: memref<1x64xf32, #tpu.memory_space<vmem>>, %arg4: memref<1x64xf32, #tpu.memory_space<vmem>>, %arg5: memref<1x12x64xbf16, #tpu.memory_space<vmem>>) attributes {dimension_semantics = [#tpu.dimension_semantics<parallel>], iteration_bounds = array<i64: 2>, scalar_prefetch = 0 : i64, scratch_operands = 0 : i64, tpu.core_type = #tpu.core_type<tc>, window_params = [{transform_indices = @transform_0, window_bounds = array<i64: 1, 18, 128>}, {pipeline_mode = #tpu.pipeline_mode<synchronous>, transform_indices = @transform_1, window_bounds = array<i64: 7, 64>}, {pipeline_mode = #tpu.pipeline_mode<synchronous>, transform_indices = @transform_2, window_bounds = array<i64: 1, 64>}, {pipeline_mode = #tpu.pipeline_mode<synchronous>, transform_indices = @transform_3, window_bounds = array<i64: 1, 64>}, {transform_indices = @transform_4, window_bounds = array<i64: 1, 12, 64>}]} {
    %c0 = arith.constant 0 : index
    %c0_0 = arith.constant 0 : index
    %c0_1 = arith.constant 0 : index
    %0 = vector.load %arg1[%c0, %c0_0, %c0_1] : memref<1x18x128xbf16, #tpu.memory_space<vmem>>, vector<1x18x128xbf16>
    %1 = vector.shape_cast %0 : vector<1x18x128xbf16> to vector<18x128xbf16>
    %2 = arith.extf %1 : vector<18x128xbf16> to vector<18x128xf32>
    %3 = vector.extract_strided_slice %2 {offsets = [0, 0], sizes = [18, 64], strides = [1, 1]} : vector<18x128xf32> to vector<18x64xf32>
    %4 = vector.extract_strided_slice %2 {offsets = [0, 64], sizes = [18, 64], strides = [1, 1]} : vector<18x128xf32> to vector<18x64xf32>
    %5 = arith.negf %4 : vector<18x64xf32>
    %6 = math.exp %5 : vector<18x64xf32>
    %cst = arith.constant 1.000000e+00 : f32
    %7 = vector.broadcast %cst : f32 to vector<18x64xf32>
    %8 = arith.addf %7, %6 : vector<18x64xf32>
    %9 = arith.divf %7, %8 : vector<18x64xf32>
    %10 = arith.mulf %3, %9 : vector<18x64xf32>
    %c0_2 = arith.constant 0 : index
    %c0_3 = arith.constant 0 : index
    %11 = vector.load %arg2[%c0_2, %c0_3] : memref<7x64xf32, #tpu.memory_space<vmem>>, vector<7x64xf32>
    %12 = vector.extract_strided_slice %10 {offsets = [0, 0], sizes = [12, 64], strides = [1, 1]} : vector<18x64xf32> to vector<12x64xf32>
    %13 = vector.extract_strided_slice %11 {offsets = [0, 0], sizes = [1, 64], strides = [1, 1]} : vector<7x64xf32> to vector<1x64xf32>
    %14 = vector.broadcast %13 : vector<1x64xf32> to vector<12x64xf32>
    %15 = arith.mulf %12, %14 : vector<12x64xf32>
    %16 = vector.extract_strided_slice %10 {offsets = [1, 0], sizes = [12, 64], strides = [1, 1]} : vector<18x64xf32> to vector<12x64xf32>
    %17 = vector.extract_strided_slice %11 {offsets = [1, 0], sizes = [1, 64], strides = [1, 1]} : vector<7x64xf32> to vector<1x64xf32>
    %18 = vector.broadcast %17 : vector<1x64xf32> to vector<12x64xf32>
    %19 = arith.mulf %16, %18 : vector<12x64xf32>
    %20 = arith.addf %15, %19 : vector<12x64xf32>
    %21 = vector.extract_strided_slice %10 {offsets = [2, 0], sizes = [12, 64], strides = [1, 1]} : vector<18x64xf32> to vector<12x64xf32>
    %22 = vector.extract_strided_slice %11 {offsets = [2, 0], sizes = [1, 64], strides = [1, 1]} : vector<7x64xf32> to vector<1x64xf32>
    %23 = vector.broadcast %22 : vector<1x64xf32> to vector<12x64xf32>
    %24 = arith.mulf %21, %23 : vector<12x64xf32>
    %25 = arith.addf %20, %24 : vector<12x64xf32>
    %26 = vector.extract_strided_slice %10 {offsets = [3, 0], sizes = [12, 64], strides = [1, 1]} : vector<18x64xf32> to vector<12x64xf32>
    %27 = vector.extract_strided_slice %11 {offsets = [3, 0], sizes = [1, 64], strides = [1, 1]} : vector<7x64xf32> to vector<1x64xf32>
    %28 = vector.broadcast %27 : vector<1x64xf32> to vector<12x64xf32>
    %29 = arith.mulf %26, %28 : vector<12x64xf32>
    %30 = arith.addf %25, %29 : vector<12x64xf32>
    %31 = vector.extract_strided_slice %10 {offsets = [4, 0], sizes = [12, 64], strides = [1, 1]} : vector<18x64xf32> to vector<12x64xf32>
    %32 = vector.extract_strided_slice %11 {offsets = [4, 0], sizes = [1, 64], strides = [1, 1]} : vector<7x64xf32> to vector<1x64xf32>
    %33 = vector.broadcast %32 : vector<1x64xf32> to vector<12x64xf32>
    %34 = arith.mulf %31, %33 : vector<12x64xf32>
    %35 = arith.addf %30, %34 : vector<12x64xf32>
    %36 = vector.extract_strided_slice %10 {offsets = [5, 0], sizes = [12, 64], strides = [1, 1]} : vector<18x64xf32> to vector<12x64xf32>
    %37 = vector.extract_strided_slice %11 {offsets = [5, 0], sizes = [1, 64], strides = [1, 1]} : vector<7x64xf32> to vector<1x64xf32>
    %38 = vector.broadcast %37 : vector<1x64xf32> to vector<12x64xf32>
    %39 = arith.mulf %36, %38 : vector<12x64xf32>
    %40 = arith.addf %35, %39 : vector<12x64xf32>
    %41 = vector.extract_strided_slice %10 {offsets = [6, 0], sizes = [12, 64], strides = [1, 1]} : vector<18x64xf32> to vector<12x64xf32>
    %42 = vector.extract_strided_slice %11 {offsets = [6, 0], sizes = [1, 64], strides = [1, 1]} : vector<7x64xf32> to vector<1x64xf32>
    %43 = vector.broadcast %42 : vector<1x64xf32> to vector<12x64xf32>
    %44 = arith.mulf %41, %43 : vector<12x64xf32>
    %45 = arith.addf %40, %44 : vector<12x64xf32>
    %c0_4 = arith.constant 0 : index
    %c0_5 = arith.constant 0 : index
    %46 = vector.load %arg3[%c0_4, %c0_5] : memref<1x64xf32, #tpu.memory_space<vmem>>, vector<1x64xf32>
    %47 = vector.broadcast %46 : vector<1x64xf32> to vector<12x64xf32>
    %48 = arith.mulf %45, %47 : vector<12x64xf32>
    %c0_6 = arith.constant 0 : index
    %c0_7 = arith.constant 0 : index
    %49 = vector.load %arg4[%c0_6, %c0_7] : memref<1x64xf32, #tpu.memory_space<vmem>>, vector<1x64xf32>
    %50 = vector.broadcast %49 : vector<1x64xf32> to vector<12x64xf32>
    %51 = arith.addf %48, %50 : vector<12x64xf32>
    %52 = arith.negf %51 : vector<12x64xf32>
    %53 = math.exp %52 : vector<12x64xf32>
    %cst_8 = arith.constant 1.000000e+00 : f32
    %54 = vector.broadcast %cst_8 : f32 to vector<12x64xf32>
    %55 = arith.addf %54, %53 : vector<12x64xf32>
    %56 = arith.divf %54, %55 : vector<12x64xf32>
    %57 = arith.mulf %51, %56 : vector<12x64xf32>
    %58 = arith.truncf %57 : vector<12x64xf32> to vector<12x64xbf16>
    %c0_9 = arith.constant 0 : index
    %c0_10 = arith.constant 0 : index
    %c0_11 = arith.constant 0 : index
    %59 = vector.load %arg5[%c0_9, %c0_10, %c0_11] : memref<1x12x64xbf16, #tpu.memory_space<vmem>>, vector<1x12x64xbf16>
    %60 = vector.shape_cast %59 : vector<1x12x64xbf16> to vector<12x64xbf16>
    %61 = vector.shape_cast %58 : vector<12x64xbf16> to vector<1x12x64xbf16>
    tpu.vector_store %arg5[%c0_9, %c0_10, %c0_11], %61 {strides = array<i32>} : memref<1x12x64xbf16, #tpu.memory_space<vmem>>, vector<1x12x64xbf16>,
    return
  }
  func.func @transform_0(%arg0: i32) -> (i32, i32, i32) {
    %c0_i32 = arith.constant 0 : i32
    %c0_i32_0 = arith.constant 0 : i32
    %c0_i32_1 = arith.constant 0 : i32
    return %arg0, %c0_i32, %c0_i32_0 : i32, i32, i32
  }
  func.func @transform_1(%arg0: i32) -> (i32, i32) {
    %c0_i32 = arith.constant 0 : i32
    %c0_i32_0 = arith.constant 0 : i32
    %c0_i32_1 = arith.constant 0 : i32
    return %c0_i32, %c0_i32_0 : i32, i32
  }
  func.func @transform_2(%arg0: i32) -> (i32, i32) {
    %c0_i32 = arith.constant 0 : i32
    %c0_i32_0 = arith.constant 0 : i32
    %c0_i32_1 = arith.constant 0 : i32
    return %c0_i32, %c0_i32_0 : i32, i32
  }
  func.func @transform_3(%arg0: i32) -> (i32, i32) {
    %c0_i32 = arith.constant 0 : i32
    %c0_i32_0 = arith.constant 0 : i32
    %c0_i32_1 = arith.constant 0 : i32
    return %c0_i32, %c0_i32_0 : i32, i32
  }
  func.func @transform_4(%arg0: i32) -> (i32, i32, i32) {
    %c0_i32 = arith.constant 0 : i32
    %c0_i32_0 = arith.constant 0 : i32
    %c0_i32_1 = arith.constant 0 : i32
    return %arg0, %c0_i32, %c0_i32_0 : i32, i32, i32
  }
}

module attributes {stable_mosaic.version = 11 : i64} {
  func.func @kernel(%arg0: i32, %arg1: memref<24x32xf32, #tpu.memory_space<vmem>>, %arg2: memref<1x32xf32, #tpu.memory_space<vmem>>, %arg3: memref<1x32xf32, #tpu.memory_space<vmem>>, %arg4: memref<24x32xf32, #tpu.memory_space<vmem>>) attributes {dimension_semantics = [#tpu.dimension_semantics<parallel>], iteration_bounds = array<i64: 1>, scalar_prefetch = 0 : i64, scratch_operands = 0 : i64, tpu.core_type = #tpu.core_type<tc>, window_params = [{transform_indices = @transform_0, window_bounds = array<i64: 24, 32>}, {pipeline_mode = #tpu.pipeline_mode<synchronous>, transform_indices = @transform_1, window_bounds = array<i64: 1, 32>}, {pipeline_mode = #tpu.pipeline_mode<synchronous>, transform_indices = @transform_2, window_bounds = array<i64: 1, 32>}, {transform_indices = @transform_3, window_bounds = array<i64: 24, 32>}]} {
    %c0 = arith.constant 0 : index
    %c0_0 = arith.constant 0 : index
    %0 = vector.load %arg1[%c0, %c0_0] : memref<24x32xf32, #tpu.memory_space<vmem>>, vector<24x32xf32>
    %cst = arith.constant dense<0.000000e+00> : vector<24xf32>
    %1 = vector.multi_reduction <add>, %0, %cst [1] : vector<24x32xf32> to vector<24xf32>
    %2 = vector.shape_cast %1 : vector<24xf32> to vector<24x1xf32>
    %cst_1 = arith.constant 3.200000e+01 : f32
    %3 = vector.broadcast %cst_1 : f32 to vector<24x1xf32>
    %4 = arith.divf %2, %3 : vector<24x1xf32>
    %5 = vector.broadcast %4 : vector<24x1xf32> to vector<24x32xf32>
    %6 = arith.subf %0, %5 : vector<24x32xf32>
    %7 = arith.mulf %6, %6 : vector<24x32xf32>
    %cst_2 = arith.constant dense<0.000000e+00> : vector<24xf32>
    %8 = vector.multi_reduction <add>, %7, %cst_2 [1] : vector<24x32xf32> to vector<24xf32>
    %9 = vector.shape_cast %8 : vector<24xf32> to vector<24x1xf32>
    %cst_3 = arith.constant 3.200000e+01 : f32
    %10 = vector.broadcast %cst_3 : f32 to vector<24x1xf32>
    %11 = arith.divf %9, %10 : vector<24x1xf32>
    %12 = vector.broadcast %4 : vector<24x1xf32> to vector<24x32xf32>
    %13 = arith.subf %0, %12 : vector<24x32xf32>
    %cst_4 = arith.constant 9.99999974E-6 : f32
    %14 = vector.broadcast %cst_4 : f32 to vector<24x1xf32>
    %15 = arith.addf %11, %14 : vector<24x1xf32>
    %16 = math.rsqrt %15 : vector<24x1xf32>
    %17 = vector.broadcast %16 : vector<24x1xf32> to vector<24x32xf32>
    %18 = arith.mulf %13, %17 : vector<24x32xf32>
    %c0_5 = arith.constant 0 : index
    %c0_6 = arith.constant 0 : index
    %19 = vector.load %arg2[%c0_5, %c0_6] : memref<1x32xf32, #tpu.memory_space<vmem>>, vector<1x32xf32>
    %20 = vector.broadcast %19 : vector<1x32xf32> to vector<24x32xf32>
    %21 = arith.mulf %18, %20 : vector<24x32xf32>
    %c0_7 = arith.constant 0 : index
    %c0_8 = arith.constant 0 : index
    %22 = vector.load %arg3[%c0_7, %c0_8] : memref<1x32xf32, #tpu.memory_space<vmem>>, vector<1x32xf32>
    %23 = vector.broadcast %22 : vector<1x32xf32> to vector<24x32xf32>
    %24 = arith.addf %21, %23 : vector<24x32xf32>
    %c0_9 = arith.constant 0 : index
    %c0_10 = arith.constant 0 : index
    %25 = vector.load %arg4[%c0_9, %c0_10] : memref<24x32xf32, #tpu.memory_space<vmem>>, vector<24x32xf32>
    tpu.vector_store %arg4[%c0_9, %c0_10], %24 {strides = array<i32>} : memref<24x32xf32, #tpu.memory_space<vmem>>, vector<24x32xf32>,
    return
  }
  func.func @transform_0(%arg0: i32) -> (i32, i32) {
    %c0_i32 = arith.constant 0 : i32
    %c0_i32_0 = arith.constant 0 : i32
    return %arg0, %c0_i32 : i32, i32
  }
  func.func @transform_1(%arg0: i32) -> (i32, i32) {
    %c0_i32 = arith.constant 0 : i32
    %c0_i32_0 = arith.constant 0 : i32
    %c0_i32_1 = arith.constant 0 : i32
    return %c0_i32, %c0_i32_0 : i32, i32
  }
  func.func @transform_2(%arg0: i32) -> (i32, i32) {
    %c0_i32 = arith.constant 0 : i32
    %c0_i32_0 = arith.constant 0 : i32
    %c0_i32_1 = arith.constant 0 : i32
    return %c0_i32, %c0_i32_0 : i32, i32
  }
  func.func @transform_3(%arg0: i32) -> (i32, i32) {
    %c0_i32 = arith.constant 0 : i32
    %c0_i32_0 = arith.constant 0 : i32
    return %arg0, %c0_i32 : i32, i32
  }
}

module attributes {stable_mosaic.version = 11 : i64} {
  func.func @kernel(%arg0: i32, %arg1: i32, %arg2: i32, %arg3: memref<24x64xbf16, #tpu.memory_space<vmem>>, %arg4: memref<64x32xbf16, #tpu.memory_space<vmem>>, %arg5: memref<1x32xf32, #tpu.memory_space<vmem>>, %arg6: memref<24x32xf32, #tpu.memory_space<vmem>>, %arg7: memref<24x32xf32, #tpu.memory_space<vmem>>, %arg8: memref<24x32xf32, #tpu.memory_space<vmem>>) attributes {dimension_semantics = [#tpu.dimension_semantics<parallel>, #tpu.dimension_semantics<parallel>, #tpu.dimension_semantics<arbitrary>], iteration_bounds = array<i64: 1, 1, 1>, scalar_prefetch = 0 : i64, scratch_operands = 1 : i64, tpu.core_type = #tpu.core_type<tc>, window_params = [{transform_indices = @transform_0, window_bounds = array<i64: 24, 64>}, {transform_indices = @transform_1, window_bounds = array<i64: 64, 32>}, {transform_indices = @transform_2, window_bounds = array<i64: 1, 32>}, {transform_indices = @transform_3, window_bounds = array<i64: 24, 32>}, {transform_indices = @transform_4, window_bounds = array<i64: 24, 32>}]} {
    %c0_i32 = arith.constant 0 : i32
    %0 = arith.cmpi eq, %arg2, %c0_i32 : i32
    %1 = arith.extui %0 : i1 to i32
    %c0_i32_0 = arith.constant 0 : i32
    %2 = arith.cmpi ne, %1, %c0_i32_0 : i32
    scf.if %2 {
      %cst_10 = arith.constant 0.000000e+00 : f32
      %12 = vector.broadcast %cst_10 : f32 to vector<24x32xf32>
      %c0_11 = arith.constant 0 : index
      %c0_12 = arith.constant 0 : index
      %13 = vector.load %arg8[%c0_11, %c0_12] : memref<24x32xf32, #tpu.memory_space<vmem>>, vector<24x32xf32>
      tpu.vector_store %arg8[%c0_11, %c0_12], %12 {strides = array<i32>} : memref<24x32xf32, #tpu.memory_space<vmem>>, vector<24x32xf32>,
    } else {
    }
    %c0 = arith.constant 0 : index
    %c0_1 = arith.constant 0 : index
    %3 = vector.load %arg8[%c0, %c0_1] : memref<24x32xf32, #tpu.memory_space<vmem>>, vector<24x32xf32>
    %c0_2 = arith.constant 0 : index
    %c0_3 = arith.constant 0 : index
    %4 = vector.load %arg3[%c0_2, %c0_3] : memref<24x64xbf16, #tpu.memory_space<vmem>>, vector<24x64xbf16>
    %c0_4 = arith.constant 0 : index
    %c0_5 = arith.constant 0 : index
    %5 = vector.load %arg4[%c0_4, %c0_5] : memref<64x32xbf16, #tpu.memory_space<vmem>>, vector<64x32xbf16>
    %cst = arith.constant dense<0.000000e+00> : vector<24x32xf32>
    %6 = tpu.matmul %4, %5, %cst {dimension_numbers = #tpu.dot_dimension_numbers<[1], [0], [0], [1], [0, 0, 1, 1], [], []>} : vector<24x64xbf16>, vector<64x32xbf16>, vector<24x32xf32> -> vector<24x32xf32>
    %7 = arith.addf %3, %6 : vector<24x32xf32>
    %c0_6 = arith.constant 0 : index
    %c0_7 = arith.constant 0 : index
    %8 = vector.load %arg8[%c0_6, %c0_7] : memref<24x32xf32, #tpu.memory_space<vmem>>, vector<24x32xf32>
    tpu.vector_store %arg8[%c0_6, %c0_7], %7 {strides = array<i32>} : memref<24x32xf32, #tpu.memory_space<vmem>>, vector<24x32xf32>,
    %c0_i32_8 = arith.constant 0 : i32
    %9 = arith.cmpi eq, %arg2, %c0_i32_8 : i32
    %10 = arith.extui %9 : i1 to i32
    %c0_i32_9 = arith.constant 0 : i32
    %11 = arith.cmpi ne, %10, %c0_i32_9 : i32
    scf.if %11 {
      %c0_10 = arith.constant 0 : index
      %c0_11 = arith.constant 0 : index
      %12 = vector.load %arg8[%c0_10, %c0_11] : memref<24x32xf32, #tpu.memory_space<vmem>>, vector<24x32xf32>
      %c0_12 = arith.constant 0 : index
      %c0_13 = arith.constant 0 : index
      %13 = vector.load %arg5[%c0_12, %c0_13] : memref<1x32xf32, #tpu.memory_space<vmem>>, vector<1x32xf32>
      %14 = vector.broadcast %13 : vector<1x32xf32> to vector<24x32xf32>
      %15 = arith.addf %12, %14 : vector<24x32xf32>
      %c0_14 = arith.constant 0 : index
      %c0_15 = arith.constant 0 : index
      %16 = vector.load %arg6[%c0_14, %c0_15] : memref<24x32xf32, #tpu.memory_space<vmem>>, vector<24x32xf32>
      %17 = arith.addf %15, %16 : vector<24x32xf32>
      %c0_16 = arith.constant 0 : index
      %c0_17 = arith.constant 0 : index
      %18 = vector.load %arg7[%c0_16, %c0_17] : memref<24x32xf32, #tpu.memory_space<vmem>>, vector<24x32xf32>
      tpu.vector_store %arg7[%c0_16, %c0_17], %17 {strides = array<i32>} : memref<24x32xf32, #tpu.memory_space<vmem>>, vector<24x32xf32>,
    } else {
    }
    return
  }
  func.func @transform_0(%arg0: i32, %arg1: i32, %arg2: i32) -> (i32, i32) {
    %c0_i32 = arith.constant 0 : i32
    return %arg0, %arg2 : i32, i32
  }
  func.func @transform_1(%arg0: i32, %arg1: i32, %arg2: i32) -> (i32, i32) {
    %c0_i32 = arith.constant 0 : i32
    return %arg2, %arg1 : i32, i32
  }
  func.func @transform_2(%arg0: i32, %arg1: i32, %arg2: i32) -> (i32, i32) {
    %c0_i32 = arith.constant 0 : i32
    %c0_i32_0 = arith.constant 0 : i32
    return %c0_i32, %arg1 : i32, i32
  }
  func.func @transform_3(%arg0: i32, %arg1: i32, %arg2: i32) -> (i32, i32) {
    %c0_i32 = arith.constant 0 : i32
    return %arg0, %arg1 : i32, i32
  }
  func.func @transform_4(%arg0: i32, %arg1: i32, %arg2: i32) -> (i32, i32) {
    %c0_i32 = arith.constant 0 : i32
    return %arg0, %arg1 : i32, i32
  }
}

module attributes {stable_mosaic.version = 11 : i64} {
  func.func @kernel(%arg0: i32, %arg1: i32, %arg2: i32, %arg3: memref<24x32xbf16, #tpu.memory_space<vmem>>, %arg4: memref<32x64xbf16, #tpu.memory_space<vmem>>, %arg5: memref<1x64xf32, #tpu.memory_space<vmem>>, %arg6: memref<24x64xbf16, #tpu.memory_space<vmem>>, %arg7: memref<24x64xf32, #tpu.memory_space<vmem>>) attributes {dimension_semantics = [#tpu.dimension_semantics<parallel>, #tpu.dimension_semantics<parallel>, #tpu.dimension_semantics<arbitrary>], iteration_bounds = array<i64: 1, 1, 1>, scalar_prefetch = 0 : i64, scratch_operands = 1 : i64, tpu.core_type = #tpu.core_type<tc>, window_params = [{transform_indices = @transform_0, window_bounds = array<i64: 24, 32>}, {transform_indices = @transform_1, window_bounds = array<i64: 32, 64>}, {transform_indices = @transform_2, window_bounds = array<i64: 1, 64>}, {transform_indices = @transform_3, window_bounds = array<i64: 24, 64>}]} {
    %c0_i32 = arith.constant 0 : i32
    %0 = arith.cmpi eq, %arg2, %c0_i32 : i32
    %1 = arith.extui %0 : i1 to i32
    %c0_i32_0 = arith.constant 0 : i32
    %2 = arith.cmpi ne, %1, %c0_i32_0 : i32
    scf.if %2 {
      %cst_10 = arith.constant 0.000000e+00 : f32
      %12 = vector.broadcast %cst_10 : f32 to vector<24x64xf32>
      %c0_11 = arith.constant 0 : index
      %c0_12 = arith.constant 0 : index
      %13 = vector.load %arg7[%c0_11, %c0_12] : memref<24x64xf32, #tpu.memory_space<vmem>>, vector<24x64xf32>
      tpu.vector_store %arg7[%c0_11, %c0_12], %12 {strides = array<i32>} : memref<24x64xf32, #tpu.memory_space<vmem>>, vector<24x64xf32>,
    } else {
    }
    %c0 = arith.constant 0 : index
    %c0_1 = arith.constant 0 : index
    %3 = vector.load %arg7[%c0, %c0_1] : memref<24x64xf32, #tpu.memory_space<vmem>>, vector<24x64xf32>
    %c0_2 = arith.constant 0 : index
    %c0_3 = arith.constant 0 : index
    %4 = vector.load %arg3[%c0_2, %c0_3] : memref<24x32xbf16, #tpu.memory_space<vmem>>, vector<24x32xbf16>
    %c0_4 = arith.constant 0 : index
    %c0_5 = arith.constant 0 : index
    %5 = vector.load %arg4[%c0_4, %c0_5] : memref<32x64xbf16, #tpu.memory_space<vmem>>, vector<32x64xbf16>
    %cst = arith.constant dense<0.000000e+00> : vector<24x64xf32>
    %6 = tpu.matmul %4, %5, %cst {dimension_numbers = #tpu.dot_dimension_numbers<[1], [0], [0], [1], [0, 0, 1, 1], [], []>} : vector<24x32xbf16>, vector<32x64xbf16>, vector<24x64xf32> -> vector<24x64xf32>
    %7 = arith.addf %3, %6 : vector<24x64xf32>
    %c0_6 = arith.constant 0 : index
    %c0_7 = arith.constant 0 : index
    %8 = vector.load %arg7[%c0_6, %c0_7] : memref<24x64xf32, #tpu.memory_space<vmem>>, vector<24x64xf32>
    tpu.vector_store %arg7[%c0_6, %c0_7], %7 {strides = array<i32>} : memref<24x64xf32, #tpu.memory_space<vmem>>, vector<24x64xf32>,
    %c0_i32_8 = arith.constant 0 : i32
    %9 = arith.cmpi eq, %arg2, %c0_i32_8 : i32
    %10 = arith.extui %9 : i1 to i32
    %c0_i32_9 = arith.constant 0 : i32
    %11 = arith.cmpi ne, %10, %c0_i32_9 : i32
    scf.if %11 {
      %c0_10 = arith.constant 0 : index
      %c0_11 = arith.constant 0 : index
      %12 = vector.load %arg7[%c0_10, %c0_11] : memref<24x64xf32, #tpu.memory_space<vmem>>, vector<24x64xf32>
      %c0_12 = arith.constant 0 : index
      %c0_13 = arith.constant 0 : index
      %13 = vector.load %arg5[%c0_12, %c0_13] : memref<1x64xf32, #tpu.memory_space<vmem>>, vector<1x64xf32>
      %14 = vector.broadcast %13 : vector<1x64xf32> to vector<24x64xf32>
      %15 = arith.addf %12, %14 : vector<24x64xf32>
      %16 = arith.truncf %15 : vector<24x64xf32> to vector<24x64xbf16>
      %c0_14 = arith.constant 0 : index
      %c0_15 = arith.constant 0 : index
      %17 = vector.load %arg6[%c0_14, %c0_15] : memref<24x64xbf16, #tpu.memory_space<vmem>>, vector<24x64xbf16>
      tpu.vector_store %arg6[%c0_14, %c0_15], %16 {strides = array<i32>} : memref<24x64xbf16, #tpu.memory_space<vmem>>, vector<24x64xbf16>,
    } else {
    }
    return
  }
  func.func @transform_0(%arg0: i32, %arg1: i32, %arg2: i32) -> (i32, i32) {
    %c0_i32 = arith.constant 0 : i32
    return %arg0, %arg2 : i32, i32
  }
  func.func @transform_1(%arg0: i32, %arg1: i32, %arg2: i32) -> (i32, i32) {
    %c0_i32 = arith.constant 0 : i32
    return %arg2, %arg1 : i32, i32
  }
  func.func @transform_2(%arg0: i32, %arg1: i32, %arg2: i32) -> (i32, i32) {
    %c0_i32 = arith.constant 0 : i32
    %c0_i32_0 = arith.constant 0 : i32
    return %c0_i32, %arg1 : i32, i32
  }
  func.func @transform_3(%arg0: i32, %arg1: i32, %arg2: i32) -> (i32, i32) {
    %c0_i32 = arith.constant 0 : i32
    return %arg0, %arg1 : i32, i32
  }
}

module attributes {stable_mosaic.version = 11 : i64} {
  func.func @kernel(%arg0: i32, %arg1: i32, %arg2: i32, %arg3: memref<16x32xbf16, #tpu.memory_space<vmem>>, %arg4: memref<32x96xbf16, #tpu.memory_space<vmem>>, %arg5: memref<1x96xf32, #tpu.memory_space<vmem>>, %arg6: memref<16x96xbf16, #tpu.memory_space<vmem>>, %arg7: memref<16x96xf32, #tpu.memory_space<vmem>>) attributes {dimension_semantics = [#tpu.dimension_semantics<parallel>, #tpu.dimension_semantics<parallel>, #tpu.dimension_semantics<arbitrary>], iteration_bounds = array<i64: 1, 1, 1>, scalar_prefetch = 0 : i64, scratch_operands = 1 : i64, tpu.core_type = #tpu.core_type<tc>, window_params = [{transform_indices = @transform_0, window_bounds = array<i64: 16, 32>}, {transform_indices = @transform_1, window_bounds = array<i64: 32, 96>}, {transform_indices = @transform_2, window_bounds = array<i64: 1, 96>}, {transform_indices = @transform_3, window_bounds = array<i64: 16, 96>}]} {
    %c0_i32 = arith.constant 0 : i32
    %0 = arith.cmpi eq, %arg2, %c0_i32 : i32
    %1 = arith.extui %0 : i1 to i32
    %c0_i32_0 = arith.constant 0 : i32
    %2 = arith.cmpi ne, %1, %c0_i32_0 : i32
    scf.if %2 {
      %cst_10 = arith.constant 0.000000e+00 : f32
      %12 = vector.broadcast %cst_10 : f32 to vector<16x96xf32>
      %c0_11 = arith.constant 0 : index
      %c0_12 = arith.constant 0 : index
      %13 = vector.load %arg7[%c0_11, %c0_12] : memref<16x96xf32, #tpu.memory_space<vmem>>, vector<16x96xf32>
      tpu.vector_store %arg7[%c0_11, %c0_12], %12 {strides = array<i32>} : memref<16x96xf32, #tpu.memory_space<vmem>>, vector<16x96xf32>,
    } else {
    }
    %c0 = arith.constant 0 : index
    %c0_1 = arith.constant 0 : index
    %3 = vector.load %arg7[%c0, %c0_1] : memref<16x96xf32, #tpu.memory_space<vmem>>, vector<16x96xf32>
    %c0_2 = arith.constant 0 : index
    %c0_3 = arith.constant 0 : index
    %4 = vector.load %arg3[%c0_2, %c0_3] : memref<16x32xbf16, #tpu.memory_space<vmem>>, vector<16x32xbf16>
    %c0_4 = arith.constant 0 : index
    %c0_5 = arith.constant 0 : index
    %5 = vector.load %arg4[%c0_4, %c0_5] : memref<32x96xbf16, #tpu.memory_space<vmem>>, vector<32x96xbf16>
    %cst = arith.constant dense<0.000000e+00> : vector<16x96xf32>
    %6 = tpu.matmul %4, %5, %cst {dimension_numbers = #tpu.dot_dimension_numbers<[1], [0], [0], [1], [0, 0, 1, 1], [], []>} : vector<16x32xbf16>, vector<32x96xbf16>, vector<16x96xf32> -> vector<16x96xf32>
    %7 = arith.addf %3, %6 : vector<16x96xf32>
    %c0_6 = arith.constant 0 : index
    %c0_7 = arith.constant 0 : index
    %8 = vector.load %arg7[%c0_6, %c0_7] : memref<16x96xf32, #tpu.memory_space<vmem>>, vector<16x96xf32>
    tpu.vector_store %arg7[%c0_6, %c0_7], %7 {strides = array<i32>} : memref<16x96xf32, #tpu.memory_space<vmem>>, vector<16x96xf32>,
    %c0_i32_8 = arith.constant 0 : i32
    %9 = arith.cmpi eq, %arg2, %c0_i32_8 : i32
    %10 = arith.extui %9 : i1 to i32
    %c0_i32_9 = arith.constant 0 : i32
    %11 = arith.cmpi ne, %10, %c0_i32_9 : i32
    scf.if %11 {
      %c0_10 = arith.constant 0 : index
      %c0_11 = arith.constant 0 : index
      %12 = vector.load %arg7[%c0_10, %c0_11] : memref<16x96xf32, #tpu.memory_space<vmem>>, vector<16x96xf32>
      %c0_12 = arith.constant 0 : index
      %c0_13 = arith.constant 0 : index
      %13 = vector.load %arg5[%c0_12, %c0_13] : memref<1x96xf32, #tpu.memory_space<vmem>>, vector<1x96xf32>
      %14 = vector.broadcast %13 : vector<1x96xf32> to vector<16x96xf32>
      %15 = arith.addf %12, %14 : vector<16x96xf32>
      %16 = arith.truncf %15 : vector<16x96xf32> to vector<16x96xbf16>
      %c0_14 = arith.constant 0 : index
      %c0_15 = arith.constant 0 : index
      %17 = vector.load %arg6[%c0_14, %c0_15] : memref<16x96xbf16, #tpu.memory_space<vmem>>, vector<16x96xbf16>
      tpu.vector_store %arg6[%c0_14, %c0_15], %16 {strides = array<i32>} : memref<16x96xbf16, #tpu.memory_space<vmem>>, vector<16x96xbf16>,
    } else {
    }
    return
  }
  func.func @transform_0(%arg0: i32, %arg1: i32, %arg2: i32) -> (i32, i32) {
    %c0_i32 = arith.constant 0 : i32
    return %arg0, %arg2 : i32, i32
  }
  func.func @transform_1(%arg0: i32, %arg1: i32, %arg2: i32) -> (i32, i32) {
    %c0_i32 = arith.constant 0 : i32
    return %arg2, %arg1 : i32, i32
  }
  func.func @transform_2(%arg0: i32, %arg1: i32, %arg2: i32) -> (i32, i32) {
    %c0_i32 = arith.constant 0 : i32
    %c0_i32_0 = arith.constant 0 : i32
    return %c0_i32, %arg1 : i32, i32
  }
  func.func @transform_3(%arg0: i32, %arg1: i32, %arg2: i32) -> (i32, i32) {
    %c0_i32 = arith.constant 0 : i32
    return %arg0, %arg1 : i32, i32
  }
}

module attributes {stable_mosaic.version = 11 : i64} {
  func.func @kernel(%arg0: i32, %arg1: i32, %arg2: memref<1x1x6x8xbf16, #tpu.memory_space<vmem>>, %arg3: memref<1x1x6x8xbf16, #tpu.memory_space<vmem>>, %arg4: memref<1x1x6x8xbf16, #tpu.memory_space<vmem>>, %arg5: memref<1x1x6x8xbf16, #tpu.memory_space<vmem>>) attributes {dimension_semantics = [#tpu.dimension_semantics<parallel>, #tpu.dimension_semantics<parallel>], iteration_bounds = array<i64: 2, 4>, scalar_prefetch = 0 : i64, scratch_operands = 0 : i64, tpu.core_type = #tpu.core_type<tc>, window_params = [{transform_indices = @transform_0, window_bounds = array<i64: 1, 1, 6, 8>}, {transform_indices = @transform_1, window_bounds = array<i64: 1, 1, 6, 8>}, {transform_indices = @transform_2, window_bounds = array<i64: 1, 1, 6, 8>}, {transform_indices = @transform_3, window_bounds = array<i64: 1, 1, 6, 8>}]} {
    %c0 = arith.constant 0 : index
    %c0_0 = arith.constant 0 : index
    %c0_1 = arith.constant 0 : index
    %c0_2 = arith.constant 0 : index
    %0 = vector.load %arg2[%c0, %c0_0, %c0_1, %c0_2] : memref<1x1x6x8xbf16, #tpu.memory_space<vmem>>, vector<1x1x6x8xbf16>
    %1 = vector.shape_cast %0 : vector<1x1x6x8xbf16> to vector<6x8xbf16>
    %c0_3 = arith.constant 0 : index
    %c0_4 = arith.constant 0 : index
    %c0_5 = arith.constant 0 : index
    %c0_6 = arith.constant 0 : index
    %2 = vector.load %arg3[%c0_3, %c0_4, %c0_5, %c0_6] : memref<1x1x6x8xbf16, #tpu.memory_space<vmem>>, vector<1x1x6x8xbf16>
    %3 = vector.shape_cast %2 : vector<1x1x6x8xbf16> to vector<6x8xbf16>
    %c0_7 = arith.constant 0 : index
    %c0_8 = arith.constant 0 : index
    %c0_9 = arith.constant 0 : index
    %c0_10 = arith.constant 0 : index
    %4 = vector.load %arg4[%c0_7, %c0_8, %c0_9, %c0_10] : memref<1x1x6x8xbf16, #tpu.memory_space<vmem>>, vector<1x1x6x8xbf16>
    %5 = vector.shape_cast %4 : vector<1x1x6x8xbf16> to vector<6x8xbf16>
    %cst = arith.constant dense<0.000000e+00> : vector<6x6xf32>
    %6 = tpu.matmul %1, %3, %cst {dimension_numbers = #tpu.dot_dimension_numbers<[1], [1], [0], [0], [0, 0, 1, 0], [], []>} : vector<6x8xbf16>, vector<6x8xbf16>, vector<6x6xf32> -> vector<6x6xf32>
    %cst_11 = arith.constant 0.353553385 : f32
    %7 = vector.broadcast %cst_11 : f32 to vector<6x6xf32>
    %8 = arith.mulf %6, %7 : vector<6x6xf32>
    %9 = tpu.iota {dimensions = array<i32: 0>} : vector<6x6xi32>
    %10 = tpu.iota {dimensions = array<i32: 1>} : vector<6x6xi32>
    %11 = arith.cmpi sgt, %10, %9 : vector<6x6xi32>
    %cst_12 = arith.constant -1.000000e+30 : f32
    %12 = vector.broadcast %cst_12 : f32 to vector<6x6xf32>
    %13 = arith.select %11, %12, %8 : vector<6x6xi1>, vector<6x6xf32>
    %cst_13 = arith.constant dense<0xFF800000> : vector<6xf32>
    %14 = vector.multi_reduction <maximumf>, %13, %cst_13 [1] : vector<6x6xf32> to vector<6xf32>
    %15 = vector.shape_cast %14 : vector<6xf32> to vector<6x1xf32>
    %16 = vector.broadcast %15 : vector<6x1xf32> to vector<6x6xf32>
    %17 = arith.subf %13, %16 : vector<6x6xf32>
    %18 = math.exp %17 : vector<6x6xf32>
    %cst_14 = arith.constant dense<0.000000e+00> : vector<6xf32>
    %19 = vector.multi_reduction <add>, %18, %cst_14 [1] : vector<6x6xf32> to vector<6xf32>
    %20 = vector.shape_cast %19 : vector<6xf32> to vector<6x1xf32>
    %21 = vector.broadcast %20 : vector<6x1xf32> to vector<6x6xf32>
    %22 = arith.divf %18, %21 : vector<6x6xf32>
    %23 = arith.truncf %22 : vector<6x6xf32> to vector<6x6xbf16>
    %cst_15 = arith.constant dense<0.000000e+00> : vector<6x8xf32>
    %24 = tpu.matmul %23, %5, %cst_15 {dimension_numbers = #tpu.dot_dimension_numbers<[1], [0], [0], [1], [0, 0, 1, 1], [], []>} : vector<6x6xbf16>, vector<6x8xbf16>, vector<6x8xf32> -> vector<6x8xf32>
    %25 = arith.truncf %24 : vector<6x8xf32> to vector<6x8xbf16>
    %c0_16 = arith.constant 0 : index
    %c0_17 = arith.constant 0 : index
    %c0_18 = arith.constant 0 : index
    %c0_19 = arith.constant 0 : index
    %26 = vector.load %arg5[%c0_16, %c0_17, %c0_18, %c0_19] : memref<1x1x6x8xbf16, #tpu.memory_space<vmem>>, vector<1x1x6x8xbf16>
    %27 = vector.shape_cast %26 : vector<1x1x6x8xbf16> to vector<6x8xbf16>
    %28 = vector.shape_cast %25 : vector<6x8xbf16> to vector<1x1x6x8xbf16>
    tpu.vector_store %arg5[%c0_16, %c0_17, %c0_18, %c0_19], %28 {strides = array<i32>} : memref<1x1x6x8xbf16, #tpu.memory_space<vmem>>, vector<1x1x6x8xbf16>,
    return
  }
  func.func @transform_0(%arg0: i32, %arg1: i32) -> (i32, i32, i32, i32) {
    %c0_i32 = arith.constant 0 : i32
    %c0_i32_0 = arith.constant 0 : i32
    %c0_i32_1 = arith.constant 0 : i32
    return %arg0, %arg1, %c0_i32, %c0_i32_0 : i32, i32, i32, i32
  }
  func.func @transform_1(%arg0: i32, %arg1: i32) -> (i32, i32, i32, i32) {
    %c0_i32 = arith.constant 0 : i32
    %c0_i32_0 = arith.constant 0 : i32
    %c0_i32_1 = arith.constant 0 : i32
    return %arg0, %arg1, %c0_i32, %c0_i32_0 : i32, i32, i32, i32
  }
  func.func @transform_2(%arg0: i32, %arg1: i32) -> (i32, i32, i32, i32) {
    %c0_i32 = arith.constant 0 : i32
    %c0_i32_0 = arith.constant 0 : i32
    %c0_i32_1 = arith.constant 0 : i32
    return %arg0, %arg1, %c0_i32, %c0_i32_0 : i32, i32, i32, i32
  }
  func.func @transform_3(%arg0: i32, %arg1: i32) -> (i32, i32, i32, i32) {
    %c0_i32 = arith.constant 0 : i32
    %c0_i32_0 = arith.constant 0 : i32
    %c0_i32_1 = arith.constant 0 : i32
    return %arg0, %arg1, %c0_i32, %c0_i32_0 : i32, i32, i32, i32
  }
}

module attributes {stable_mosaic.version = 11 : i64} {
  func.func @kernel(%arg0: i32, %arg1: i32, %arg2: i32, %arg3: memref<16x32xbf16, #tpu.memory_space<vmem>>, %arg4: memref<32x32xbf16, #tpu.memory_space<vmem>>, %arg5: memref<1x32xf32, #tpu.memory_space<vmem>>, %arg6: memref<16x32xf32, #tpu.memory_space<vmem>>, %arg7: memref<16x32xf32, #tpu.memory_space<vmem>>, %arg8: memref<16x32xf32, #tpu.memory_space<vmem>>) attributes {dimension_semantics = [#tpu.dimension_semantics<parallel>, #tpu.dimension_semantics<parallel>, #tpu.dimension_semantics<arbitrary>], iteration_bounds = array<i64: 1, 1, 1>, scalar_prefetch = 0 : i64, scratch_operands = 1 : i64, tpu.core_type = #tpu.core_type<tc>, window_params = [{transform_indices = @transform_0, window_bounds = array<i64: 16, 32>}, {transform_indices = @transform_1, window_bounds = array<i64: 32, 32>}, {transform_indices = @transform_2, window_bounds = array<i64: 1, 32>}, {transform_indices = @transform_3, window_bounds = array<i64: 16, 32>}, {transform_indices = @transform_4, window_bounds = array<i64: 16, 32>}]} {
    %c0_i32 = arith.constant 0 : i32
    %0 = arith.cmpi eq, %arg2, %c0_i32 : i32
    %1 = arith.extui %0 : i1 to i32
    %c0_i32_0 = arith.constant 0 : i32
    %2 = arith.cmpi ne, %1, %c0_i32_0 : i32
    scf.if %2 {
      %cst_10 = arith.constant 0.000000e+00 : f32
      %12 = vector.broadcast %cst_10 : f32 to vector<16x32xf32>
      %c0_11 = arith.constant 0 : index
      %c0_12 = arith.constant 0 : index
      %13 = vector.load %arg8[%c0_11, %c0_12] : memref<16x32xf32, #tpu.memory_space<vmem>>, vector<16x32xf32>
      tpu.vector_store %arg8[%c0_11, %c0_12], %12 {strides = array<i32>} : memref<16x32xf32, #tpu.memory_space<vmem>>, vector<16x32xf32>,
    } else {
    }
    %c0 = arith.constant 0 : index
    %c0_1 = arith.constant 0 : index
    %3 = vector.load %arg8[%c0, %c0_1] : memref<16x32xf32, #tpu.memory_space<vmem>>, vector<16x32xf32>
    %c0_2 = arith.constant 0 : index
    %c0_3 = arith.constant 0 : index
    %4 = vector.load %arg3[%c0_2, %c0_3] : memref<16x32xbf16, #tpu.memory_space<vmem>>, vector<16x32xbf16>
    %c0_4 = arith.constant 0 : index
    %c0_5 = arith.constant 0 : index
    %5 = vector.load %arg4[%c0_4, %c0_5] : memref<32x32xbf16, #tpu.memory_space<vmem>>, vector<32x32xbf16>
    %cst = arith.constant dense<0.000000e+00> : vector<16x32xf32>
    %6 = tpu.matmul %4, %5, %cst {dimension_numbers = #tpu.dot_dimension_numbers<[1], [0], [0], [1], [0, 0, 1, 1], [], []>} : vector<16x32xbf16>, vector<32x32xbf16>, vector<16x32xf32> -> vector<16x32xf32>
    %7 = arith.addf %3, %6 : vector<16x32xf32>
    %c0_6 = arith.constant 0 : index
    %c0_7 = arith.constant 0 : index
    %8 = vector.load %arg8[%c0_6, %c0_7] : memref<16x32xf32, #tpu.memory_space<vmem>>, vector<16x32xf32>
    tpu.vector_store %arg8[%c0_6, %c0_7], %7 {strides = array<i32>} : memref<16x32xf32, #tpu.memory_space<vmem>>, vector<16x32xf32>,
    %c0_i32_8 = arith.constant 0 : i32
    %9 = arith.cmpi eq, %arg2, %c0_i32_8 : i32
    %10 = arith.extui %9 : i1 to i32
    %c0_i32_9 = arith.constant 0 : i32
    %11 = arith.cmpi ne, %10, %c0_i32_9 : i32
    scf.if %11 {
      %c0_10 = arith.constant 0 : index
      %c0_11 = arith.constant 0 : index
      %12 = vector.load %arg8[%c0_10, %c0_11] : memref<16x32xf32, #tpu.memory_space<vmem>>, vector<16x32xf32>
      %c0_12 = arith.constant 0 : index
      %c0_13 = arith.constant 0 : index
      %13 = vector.load %arg5[%c0_12, %c0_13] : memref<1x32xf32, #tpu.memory_space<vmem>>, vector<1x32xf32>
      %14 = vector.broadcast %13 : vector<1x32xf32> to vector<16x32xf32>
      %15 = arith.addf %12, %14 : vector<16x32xf32>
      %c0_14 = arith.constant 0 : index
      %c0_15 = arith.constant 0 : index
      %16 = vector.load %arg6[%c0_14, %c0_15] : memref<16x32xf32, #tpu.memory_space<vmem>>, vector<16x32xf32>
      %17 = arith.addf %15, %16 : vector<16x32xf32>
      %c0_16 = arith.constant 0 : index
      %c0_17 = arith.constant 0 : index
      %18 = vector.load %arg7[%c0_16, %c0_17] : memref<16x32xf32, #tpu.memory_space<vmem>>, vector<16x32xf32>
      tpu.vector_store %arg7[%c0_16, %c0_17], %17 {strides = array<i32>} : memref<16x32xf32, #tpu.memory_space<vmem>>, vector<16x32xf32>,
    } else {
    }
    return
  }
  func.func @transform_0(%arg0: i32, %arg1: i32, %arg2: i32) -> (i32, i32) {
    %c0_i32 = arith.constant 0 : i32
    return %arg0, %arg2 : i32, i32
  }
  func.func @transform_1(%arg0: i32, %arg1: i32, %arg2: i32) -> (i32, i32) {
    %c0_i32 = arith.constant 0 : i32
    return %arg2, %arg1 : i32, i32
  }
  func.func @transform_2(%arg0: i32, %arg1: i32, %arg2: i32) -> (i32, i32) {
    %c0_i32 = arith.constant 0 : i32
    %c0_i32_0 = arith.constant 0 : i32
    return %c0_i32, %arg1 : i32, i32
  }
  func.func @transform_3(%arg0: i32, %arg1: i32, %arg2: i32) -> (i32, i32) {
    %c0_i32 = arith.constant 0 : i32
    return %arg0, %arg1 : i32, i32
  }
  func.func @transform_4(%arg0: i32, %arg1: i32, %arg2: i32) -> (i32, i32) {
    %c0_i32 = arith.constant 0 : i32
    return %arg0, %arg1 : i32, i32
  }
}

module attributes {stable_mosaic.version = 11 : i64} {
  func.func @kernel(%arg0: i32, %arg1: memref<16x32xf32, #tpu.memory_space<vmem>>, %arg2: memref<1x32xf32, #tpu.memory_space<vmem>>, %arg3: memref<1x32xf32, #tpu.memory_space<vmem>>, %arg4: memref<16x32xf32, #tpu.memory_space<vmem>>) attributes {dimension_semantics = [#tpu.dimension_semantics<parallel>], iteration_bounds = array<i64: 1>, scalar_prefetch = 0 : i64, scratch_operands = 0 : i64, tpu.core_type = #tpu.core_type<tc>, window_params = [{transform_indices = @transform_0, window_bounds = array<i64: 16, 32>}, {pipeline_mode = #tpu.pipeline_mode<synchronous>, transform_indices = @transform_1, window_bounds = array<i64: 1, 32>}, {pipeline_mode = #tpu.pipeline_mode<synchronous>, transform_indices = @transform_2, window_bounds = array<i64: 1, 32>}, {transform_indices = @transform_3, window_bounds = array<i64: 16, 32>}]} {
    %c0 = arith.constant 0 : index
    %c0_0 = arith.constant 0 : index
    %0 = vector.load %arg1[%c0, %c0_0] : memref<16x32xf32, #tpu.memory_space<vmem>>, vector<16x32xf32>
    %cst = arith.constant dense<0.000000e+00> : vector<16xf32>
    %1 = vector.multi_reduction <add>, %0, %cst [1] : vector<16x32xf32> to vector<16xf32>
    %2 = vector.shape_cast %1 : vector<16xf32> to vector<16x1xf32>
    %cst_1 = arith.constant 3.200000e+01 : f32
    %3 = vector.broadcast %cst_1 : f32 to vector<16x1xf32>
    %4 = arith.divf %2, %3 : vector<16x1xf32>
    %5 = vector.broadcast %4 : vector<16x1xf32> to vector<16x32xf32>
    %6 = arith.subf %0, %5 : vector<16x32xf32>
    %7 = arith.mulf %6, %6 : vector<16x32xf32>
    %cst_2 = arith.constant dense<0.000000e+00> : vector<16xf32>
    %8 = vector.multi_reduction <add>, %7, %cst_2 [1] : vector<16x32xf32> to vector<16xf32>
    %9 = vector.shape_cast %8 : vector<16xf32> to vector<16x1xf32>
    %cst_3 = arith.constant 3.200000e+01 : f32
    %10 = vector.broadcast %cst_3 : f32 to vector<16x1xf32>
    %11 = arith.divf %9, %10 : vector<16x1xf32>
    %12 = vector.broadcast %4 : vector<16x1xf32> to vector<16x32xf32>
    %13 = arith.subf %0, %12 : vector<16x32xf32>
    %cst_4 = arith.constant 9.99999974E-6 : f32
    %14 = vector.broadcast %cst_4 : f32 to vector<16x1xf32>
    %15 = arith.addf %11, %14 : vector<16x1xf32>
    %16 = math.rsqrt %15 : vector<16x1xf32>
    %17 = vector.broadcast %16 : vector<16x1xf32> to vector<16x32xf32>
    %18 = arith.mulf %13, %17 : vector<16x32xf32>
    %c0_5 = arith.constant 0 : index
    %c0_6 = arith.constant 0 : index
    %19 = vector.load %arg2[%c0_5, %c0_6] : memref<1x32xf32, #tpu.memory_space<vmem>>, vector<1x32xf32>
    %20 = vector.broadcast %19 : vector<1x32xf32> to vector<16x32xf32>
    %21 = arith.mulf %18, %20 : vector<16x32xf32>
    %c0_7 = arith.constant 0 : index
    %c0_8 = arith.constant 0 : index
    %22 = vector.load %arg3[%c0_7, %c0_8] : memref<1x32xf32, #tpu.memory_space<vmem>>, vector<1x32xf32>
    %23 = vector.broadcast %22 : vector<1x32xf32> to vector<16x32xf32>
    %24 = arith.addf %21, %23 : vector<16x32xf32>
    %c0_9 = arith.constant 0 : index
    %c0_10 = arith.constant 0 : index
    %25 = vector.load %arg4[%c0_9, %c0_10] : memref<16x32xf32, #tpu.memory_space<vmem>>, vector<16x32xf32>
    tpu.vector_store %arg4[%c0_9, %c0_10], %24 {strides = array<i32>} : memref<16x32xf32, #tpu.memory_space<vmem>>, vector<16x32xf32>,
    return
  }
  func.func @transform_0(%arg0: i32) -> (i32, i32) {
    %c0_i32 = arith.constant 0 : i32
    %c0_i32_0 = arith.constant 0 : i32
    return %arg0, %c0_i32 : i32, i32
  }
  func.func @transform_1(%arg0: i32) -> (i32, i32) {
    %c0_i32 = arith.constant 0 : i32
    %c0_i32_0 = arith.constant 0 : i32
    %c0_i32_1 = arith.constant 0 : i32
    return %c0_i32, %c0_i32_0 : i32, i32
  }
  func.func @transform_2(%arg0: i32) -> (i32, i32) {
    %c0_i32 = arith.constant 0 : i32
    %c0_i32_0 = arith.constant 0 : i32
    %c0_i32_1 = arith.constant 0 : i32
    return %c0_i32, %c0_i32_0 : i32, i32
  }
  func.func @transform_3(%arg0: i32) -> (i32, i32) {
    %c0_i32 = arith.constant 0 : i32
    %c0_i32_0 = arith.constant 0 : i32
    return %arg0, %c0_i32 : i32, i32
  }
}

module attributes {stable_mosaic.version = 11 : i64} {
  func.func @kernel(%arg0: i32, %arg1: i32, %arg2: memref<1x1x6x8xbf16, #tpu.memory_space<vmem>>, %arg3: memref<1x1x12x8xbf16, #tpu.memory_space<vmem>>, %arg4: memref<1x1x12x8xbf16, #tpu.memory_space<vmem>>, %arg5: memref<1x1x6x8xbf16, #tpu.memory_space<vmem>>) attributes {dimension_semantics = [#tpu.dimension_semantics<parallel>, #tpu.dimension_semantics<parallel>], iteration_bounds = array<i64: 2, 4>, scalar_prefetch = 0 : i64, scratch_operands = 0 : i64, tpu.core_type = #tpu.core_type<tc>, window_params = [{transform_indices = @transform_0, window_bounds = array<i64: 1, 1, 6, 8>}, {transform_indices = @transform_1, window_bounds = array<i64: 1, 1, 12, 8>}, {transform_indices = @transform_2, window_bounds = array<i64: 1, 1, 12, 8>}, {transform_indices = @transform_3, window_bounds = array<i64: 1, 1, 6, 8>}]} {
    %c0 = arith.constant 0 : index
    %c0_0 = arith.constant 0 : index
    %c0_1 = arith.constant 0 : index
    %c0_2 = arith.constant 0 : index
    %0 = vector.load %arg2[%c0, %c0_0, %c0_1, %c0_2] : memref<1x1x6x8xbf16, #tpu.memory_space<vmem>>, vector<1x1x6x8xbf16>
    %1 = vector.shape_cast %0 : vector<1x1x6x8xbf16> to vector<6x8xbf16>
    %c0_3 = arith.constant 0 : index
    %c0_4 = arith.constant 0 : index
    %c0_5 = arith.constant 0 : index
    %c0_6 = arith.constant 0 : index
    %2 = vector.load %arg3[%c0_3, %c0_4, %c0_5, %c0_6] : memref<1x1x12x8xbf16, #tpu.memory_space<vmem>>, vector<1x1x12x8xbf16>
    %3 = vector.shape_cast %2 : vector<1x1x12x8xbf16> to vector<12x8xbf16>
    %c0_7 = arith.constant 0 : index
    %c0_8 = arith.constant 0 : index
    %c0_9 = arith.constant 0 : index
    %c0_10 = arith.constant 0 : index
    %4 = vector.load %arg4[%c0_7, %c0_8, %c0_9, %c0_10] : memref<1x1x12x8xbf16, #tpu.memory_space<vmem>>, vector<1x1x12x8xbf16>
    %5 = vector.shape_cast %4 : vector<1x1x12x8xbf16> to vector<12x8xbf16>
    %cst = arith.constant dense<0.000000e+00> : vector<6x12xf32>
    %6 = tpu.matmul %1, %3, %cst {dimension_numbers = #tpu.dot_dimension_numbers<[1], [1], [0], [0], [0, 0, 1, 0], [], []>} : vector<6x8xbf16>, vector<12x8xbf16>, vector<6x12xf32> -> vector<6x12xf32>
    %cst_11 = arith.constant 0.353553385 : f32
    %7 = vector.broadcast %cst_11 : f32 to vector<6x12xf32>
    %8 = arith.mulf %6, %7 : vector<6x12xf32>
    %cst_12 = arith.constant dense<0xFF800000> : vector<6xf32>
    %9 = vector.multi_reduction <maximumf>, %8, %cst_12 [1] : vector<6x12xf32> to vector<6xf32>
    %10 = vector.shape_cast %9 : vector<6xf32> to vector<6x1xf32>
    %11 = vector.broadcast %10 : vector<6x1xf32> to vector<6x12xf32>
    %12 = arith.subf %8, %11 : vector<6x12xf32>
    %13 = math.exp %12 : vector<6x12xf32>
    %cst_13 = arith.constant dense<0.000000e+00> : vector<6xf32>
    %14 = vector.multi_reduction <add>, %13, %cst_13 [1] : vector<6x12xf32> to vector<6xf32>
    %15 = vector.shape_cast %14 : vector<6xf32> to vector<6x1xf32>
    %16 = vector.broadcast %15 : vector<6x1xf32> to vector<6x12xf32>
    %17 = arith.divf %13, %16 : vector<6x12xf32>
    %18 = arith.truncf %17 : vector<6x12xf32> to vector<6x12xbf16>
    %cst_14 = arith.constant dense<0.000000e+00> : vector<6x8xf32>
    %19 = tpu.matmul %18, %5, %cst_14 {dimension_numbers = #tpu.dot_dimension_numbers<[1], [0], [0], [1], [0, 0, 1, 1], [], []>} : vector<6x12xbf16>, vector<12x8xbf16>, vector<6x8xf32> -> vector<6x8xf32>
    %20 = arith.truncf %19 : vector<6x8xf32> to vector<6x8xbf16>
    %c0_15 = arith.constant 0 : index
    %c0_16 = arith.constant 0 : index
    %c0_17 = arith.constant 0 : index
    %c0_18 = arith.constant 0 : index
    %21 = vector.load %arg5[%c0_15, %c0_16, %c0_17, %c0_18] : memref<1x1x6x8xbf16, #tpu.memory_space<vmem>>, vector<1x1x6x8xbf16>
    %22 = vector.shape_cast %21 : vector<1x1x6x8xbf16> to vector<6x8xbf16>
    %23 = vector.shape_cast %20 : vector<6x8xbf16> to vector<1x1x6x8xbf16>
    tpu.vector_store %arg5[%c0_15, %c0_16, %c0_17, %c0_18], %23 {strides = array<i32>} : memref<1x1x6x8xbf16, #tpu.memory_space<vmem>>, vector<1x1x6x8xbf16>,
    return
  }
  func.func @transform_0(%arg0: i32, %arg1: i32) -> (i32, i32, i32, i32) {
    %c0_i32 = arith.constant 0 : i32
    %c0_i32_0 = arith.constant 0 : i32
    %c0_i32_1 = arith.constant 0 : i32
    return %arg0, %arg1, %c0_i32, %c0_i32_0 : i32, i32, i32, i32
  }
  func.func @transform_1(%arg0: i32, %arg1: i32) -> (i32, i32, i32, i32) {
    %c0_i32 = arith.constant 0 : i32
    %c0_i32_0 = arith.constant 0 : i32
    %c0_i32_1 = arith.constant 0 : i32
    return %arg0, %arg1, %c0_i32, %c0_i32_0 : i32, i32, i32, i32
  }
  func.func @transform_2(%arg0: i32, %arg1: i32) -> (i32, i32, i32, i32) {
    %c0_i32 = arith.constant 0 : i32
    %c0_i32_0 = arith.constant 0 : i32
    %c0_i32_1 = arith.constant 0 : i32
    return %arg0, %arg1, %c0_i32, %c0_i32_0 : i32, i32, i32, i32
  }
  func.func @transform_3(%arg0: i32, %arg1: i32) -> (i32, i32, i32, i32) {
    %c0_i32 = arith.constant 0 : i32
    %c0_i32_0 = arith.constant 0 : i32
    %c0_i32_1 = arith.constant 0 : i32
    return %arg0, %arg1, %c0_i32, %c0_i32_0 : i32, i32, i32, i32
  }
}

module attributes {stable_mosaic.version = 11 : i64} {
  func.func @kernel(%arg0: i32, %arg1: i32, %arg2: i32, %arg3: memref<16x32xbf16, #tpu.memory_space<vmem>>, %arg4: memref<32x32xbf16, #tpu.memory_space<vmem>>, %arg5: memref<1x32xf32, #tpu.memory_space<vmem>>, %arg6: memref<16x32xbf16, #tpu.memory_space<vmem>>, %arg7: memref<16x32xf32, #tpu.memory_space<vmem>>) attributes {dimension_semantics = [#tpu.dimension_semantics<parallel>, #tpu.dimension_semantics<parallel>, #tpu.dimension_semantics<arbitrary>], iteration_bounds = array<i64: 1, 1, 1>, scalar_prefetch = 0 : i64, scratch_operands = 1 : i64, tpu.core_type = #tpu.core_type<tc>, window_params = [{transform_indices = @transform_0, window_bounds = array<i64: 16, 32>}, {transform_indices = @transform_1, window_bounds = array<i64: 32, 32>}, {transform_indices = @transform_2, window_bounds = array<i64: 1, 32>}, {transform_indices = @transform_3, window_bounds = array<i64: 16, 32>}]} {
    %c0_i32 = arith.constant 0 : i32
    %0 = arith.cmpi eq, %arg2, %c0_i32 : i32
    %1 = arith.extui %0 : i1 to i32
    %c0_i32_0 = arith.constant 0 : i32
    %2 = arith.cmpi ne, %1, %c0_i32_0 : i32
    scf.if %2 {
      %cst_10 = arith.constant 0.000000e+00 : f32
      %12 = vector.broadcast %cst_10 : f32 to vector<16x32xf32>
      %c0_11 = arith.constant 0 : index
      %c0_12 = arith.constant 0 : index
      %13 = vector.load %arg7[%c0_11, %c0_12] : memref<16x32xf32, #tpu.memory_space<vmem>>, vector<16x32xf32>
      tpu.vector_store %arg7[%c0_11, %c0_12], %12 {strides = array<i32>} : memref<16x32xf32, #tpu.memory_space<vmem>>, vector<16x32xf32>,
    } else {
    }
    %c0 = arith.constant 0 : index
    %c0_1 = arith.constant 0 : index
    %3 = vector.load %arg7[%c0, %c0_1] : memref<16x32xf32, #tpu.memory_space<vmem>>, vector<16x32xf32>
    %c0_2 = arith.constant 0 : index
    %c0_3 = arith.constant 0 : index
    %4 = vector.load %arg3[%c0_2, %c0_3] : memref<16x32xbf16, #tpu.memory_space<vmem>>, vector<16x32xbf16>
    %c0_4 = arith.constant 0 : index
    %c0_5 = arith.constant 0 : index
    %5 = vector.load %arg4[%c0_4, %c0_5] : memref<32x32xbf16, #tpu.memory_space<vmem>>, vector<32x32xbf16>
    %cst = arith.constant dense<0.000000e+00> : vector<16x32xf32>
    %6 = tpu.matmul %4, %5, %cst {dimension_numbers = #tpu.dot_dimension_numbers<[1], [0], [0], [1], [0, 0, 1, 1], [], []>} : vector<16x32xbf16>, vector<32x32xbf16>, vector<16x32xf32> -> vector<16x32xf32>
    %7 = arith.addf %3, %6 : vector<16x32xf32>
    %c0_6 = arith.constant 0 : index
    %c0_7 = arith.constant 0 : index
    %8 = vector.load %arg7[%c0_6, %c0_7] : memref<16x32xf32, #tpu.memory_space<vmem>>, vector<16x32xf32>
    tpu.vector_store %arg7[%c0_6, %c0_7], %7 {strides = array<i32>} : memref<16x32xf32, #tpu.memory_space<vmem>>, vector<16x32xf32>,
    %c0_i32_8 = arith.constant 0 : i32
    %9 = arith.cmpi eq, %arg2, %c0_i32_8 : i32
    %10 = arith.extui %9 : i1 to i32
    %c0_i32_9 = arith.constant 0 : i32
    %11 = arith.cmpi ne, %10, %c0_i32_9 : i32
    scf.if %11 {
      %c0_10 = arith.constant 0 : index
      %c0_11 = arith.constant 0 : index
      %12 = vector.load %arg7[%c0_10, %c0_11] : memref<16x32xf32, #tpu.memory_space<vmem>>, vector<16x32xf32>
      %c0_12 = arith.constant 0 : index
      %c0_13 = arith.constant 0 : index
      %13 = vector.load %arg5[%c0_12, %c0_13] : memref<1x32xf32, #tpu.memory_space<vmem>>, vector<1x32xf32>
      %14 = vector.broadcast %13 : vector<1x32xf32> to vector<16x32xf32>
      %15 = arith.addf %12, %14 : vector<16x32xf32>
      %16 = arith.truncf %15 : vector<16x32xf32> to vector<16x32xbf16>
      %c0_14 = arith.constant 0 : index
      %c0_15 = arith.constant 0 : index
      %17 = vector.load %arg6[%c0_14, %c0_15] : memref<16x32xbf16, #tpu.memory_space<vmem>>, vector<16x32xbf16>
      tpu.vector_store %arg6[%c0_14, %c0_15], %16 {strides = array<i32>} : memref<16x32xbf16, #tpu.memory_space<vmem>>, vector<16x32xbf16>,
    } else {
    }
    return
  }
  func.func @transform_0(%arg0: i32, %arg1: i32, %arg2: i32) -> (i32, i32) {
    %c0_i32 = arith.constant 0 : i32
    return %arg0, %arg2 : i32, i32
  }
  func.func @transform_1(%arg0: i32, %arg1: i32, %arg2: i32) -> (i32, i32) {
    %c0_i32 = arith.constant 0 : i32
    return %arg2, %arg1 : i32, i32
  }
  func.func @transform_2(%arg0: i32, %arg1: i32, %arg2: i32) -> (i32, i32) {
    %c0_i32 = arith.constant 0 : i32
    %c0_i32_0 = arith.constant 0 : i32
    return %c0_i32, %arg1 : i32, i32
  }
  func.func @transform_3(%arg0: i32, %arg1: i32, %arg2: i32) -> (i32, i32) {
    %c0_i32 = arith.constant 0 : i32
    return %arg0, %arg1 : i32, i32
  }
}

module attributes {stable_mosaic.version = 11 : i64} {
  func.func @kernel(%arg0: i32, %arg1: i32, %arg2: i32, %arg3: memref<16x32xbf16, #tpu.memory_space<vmem>>, %arg4: memref<32x128xbf16, #tpu.memory_space<vmem>>, %arg5: memref<1x128xf32, #tpu.memory_space<vmem>>, %arg6: memref<16x128xbf16, #tpu.memory_space<vmem>>, %arg7: memref<16x128xf32, #tpu.memory_space<vmem>>) attributes {dimension_semantics = [#tpu.dimension_semantics<parallel>, #tpu.dimension_semantics<parallel>, #tpu.dimension_semantics<arbitrary>], iteration_bounds = array<i64: 1, 1, 1>, scalar_prefetch = 0 : i64, scratch_operands = 1 : i64, tpu.core_type = #tpu.core_type<tc>, window_params = [{transform_indices = @transform_0, window_bounds = array<i64: 16, 32>}, {transform_indices = @transform_1, window_bounds = array<i64: 32, 128>}, {transform_indices = @transform_2, window_bounds = array<i64: 1, 128>}, {transform_indices = @transform_3, window_bounds = array<i64: 16, 128>}]} {
    %c0_i32 = arith.constant 0 : i32
    %0 = arith.cmpi eq, %arg2, %c0_i32 : i32
    %1 = arith.extui %0 : i1 to i32
    %c0_i32_0 = arith.constant 0 : i32
    %2 = arith.cmpi ne, %1, %c0_i32_0 : i32
    scf.if %2 {
      %cst_10 = arith.constant 0.000000e+00 : f32
      %12 = vector.broadcast %cst_10 : f32 to vector<16x128xf32>
      %c0_11 = arith.constant 0 : index
      %c0_12 = arith.constant 0 : index
      %13 = vector.load %arg7[%c0_11, %c0_12] : memref<16x128xf32, #tpu.memory_space<vmem>>, vector<16x128xf32>
      tpu.vector_store %arg7[%c0_11, %c0_12], %12 {strides = array<i32>} : memref<16x128xf32, #tpu.memory_space<vmem>>, vector<16x128xf32>,
    } else {
    }
    %c0 = arith.constant 0 : index
    %c0_1 = arith.constant 0 : index
    %3 = vector.load %arg7[%c0, %c0_1] : memref<16x128xf32, #tpu.memory_space<vmem>>, vector<16x128xf32>
    %c0_2 = arith.constant 0 : index
    %c0_3 = arith.constant 0 : index
    %4 = vector.load %arg3[%c0_2, %c0_3] : memref<16x32xbf16, #tpu.memory_space<vmem>>, vector<16x32xbf16>
    %c0_4 = arith.constant 0 : index
    %c0_5 = arith.constant 0 : index
    %5 = vector.load %arg4[%c0_4, %c0_5] : memref<32x128xbf16, #tpu.memory_space<vmem>>, vector<32x128xbf16>
    %cst = arith.constant dense<0.000000e+00> : vector<16x128xf32>
    %6 = tpu.matmul %4, %5, %cst {dimension_numbers = #tpu.dot_dimension_numbers<[1], [0], [0], [1], [0, 0, 1, 1], [], []>} : vector<16x32xbf16>, vector<32x128xbf16>, vector<16x128xf32> -> vector<16x128xf32>
    %7 = arith.addf %3, %6 : vector<16x128xf32>
    %c0_6 = arith.constant 0 : index
    %c0_7 = arith.constant 0 : index
    %8 = vector.load %arg7[%c0_6, %c0_7] : memref<16x128xf32, #tpu.memory_space<vmem>>, vector<16x128xf32>
    tpu.vector_store %arg7[%c0_6, %c0_7], %7 {strides = array<i32>} : memref<16x128xf32, #tpu.memory_space<vmem>>, vector<16x128xf32>,
    %c0_i32_8 = arith.constant 0 : i32
    %9 = arith.cmpi eq, %arg2, %c0_i32_8 : i32
    %10 = arith.extui %9 : i1 to i32
    %c0_i32_9 = arith.constant 0 : i32
    %11 = arith.cmpi ne, %10, %c0_i32_9 : i32
    scf.if %11 {
      %c0_10 = arith.constant 0 : index
      %c0_11 = arith.constant 0 : index
      %12 = vector.load %arg7[%c0_10, %c0_11] : memref<16x128xf32, #tpu.memory_space<vmem>>, vector<16x128xf32>
      %c0_12 = arith.constant 0 : index
      %c0_13 = arith.constant 0 : index
      %13 = vector.load %arg5[%c0_12, %c0_13] : memref<1x128xf32, #tpu.memory_space<vmem>>, vector<1x128xf32>
      %14 = vector.broadcast %13 : vector<1x128xf32> to vector<16x128xf32>
      %15 = arith.addf %12, %14 : vector<16x128xf32>
      %cst_14 = arith.constant 0.000000e+00 : f32
      %16 = vector.broadcast %cst_14 : f32 to vector<16x128xf32>
      %17 = arith.maximumf %15, %16 : vector<16x128xf32>
      %18 = arith.truncf %17 : vector<16x128xf32> to vector<16x128xbf16>
      %c0_15 = arith.constant 0 : index
      %c0_16 = arith.constant 0 : index
      %19 = vector.load %arg6[%c0_15, %c0_16] : memref<16x128xbf16, #tpu.memory_space<vmem>>, vector<16x128xbf16>
      tpu.vector_store %arg6[%c0_15, %c0_16], %18 {strides = array<i32>} : memref<16x128xbf16, #tpu.memory_space<vmem>>, vector<16x128xbf16>,
    } else {
    }
    return
  }
  func.func @transform_0(%arg0: i32, %arg1: i32, %arg2: i32) -> (i32, i32) {
    %c0_i32 = arith.constant 0 : i32
    return %arg0, %arg2 : i32, i32
  }
  func.func @transform_1(%arg0: i32, %arg1: i32, %arg2: i32) -> (i32, i32) {
    %c0_i32 = arith.constant 0 : i32
    return %arg2, %arg1 : i32, i32
  }
  func.func @transform_2(%arg0: i32, %arg1: i32, %arg2: i32) -> (i32, i32) {
    %c0_i32 = arith.constant 0 : i32
    %c0_i32_0 = arith.constant 0 : i32
    return %c0_i32, %arg1 : i32, i32
  }
  func.func @transform_3(%arg0: i32, %arg1: i32, %arg2: i32) -> (i32, i32) {
    %c0_i32 = arith.constant 0 : i32
    return %arg0, %arg1 : i32, i32
  }
}

module attributes {stable_mosaic.version = 11 : i64} {
  func.func @kernel(%arg0: i32, %arg1: i32, %arg2: i32, %arg3: memref<16x128xbf16, #tpu.memory_space<vmem>>, %arg4: memref<128x32xbf16, #tpu.memory_space<vmem>>, %arg5: memref<1x32xf32, #tpu.memory_space<vmem>>, %arg6: memref<16x32xf32, #tpu.memory_space<vmem>>, %arg7: memref<16x32xf32, #tpu.memory_space<vmem>>, %arg8: memref<16x32xf32, #tpu.memory_space<vmem>>) attributes {dimension_semantics = [#tpu.dimension_semantics<parallel>, #tpu.dimension_semantics<parallel>, #tpu.dimension_semantics<arbitrary>], iteration_bounds = array<i64: 1, 1, 1>, scalar_prefetch = 0 : i64, scratch_operands = 1 : i64, tpu.core_type = #tpu.core_type<tc>, window_params = [{transform_indices = @transform_0, window_bounds = array<i64: 16, 128>}, {transform_indices = @transform_1, window_bounds = array<i64: 128, 32>}, {transform_indices = @transform_2, window_bounds = array<i64: 1, 32>}, {transform_indices = @transform_3, window_bounds = array<i64: 16, 32>}, {transform_indices = @transform_4, window_bounds = array<i64: 16, 32>}]} {
    %c0_i32 = arith.constant 0 : i32
    %0 = arith.cmpi eq, %arg2, %c0_i32 : i32
    %1 = arith.extui %0 : i1 to i32
    %c0_i32_0 = arith.constant 0 : i32
    %2 = arith.cmpi ne, %1, %c0_i32_0 : i32
    scf.if %2 {
      %cst_10 = arith.constant 0.000000e+00 : f32
      %12 = vector.broadcast %cst_10 : f32 to vector<16x32xf32>
      %c0_11 = arith.constant 0 : index
      %c0_12 = arith.constant 0 : index
      %13 = vector.load %arg8[%c0_11, %c0_12] : memref<16x32xf32, #tpu.memory_space<vmem>>, vector<16x32xf32>
      tpu.vector_store %arg8[%c0_11, %c0_12], %12 {strides = array<i32>} : memref<16x32xf32, #tpu.memory_space<vmem>>, vector<16x32xf32>,
    } else {
    }
    %c0 = arith.constant 0 : index
    %c0_1 = arith.constant 0 : index
    %3 = vector.load %arg8[%c0, %c0_1] : memref<16x32xf32, #tpu.memory_space<vmem>>, vector<16x32xf32>
    %c0_2 = arith.constant 0 : index
    %c0_3 = arith.constant 0 : index
    %4 = vector.load %arg3[%c0_2, %c0_3] : memref<16x128xbf16, #tpu.memory_space<vmem>>, vector<16x128xbf16>
    %c0_4 = arith.constant 0 : index
    %c0_5 = arith.constant 0 : index
    %5 = vector.load %arg4[%c0_4, %c0_5] : memref<128x32xbf16, #tpu.memory_space<vmem>>, vector<128x32xbf16>
    %cst = arith.constant dense<0.000000e+00> : vector<16x32xf32>
    %6 = tpu.matmul %4, %5, %cst {dimension_numbers = #tpu.dot_dimension_numbers<[1], [0], [0], [1], [0, 0, 1, 1], [], []>} : vector<16x128xbf16>, vector<128x32xbf16>, vector<16x32xf32> -> vector<16x32xf32>
    %7 = arith.addf %3, %6 : vector<16x32xf32>
    %c0_6 = arith.constant 0 : index
    %c0_7 = arith.constant 0 : index
    %8 = vector.load %arg8[%c0_6, %c0_7] : memref<16x32xf32, #tpu.memory_space<vmem>>, vector<16x32xf32>
    tpu.vector_store %arg8[%c0_6, %c0_7], %7 {strides = array<i32>} : memref<16x32xf32, #tpu.memory_space<vmem>>, vector<16x32xf32>,
    %c0_i32_8 = arith.constant 0 : i32
    %9 = arith.cmpi eq, %arg2, %c0_i32_8 : i32
    %10 = arith.extui %9 : i1 to i32
    %c0_i32_9 = arith.constant 0 : i32
    %11 = arith.cmpi ne, %10, %c0_i32_9 : i32
    scf.if %11 {
      %c0_10 = arith.constant 0 : index
      %c0_11 = arith.constant 0 : index
      %12 = vector.load %arg8[%c0_10, %c0_11] : memref<16x32xf32, #tpu.memory_space<vmem>>, vector<16x32xf32>
      %c0_12 = arith.constant 0 : index
      %c0_13 = arith.constant 0 : index
      %13 = vector.load %arg5[%c0_12, %c0_13] : memref<1x32xf32, #tpu.memory_space<vmem>>, vector<1x32xf32>
      %14 = vector.broadcast %13 : vector<1x32xf32> to vector<16x32xf32>
      %15 = arith.addf %12, %14 : vector<16x32xf32>
      %c0_14 = arith.constant 0 : index
      %c0_15 = arith.constant 0 : index
      %16 = vector.load %arg6[%c0_14, %c0_15] : memref<16x32xf32, #tpu.memory_space<vmem>>, vector<16x32xf32>
      %17 = arith.addf %15, %16 : vector<16x32xf32>
      %c0_16 = arith.constant 0 : index
      %c0_17 = arith.constant 0 : index
      %18 = vector.load %arg7[%c0_16, %c0_17] : memref<16x32xf32, #tpu.memory_space<vmem>>, vector<16x32xf32>
      tpu.vector_store %arg7[%c0_16, %c0_17], %17 {strides = array<i32>} : memref<16x32xf32, #tpu.memory_space<vmem>>, vector<16x32xf32>,
    } else {
    }
    return
  }
  func.func @transform_0(%arg0: i32, %arg1: i32, %arg2: i32) -> (i32, i32) {
    %c0_i32 = arith.constant 0 : i32
    return %arg0, %arg2 : i32, i32
  }
  func.func @transform_1(%arg0: i32, %arg1: i32, %arg2: i32) -> (i32, i32) {
    %c0_i32 = arith.constant 0 : i32
    return %arg2, %arg1 : i32, i32
  }
  func.func @transform_2(%arg0: i32, %arg1: i32, %arg2: i32) -> (i32, i32) {
    %c0_i32 = arith.constant 0 : i32
    %c0_i32_0 = arith.constant 0 : i32
    return %c0_i32, %arg1 : i32, i32
  }
  func.func @transform_3(%arg0: i32, %arg1: i32, %arg2: i32) -> (i32, i32) {
    %c0_i32 = arith.constant 0 : i32
    return %arg0, %arg1 : i32, i32
  }
  func.func @transform_4(%arg0: i32, %arg1: i32, %arg2: i32) -> (i32, i32) {
    %c0_i32 = arith.constant 0 : i32
    return %arg0, %arg1 : i32, i32
  }
}

module attributes {stable_mosaic.version = 11 : i64} {
  func.func @kernel(%arg0: i32, %arg1: i32, %arg2: i32, %arg3: memref<16x32xbf16, #tpu.memory_space<vmem>>, %arg4: memref<32x11xbf16, #tpu.memory_space<vmem>>, %arg5: memref<1x11xf32, #tpu.memory_space<vmem>>, %arg6: memref<16x11xf32, #tpu.memory_space<vmem>>, %arg7: memref<16x11xf32, #tpu.memory_space<vmem>>) attributes {dimension_semantics = [#tpu.dimension_semantics<parallel>, #tpu.dimension_semantics<parallel>, #tpu.dimension_semantics<arbitrary>], iteration_bounds = array<i64: 1, 1, 1>, scalar_prefetch = 0 : i64, scratch_operands = 1 : i64, tpu.core_type = #tpu.core_type<tc>, window_params = [{transform_indices = @transform_0, window_bounds = array<i64: 16, 32>}, {transform_indices = @transform_1, window_bounds = array<i64: 32, 11>}, {transform_indices = @transform_2, window_bounds = array<i64: 1, 11>}, {transform_indices = @transform_3, window_bounds = array<i64: 16, 11>}]} {
    %c0_i32 = arith.constant 0 : i32
    %0 = arith.cmpi eq, %arg2, %c0_i32 : i32
    %1 = arith.extui %0 : i1 to i32
    %c0_i32_0 = arith.constant 0 : i32
    %2 = arith.cmpi ne, %1, %c0_i32_0 : i32
    scf.if %2 {
      %cst_10 = arith.constant 0.000000e+00 : f32
      %12 = vector.broadcast %cst_10 : f32 to vector<16x11xf32>
      %c0_11 = arith.constant 0 : index
      %c0_12 = arith.constant 0 : index
      %13 = vector.load %arg7[%c0_11, %c0_12] : memref<16x11xf32, #tpu.memory_space<vmem>>, vector<16x11xf32>
      tpu.vector_store %arg7[%c0_11, %c0_12], %12 {strides = array<i32>} : memref<16x11xf32, #tpu.memory_space<vmem>>, vector<16x11xf32>,
    } else {
    }
    %c0 = arith.constant 0 : index
    %c0_1 = arith.constant 0 : index
    %3 = vector.load %arg7[%c0, %c0_1] : memref<16x11xf32, #tpu.memory_space<vmem>>, vector<16x11xf32>
    %c0_2 = arith.constant 0 : index
    %c0_3 = arith.constant 0 : index
    %4 = vector.load %arg3[%c0_2, %c0_3] : memref<16x32xbf16, #tpu.memory_space<vmem>>, vector<16x32xbf16>
    %c0_4 = arith.constant 0 : index
    %c0_5 = arith.constant 0 : index
    %5 = vector.load %arg4[%c0_4, %c0_5] : memref<32x11xbf16, #tpu.memory_space<vmem>>, vector<32x11xbf16>
    %cst = arith.constant dense<0.000000e+00> : vector<16x11xf32>
    %6 = tpu.matmul %4, %5, %cst {dimension_numbers = #tpu.dot_dimension_numbers<[1], [0], [0], [1], [0, 0, 1, 1], [], []>} : vector<16x32xbf16>, vector<32x11xbf16>, vector<16x11xf32> -> vector<16x11xf32>
    %7 = arith.addf %3, %6 : vector<16x11xf32>
    %c0_6 = arith.constant 0 : index
    %c0_7 = arith.constant 0 : index
    %8 = vector.load %arg7[%c0_6, %c0_7] : memref<16x11xf32, #tpu.memory_space<vmem>>, vector<16x11xf32>
    tpu.vector_store %arg7[%c0_6, %c0_7], %7 {strides = array<i32>} : memref<16x11xf32, #tpu.memory_space<vmem>>, vector<16x11xf32>,
    %c0_i32_8 = arith.constant 0 : i32
    %9 = arith.cmpi eq, %arg2, %c0_i32_8 : i32
    %10 = arith.extui %9 : i1 to i32
    %c0_i32_9 = arith.constant 0 : i32
    %11 = arith.cmpi ne, %10, %c0_i32_9 : i32
    scf.if %11 {
      %c0_10 = arith.constant 0 : index
      %c0_11 = arith.constant 0 : index
      %12 = vector.load %arg7[%c0_10, %c0_11] : memref<16x11xf32, #tpu.memory_space<vmem>>, vector<16x11xf32>
      %c0_12 = arith.constant 0 : index
      %c0_13 = arith.constant 0 : index
      %13 = vector.load %arg5[%c0_12, %c0_13] : memref<1x11xf32, #tpu.memory_space<vmem>>, vector<1x11xf32>
      %14 = vector.broadcast %13 : vector<1x11xf32> to vector<16x11xf32>
      %15 = arith.addf %12, %14 : vector<16x11xf32>
      %c0_14 = arith.constant 0 : index
      %c0_15 = arith.constant 0 : index
      %16 = vector.load %arg6[%c0_14, %c0_15] : memref<16x11xf32, #tpu.memory_space<vmem>>, vector<16x11xf32>
      tpu.vector_store %arg6[%c0_14, %c0_15], %15 {strides = array<i32>} : memref<16x11xf32, #tpu.memory_space<vmem>>, vector<16x11xf32>,
    } else {
    }
    return
  }
  func.func @transform_0(%arg0: i32, %arg1: i32, %arg2: i32) -> (i32, i32) {
    %c0_i32 = arith.constant 0 : i32
    return %arg0, %arg2 : i32, i32
  }
  func.func @transform_1(%arg0: i32, %arg1: i32, %arg2: i32) -> (i32, i32) {
    %c0_i32 = arith.constant 0 : i32
    return %arg2, %arg1 : i32, i32
  }
  func.func @transform_2(%arg0: i32, %arg1: i32, %arg2: i32) -> (i32, i32) {
    %c0_i32 = arith.constant 0 : i32
    %c0_i32_0 = arith.constant 0 : i32
    return %c0_i32, %arg1 : i32, i32
  }
  func.func @transform_3(%arg0: i32, %arg1: i32, %arg2: i32) -> (i32, i32) {
    %c0_i32 = arith.constant 0 : i32
    return %arg0, %arg1 : i32, i32
  }
}

module attributes {stable_mosaic.version = 11 : i64} {
  func.func @kernel(%arg0: i32, %arg1: i32, %arg2: i32, %arg3: memref<24x32xbf16, #tpu.memory_space<vmem>>, %arg4: memref<32x11xbf16, #tpu.memory_space<vmem>>, %arg5: memref<1x11xf32, #tpu.memory_space<vmem>>, %arg6: memref<24x11xf32, #tpu.memory_space<vmem>>, %arg7: memref<24x11xf32, #tpu.memory_space<vmem>>) attributes {dimension_semantics = [#tpu.dimension_semantics<parallel>, #tpu.dimension_semantics<parallel>, #tpu.dimension_semantics<arbitrary>], iteration_bounds = array<i64: 1, 1, 1>, scalar_prefetch = 0 : i64, scratch_operands = 1 : i64, tpu.core_type = #tpu.core_type<tc>, window_params = [{transform_indices = @transform_0, window_bounds = array<i64: 24, 32>}, {transform_indices = @transform_1, window_bounds = array<i64: 32, 11>}, {transform_indices = @transform_2, window_bounds = array<i64: 1, 11>}, {transform_indices = @transform_3, window_bounds = array<i64: 24, 11>}]} {
    %c0_i32 = arith.constant 0 : i32
    %0 = arith.cmpi eq, %arg2, %c0_i32 : i32
    %1 = arith.extui %0 : i1 to i32
    %c0_i32_0 = arith.constant 0 : i32
    %2 = arith.cmpi ne, %1, %c0_i32_0 : i32
    scf.if %2 {
      %cst_10 = arith.constant 0.000000e+00 : f32
      %12 = vector.broadcast %cst_10 : f32 to vector<24x11xf32>
      %c0_11 = arith.constant 0 : index
      %c0_12 = arith.constant 0 : index
      %13 = vector.load %arg7[%c0_11, %c0_12] : memref<24x11xf32, #tpu.memory_space<vmem>>, vector<24x11xf32>
      tpu.vector_store %arg7[%c0_11, %c0_12], %12 {strides = array<i32>} : memref<24x11xf32, #tpu.memory_space<vmem>>, vector<24x11xf32>,
    } else {
    }
    %c0 = arith.constant 0 : index
    %c0_1 = arith.constant 0 : index
    %3 = vector.load %arg7[%c0, %c0_1] : memref<24x11xf32, #tpu.memory_space<vmem>>, vector<24x11xf32>
    %c0_2 = arith.constant 0 : index
    %c0_3 = arith.constant 0 : index
    %4 = vector.load %arg3[%c0_2, %c0_3] : memref<24x32xbf16, #tpu.memory_space<vmem>>, vector<24x32xbf16>
    %c0_4 = arith.constant 0 : index
    %c0_5 = arith.constant 0 : index
    %5 = vector.load %arg4[%c0_4, %c0_5] : memref<32x11xbf16, #tpu.memory_space<vmem>>, vector<32x11xbf16>
    %cst = arith.constant dense<0.000000e+00> : vector<24x11xf32>
    %6 = tpu.matmul %4, %5, %cst {dimension_numbers = #tpu.dot_dimension_numbers<[1], [0], [0], [1], [0, 0, 1, 1], [], []>} : vector<24x32xbf16>, vector<32x11xbf16>, vector<24x11xf32> -> vector<24x11xf32>
    %7 = arith.addf %3, %6 : vector<24x11xf32>
    %c0_6 = arith.constant 0 : index
    %c0_7 = arith.constant 0 : index
    %8 = vector.load %arg7[%c0_6, %c0_7] : memref<24x11xf32, #tpu.memory_space<vmem>>, vector<24x11xf32>
    tpu.vector_store %arg7[%c0_6, %c0_7], %7 {strides = array<i32>} : memref<24x11xf32, #tpu.memory_space<vmem>>, vector<24x11xf32>,
    %c0_i32_8 = arith.constant 0 : i32
    %9 = arith.cmpi eq, %arg2, %c0_i32_8 : i32
    %10 = arith.extui %9 : i1 to i32
    %c0_i32_9 = arith.constant 0 : i32
    %11 = arith.cmpi ne, %10, %c0_i32_9 : i32
    scf.if %11 {
      %c0_10 = arith.constant 0 : index
      %c0_11 = arith.constant 0 : index
      %12 = vector.load %arg7[%c0_10, %c0_11] : memref<24x11xf32, #tpu.memory_space<vmem>>, vector<24x11xf32>
      %c0_12 = arith.constant 0 : index
      %c0_13 = arith.constant 0 : index
      %13 = vector.load %arg5[%c0_12, %c0_13] : memref<1x11xf32, #tpu.memory_space<vmem>>, vector<1x11xf32>
      %14 = vector.broadcast %13 : vector<1x11xf32> to vector<24x11xf32>
      %15 = arith.addf %12, %14 : vector<24x11xf32>
      %c0_14 = arith.constant 0 : index
      %c0_15 = arith.constant 0 : index
      %16 = vector.load %arg6[%c0_14, %c0_15] : memref<24x11xf32, #tpu.memory_space<vmem>>, vector<24x11xf32>
      tpu.vector_store %arg6[%c0_14, %c0_15], %15 {strides = array<i32>} : memref<24x11xf32, #tpu.memory_space<vmem>>, vector<24x11xf32>,
    } else {
    }
    return
  }
  func.func @transform_0(%arg0: i32, %arg1: i32, %arg2: i32) -> (i32, i32) {
    %c0_i32 = arith.constant 0 : i32
    return %arg0, %arg2 : i32, i32
  }
  func.func @transform_1(%arg0: i32, %arg1: i32, %arg2: i32) -> (i32, i32) {
    %c0_i32 = arith.constant 0 : i32
    return %arg2, %arg1 : i32, i32
  }
  func.func @transform_2(%arg0: i32, %arg1: i32, %arg2: i32) -> (i32, i32) {
    %c0_i32 = arith.constant 0 : i32
    %c0_i32_0 = arith.constant 0 : i32
    return %c0_i32, %arg1 : i32, i32
  }
  func.func @transform_3(%arg0: i32, %arg1: i32, %arg2: i32) -> (i32, i32) {
    %c0_i32 = arith.constant 0 : i32
    return %arg0, %arg1 : i32, i32
  }
}

</mosaic_0001>

<bundles_post_ra>
// kernel: _lambda_.52
= control target key start
LH: loop header
LB: loop body
LE: loop exit
PB: predicated region body
PF: predicated region fallthrough
CT: control target
= control target key end

     0   :  { %vm28_vm0 = vcmask 261120   ;;  %v300_v6 = vmov 32.0   ;;  %vm119_vm6 = vcmask 257024   ;;  %s377_s0 = inlined_call_operand.vmem [shape: f32[24,32], index: 0, kind: input, shape index: {}]   ;;  %s378_s1 = inlined_call_operand.vmem [shape: f32[1,32], index: 1, kind: input, shape index: {}]   ;;  %s379_s2 = inlined_call_operand.vmem [shape: f32[1,32], index: 2, kind: input, shape index: {}]   ;;  %s380_s4 = inlined_call_operand.vmem [shape: f32[1,128], index: 4, kind: input, shape index: {}]   ;;  %s381_s3 = inlined_call_operand.vmem [shape: bf16[32,128], index: 3, kind: input, shape index: {}]   ;;  %s382_s5 = inlined_call_operand.vmem [shape: bf16[24,128], index: 5, kind: output, shape index: {}]  }
   0x1   :  { %v25_v0 = vld [vmem:[%s377_s0] sm:$0xff]  ;;  %v27_v1 = vld [vmem:[%s377_s0 + $0x10] sm:$0xff]  ;;  %v26_v4 = vld [vmem:[%s377_s0 + $0x8] sm:$0xff]  ;;  %280 = vrcp.f32 %v300_v6 }
   0x2   :  { %v29_v2 = vsel %vm28_vm0, %v25_v0, 0.0  ;;  %v35_v3 = vsel %vm28_vm0, %v27_v1, 0.0  ;;  %v32_v5 = vsel %vm28_vm0, %v26_v4, 0.0  ;;  %v268_v31 = vld [vmem:[%s381_s3 + $0x8] sm:$0xff]  ;;  %v267_v36 = vld [vmem:[%s381_s3] sm:$0xff] }
   0x3   :  { %30 = vadd.xlane.f32.xlu0 %v29_v2  ;;  %36 = vadd.xlane.f32.xlu1 %v35_v3  ;;  %v277_v47 = vld [vmem:[%s378_s1] ss:$0 sm:$0xff] }
   0x4   :  { %167 = vmatpush.bf16.msra.mxu0 %v268_v31  ;;  %274 = vmatpush.bf16.msra.mxu1 %v268_v31  ;;  %v278_v50 = vld [vmem:[%s379_s2] ss:$0 sm:$0xff] }
   0x7   :  { %v281_v7 = vpop.eup %280 }
   0x8   :  { %v39_v8 = vmul.f32 32.0, %v281_v7  ;;  %vm43_vm1 = vweird.f32 %v281_v7  ;;  %168 = vmatpush.bf16.msra.mxu0 %v267_v36  ;;  %275 = vmatpush.bf16.msra.mxu1 %v267_v36 }
   0xa   :  { %v40_v9 = vsub.f32 1.0, %v39_v8 }
   0xb   :  { %33 = vadd.xlane.f32.xlu0 %v32_v5 }
   0xc   :  { %v41_v10 = vmul.f32 %v281_v7, %v40_v9 }
   0xe   :  { %v42_v11 = vadd.f32 %v281_v7, %v41_v10 }
  0x10   :  { %v44_v12 = vsel %vm43_vm1, %v281_v7, %v42_v11 }
  0x76   :  { %v31_v13 = vpop.xlane.xlu0 %30  ;;  %v37_v17 = vpop.xlane.xlu1 %36 }
  0x77   :  { %v45_v14 = vmul.f32 %v44_v12, %v31_v13  ;;  %v47_v21 = vmul.f32 %v44_v12, %v37_v17 }
  0x79   :  { %v48_v15 = vsub.f32 %v25_v0, %v45_v14  ;;  %v344_v23 = vsub.f32 %v27_v1, %v47_v21  ;;  %v279_v14 = vld [vmem:[%s380_s4] ss:$0 sm:$0xff] }
  0x7b   :  { %v51_v16 = vmul.f32 %v48_v15, %v48_v15  ;;  %v53_v26 = vmul.f32 %v344_v23, %v344_v23 }
  0x7d   :  { %v54_v18 = vsel %vm28_vm0, %v51_v16, 0.0  ;;  %v60_v27 = vsel %vm28_vm0, %v53_v26, 0.0 }
  0x7e   :  { %55 = vadd.xlane.f32.xlu1 %v54_v18  ;;  %v34_v19 = vpop.xlane.xlu0 %33 }
  0x7f   :  { %v46_v20 = vmul.f32 %v44_v12, %v34_v19 }
  0x81   :  { %v49_v22 = vsub.f32 %v26_v4, %v46_v20 }
  0x83   :  { %v52_v24 = vmul.f32 %v49_v22, %v49_v22 }
  0x85   :  { %v57_v25 = vsel %vm28_vm0, %v52_v24, 0.0 }
  0x86   :  { %58 = vadd.xlane.f32.xlu2 %v57_v25 }
  0x8e   :  { %61 = vadd.xlane.f32.xlu2 %v60_v27 }
  0xf1   :  { %v56_v28 = vpop.xlane.xlu1 %55 }
  0xf2   :  { %v63_v29 = vmul.f32 %v56_v28, %v44_v12 }
  0xf4   :  { %v66_v30 = vadd.f32 1e-05, %v63_v29 }
  0xf6   :  { %282 = vrsqrt.f32 %v66_v30  ;;  %vm75_vm3 = vweird.f32 %v66_v30 }
  0xf9   :  { %v59_v32 = vpop.xlane.xlu2 %58 }
  0xfa   :  { %v64_v33 = vmul.f32 %v59_v32, %v44_v12 }
  0xfc   :  { %v283_v34 = vpop.eup %282  ;;  %v67_v35 = vadd.f32 1e-05, %v64_v33 }
  0xfd   :  { %v70_v37 = vmul.f32 %v283_v34, %v66_v30  ;;  %vm76_vm2 = vweird.f32 %v283_v34 }
  0xfe   :  { %284 = vrsqrt.f32 %v67_v35  ;;  %vm77_vm4 = vmor %vm75_vm3, %vm76_vm2  ;;  %vm85_vm7 = vweird.f32 %v67_v35 }
  0xff   :  { %v71_v38 = vmul.f32 %v283_v34, %v70_v37 }
 0x101   :  { %v72_v39 = vmul.f32 0.5, %v71_v38  ;;  %v62_v40 = vpop.xlane.xlu2 %61 }
 0x102   :  { %v65_v41 = vmul.f32 %v62_v40, %v44_v12 }
 0x103   :  { %v73_v42 = vsub.f32 1.5, %v72_v39 }
 0x104   :  { %v285_v43 = vpop.eup %284  ;;  %v68_v44 = vadd.f32 1e-05, %v65_v41 }
 0x105   :  { %v74_v45 = vmul.f32 %v283_v34, %v73_v42  ;;  %v80_v46 = vmul.f32 %v285_v43, %v67_v35  ;;  %vm86_vm5 = vweird.f32 %v285_v43 }
 0x106   :  { %286 = vrsqrt.f32 %v68_v44  ;;  %vm87_vm8 = vmor %vm85_vm7, %vm86_vm5  ;;  %vm95_vm10 = vweird.f32 %v68_v44 }
 0x107   :  { %v78_v48 = vsel %vm77_vm4, %v283_v34, %v74_v45  ;;  %v81_v49 = vmul.f32 %v285_v43, %v80_v46 }
 0x108   :  { %v99_v51 = vmul.f32 %v78_v48, %v48_v15 }
 0x109   :  { %v82_v52 = vmul.f32 0.5, %v81_v49 }
 0x10a   :  { %v106_v53 = vmul.f32 %v277_v47, %v99_v51 }
 0x10b   :  { %v83_v54 = vsub.f32 1.5, %v82_v52 }
 0x10c   :  { %v287_v55 = vpop.eup %286  ;;  %v113_v56 = vadd.f32 %v278_v50, %v106_v53 }
 0x10d   :  { %v84_v57 = vmul.f32 %v285_v43, %v83_v54  ;;  %v90_v58 = vmul.f32 %v287_v55, %v68_v44  ;;  %vm96_vm9 = vweird.f32 %v287_v55 }
 0x10e   :  { %v116_v59 = vpack.c.bf16 %v113_v56, %v113_v56  ;;  %vm97_vm11 = vmor %vm95_vm10, %vm96_vm9 }
 0x10f   :  { %v88_v60 = vsel %vm87_vm8, %v285_v43, %v84_v57  ;;  %v91_v61 = vmul.f32 %v287_v55, %v90_v58 }
 0x110   :  { %120 = vst.msk [vmem:[#allocation2] sm:$0xf] %vm119_vm6, %v116_v59  ;;  %v100_v62 = vmul.f32 %v88_v60, %v49_v22 }
 0x111   :  { %v92_v63 = vmul.f32 0.5, %v91_v61 }
 0x112   :  { %v107_v0 = vmul.f32 %v277_v47, %v100_v62 }
 0x113   :  { %v93_v1 = vsub.f32 1.5, %v92_v63 }
 0x114   :  { %v114_v2 = vadd.f32 %v278_v50, %v107_v0 }
 0x115   :  { %v94_v3 = vmul.f32 %v287_v55, %v93_v1 }
 0x116   :  { %v117_v4 = vpack.c.bf16 %v114_v2, %v114_v2 }
 0x117   :  { %v98_v5 = vsel %vm97_vm11, %v287_v55, %v94_v3 }
 0x118   :  { %121 = vst.msk [vmem:[#allocation2 + $0x4] sm:$0xf] %vm119_vm6, %v117_v4  ;;  %v101_v6 = vmul.f32 %v98_v5, %v344_v23 }
 0x11a   :  { %v108_v7 = vmul.f32 %v277_v47, %v101_v6 }
 0x11c   :  { %v115_v8 = vadd.f32 %v278_v50, %v108_v7 }
 0x11e   :  { %v118_v9 = vpack.c.bf16 %v115_v8, %v115_v8 }
 0x11f   :  { %v266_v10 = vld [vmem:[#allocation2] sm:$0xff] }
 0x120   :  { %122 = vst.msk [vmem:[#allocation2 + $0x8] sm:$0xf] %vm119_vm6, %v118_v9  ;;  %261 = vmatmul.msk.bf16.vlgmr.msra.gmra.mxu0 %vm28_vm0, %v266_v10 }
 0x127   :  { %v125_v11 = vld [vmem:[#allocation2 + $0x8] sm:$0xf] }
 0x128   :  { %v139_v12 = vunpack.c.l.b16 %v125_v11 }
 0x12a   :  { %v141_v13 = vpack.c.b16 %v139_v12, %v139_v12 }
 0x12c   :  { %262 = vmatmul.msk.bf16.vlgmr.msra.gmra.mxu1 %vm28_vm0, %v141_v13 }
 0x19d   :  { %v170_v15 = vpop.f32.mrf.mxu0 }
 0x19e   :  { %v171_v16 = vadd.f32 %v279_v14, %v170_v15 }
 0x1a0   :  { %v263_v17 = vmul.f32 -1.442695, %v171_v16 }
 0x1a2   :  { %288 = vpow2.f32 %v263_v17 }
 0x1a5   :  { %v172_v18 = vpop.f32.mrf.mxu0 }
 0x1a6   :  { %v173_v19 = vadd.f32 %v279_v14, %v172_v18 }
 0x1a8   :  { %v289_v20 = vpop.eup %288  ;;  %v264_v21 = vmul.f32 -1.442695, %v173_v19 }
 0x1a9   :  { %v175_v22 = vpop.f32.mrf.mxu1  ;;  %v188_v23 = vadd.f32 1.0, %v289_v20 }
 0x1aa   :  { %v176_v24 = vadd.f32 %v279_v14, %v175_v22  ;;  %290 = vpow2.f32 %v264_v21 }
 0x1ab   :  { %292 = vrcp.f32 %v188_v23  ;;  %v202_v38 = vand.u32 2147483648, %v188_v23  ;;  %vm196_vm13 = vweird.f32 %v188_v23  ;;  %v200_v39 = vand.u32 2147483647, %v188_v23 }
 0x1ac   :  { %v265_v25 = vmul.f32 -1.442695, %v176_v24 }
 0x1ad   :  { %v203_v47 = vor.u32 1.1754944e-38, %v202_v38  ;;  %vm201_vm0 = vcmp.eq.f32.partialorder %v200_v39, 8.507059e+37 }
 0x1ae   :  { %294 = vpow2.f32 %v265_v25 }
 0x1b0   :  { %v291_v26 = vpop.eup %290 }
 0x1b1   :  { %v177_v27 = vpop.f32.mrf.mxu1  ;;  %v293_v28 = vpop.eup %292  ;;  %v189_v29 = vadd.f32 1.0, %v291_v26 }
 0x1b2   :  { %v192_v30 = vmul.f32 %v293_v28, %v188_v23  ;;  %vm197_vm12 = vweird.f32 %v293_v28 }
 0x1b3   :  { %296 = vrcp.f32 %v189_v29  ;;  %vm198_vm14 = vmor %vm196_vm13, %vm197_vm12  ;;  %v215_v42 = vand.u32 2147483647, %v189_v29  ;;  %v217_v43 = vand.u32 2147483648, %v189_v29  ;;  %vm211_vm1 = vweird.f32 %v189_v29 }
 0x1b4   :  { %v295_v31 = vpop.eup %294  ;;  %v193_v32 = vsub.f32 1.0, %v192_v30 }
 0x1b5   :  { %v190_v33 = vadd.f32 1.0, %v295_v31  ;;  %vm216_vm3 = vcmp.eq.f32.partialorder %v215_v42, 8.507059e+37  ;;  %v218_v51 = vor.u32 1.1754944e-38, %v217_v43 }
 0x1b6   :  { %v194_v34 = vmul.f32 %v293_v28, %v193_v32 }
 0x1b7   :  { %298 = vrcp.f32 %v190_v33  ;;  %v232_v52 = vand.u32 2147483648, %v190_v33  ;;  %v230_v55 = vand.u32 2147483647, %v190_v33  ;;  %vm226_vm5 = vweird.f32 %v190_v33 }
 0x1b8   :  { %v195_v36 = vadd.f32 %v293_v28, %v194_v34 }
 0x1b9   :  { %v297_v35 = vpop.eup %296  ;;  %v233_v60 = vor.u32 1.1754944e-38, %v232_v52  ;;  %vm231_vm7 = vcmp.eq.f32.partialorder %v230_v55, 8.507059e+37 }
 0x1ba   :  { %v207_v37 = vmul.f32 %v297_v35, %v189_v29  ;;  %v199_v44 = vsel %vm198_vm14, %v293_v28, %v195_v36  ;;  %vm212_vm15 = vweird.f32 %v297_v35 }
 0x1bb   :  { %v204_v50 = vsel %vm201_vm0, %v203_v47, %v199_v44  ;;  %vm213_vm2 = vmor %vm211_vm1, %vm212_vm15 }
 0x1bc   :  { %v208_v40 = vsub.f32 1.0, %v207_v37  ;;  %v236_v57 = vmul.f32 %v204_v50, %v171_v16 }
 0x1bd   :  { %v299_v41 = vpop.eup %298 }
 0x1be   :  { %v209_v45 = vmul.f32 %v297_v35, %v208_v40  ;;  %v222_v46 = vmul.f32 %v299_v41, %v190_v33  ;;  %vm227_vm4 = vweird.f32 %v299_v41 }
 0x1bf   :  { %vm228_vm6 = vmor %vm226_vm5, %vm227_vm4 }
 0x1c0   :  { %v210_v48 = vadd.f32 %v297_v35, %v209_v45  ;;  %v223_v49 = vsub.f32 1.0, %v222_v46 }
 0x1c2   :  { %v214_v53 = vsel %vm213_vm2, %v297_v35, %v210_v48  ;;  %v224_v54 = vmul.f32 %v299_v41, %v223_v49 }
 0x1c3   :  { %v219_v56 = vsel %vm216_vm3, %v218_v51, %v214_v53 }
 0x1c4   :  { %v237_v58 = vmul.f32 %v219_v56, %v173_v19  ;;  %v225_v59 = vadd.f32 %v299_v41, %v224_v54 }
 0x1c6   :  { %v272_v61 = vpack.c.bf16 %v237_v58, %v236_v57  ;;  %v229_v62 = vsel %vm228_vm6, %v299_v41, %v225_v59 }
 0x1c7   :  { %v234_v63 = vsel %vm231_vm7, %v233_v60, %v229_v62 }
 0x1c8   :  { %v238_v0 = vmul.f32 %v234_v63, %v176_v24  ;;  %273 = vst [vmem:[%s382_s5] sm:$0xff] %v272_v61  }
 0x1ca   :  { %v241_v1 = vpack.c.bf16 %v238_v0, %v238_v0 }
 0x1cc   :  { %244 = vst [vmem:[%s382_s5 + $0x8] sm:$0xf] %v241_v1 }

// kernel: _lambda_.54
= control target key start
LH: loop header
LB: loop body
LE: loop exit
PB: predicated region body
PF: predicated region fallthrough
CT: control target
= control target key end

     0   :  { %vm25_vm0 = vcmask 261120   ;;  %v213_v6 = vmov 32.0   ;;  %vm116_vm6 = vcmask 257024   ;;  %vm175_vm12 = vcmask 781312   ;;  %s285_s0 = inlined_call_operand.vmem [shape: f32[24,32], index: 0, kind: input, shape index: {}]   ;;  %s286_s1 = inlined_call_operand.vmem [shape: f32[1,32], index: 1, kind: input, shape index: {}]   ;;  %s287_s2 = inlined_call_operand.vmem [shape: f32[1,32], index: 2, kind: input, shape index: {}]   ;;  %s288_s3 = inlined_call_operand.vmem [shape: bf16[32,96], index: 3, kind: input, shape index: {}]   ;;  %s289_s4 = inlined_call_operand.vmem [shape: bf16[24,96], index: 4, kind: output, shape index: {}]  }
   0x1   :  { %v22_v0 = vld [vmem:[%s285_s0] sm:$0xff]  ;;  %v24_v1 = vld [vmem:[%s285_s0 + $0x10] sm:$0xff]  ;;  %v23_v4 = vld [vmem:[%s285_s0 + $0x8] sm:$0xff]  ;;  %205 = vrcp.f32 %v213_v6 }
   0x2   :  { %v26_v2 = vsel %vm25_vm0, %v22_v0, 0.0  ;;  %v32_v3 = vsel %vm25_vm0, %v24_v1, 0.0  ;;  %v29_v5 = vsel %vm25_vm0, %v23_v4, 0.0  ;;  %v199_v31 = vld [vmem:[%s288_s3 + $0x8] sm:$0xff]  ;;  %v198_v36 = vld [vmem:[%s288_s3] sm:$0xff] }
   0x3   :  { %27 = vadd.xlane.f32.xlu0 %v26_v2  ;;  %33 = vadd.xlane.f32.xlu1 %v32_v3  ;;  %v203_v47 = vld [vmem:[%s286_s1] ss:$0 sm:$0xff] }
   0x4   :  { %160 = vmatpush.bf16.msra.mxu0 %v199_v31  ;;  %200 = vmatpush.bf16.msra.mxu1 %v199_v31  ;;  %v204_v50 = vld [vmem:[%s287_s2] ss:$0 sm:$0xff] }
   0x7   :  { %v206_v7 = vpop.eup %205 }
   0x8   :  { %v36_v8 = vmul.f32 32.0, %v206_v7  ;;  %vm40_vm1 = vweird.f32 %v206_v7  ;;  %161 = vmatpush.bf16.msra.mxu0 %v198_v36  ;;  %201 = vmatpush.bf16.msra.mxu1 %v198_v36 }
   0xa   :  { %v37_v9 = vsub.f32 1.0, %v36_v8 }
   0xb   :  { %30 = vadd.xlane.f32.xlu0 %v29_v5 }
   0xc   :  { %v38_v10 = vmul.f32 %v206_v7, %v37_v9 }
   0xe   :  { %v39_v11 = vadd.f32 %v206_v7, %v38_v10 }
  0x10   :  { %v41_v12 = vsel %vm40_vm1, %v206_v7, %v39_v11 }
  0x76   :  { %v28_v13 = vpop.xlane.xlu0 %27  ;;  %v34_v17 = vpop.xlane.xlu1 %33 }
  0x77   :  { %v42_v14 = vmul.f32 %v41_v12, %v28_v13  ;;  %v44_v21 = vmul.f32 %v41_v12, %v34_v17 }
  0x79   :  { %v45_v15 = vsub.f32 %v22_v0, %v42_v14  ;;  %v252_v23 = vsub.f32 %v24_v1, %v44_v21 }
  0x7b   :  { %v48_v16 = vmul.f32 %v45_v15, %v45_v15  ;;  %v50_v26 = vmul.f32 %v252_v23, %v252_v23 }
  0x7d   :  { %v51_v18 = vsel %vm25_vm0, %v48_v16, 0.0  ;;  %v57_v27 = vsel %vm25_vm0, %v50_v26, 0.0 }
  0x7e   :  { %52 = vadd.xlane.f32.xlu1 %v51_v18  ;;  %v31_v19 = vpop.xlane.xlu0 %30 }
  0x7f   :  { %v43_v20 = vmul.f32 %v41_v12, %v31_v19 }
  0x81   :  { %v46_v22 = vsub.f32 %v23_v4, %v43_v20 }
  0x83   :  { %v49_v24 = vmul.f32 %v46_v22, %v46_v22 }
  0x85   :  { %v54_v25 = vsel %vm25_vm0, %v49_v24, 0.0 }
  0x86   :  { %55 = vadd.xlane.f32.xlu2 %v54_v25 }
  0x8e   :  { %58 = vadd.xlane.f32.xlu2 %v57_v27 }
  0xf1   :  { %v53_v28 = vpop.xlane.xlu1 %52 }
  0xf2   :  { %v60_v29 = vmul.f32 %v53_v28, %v41_v12 }
  0xf4   :  { %v63_v30 = vadd.f32 1e-05, %v60_v29 }
  0xf6   :  { %207 = vrsqrt.f32 %v63_v30  ;;  %vm72_vm3 = vweird.f32 %v63_v30 }
  0xf9   :  { %v56_v32 = vpop.xlane.xlu2 %55 }
  0xfa   :  { %v61_v33 = vmul.f32 %v56_v32, %v41_v12 }
  0xfc   :  { %v208_v34 = vpop.eup %207  ;;  %v64_v35 = vadd.f32 1e-05, %v61_v33 }
  0xfd   :  { %v67_v37 = vmul.f32 %v208_v34, %v63_v30  ;;  %vm73_vm2 = vweird.f32 %v208_v34 }
  0xfe   :  { %209 = vrsqrt.f32 %v64_v35  ;;  %vm74_vm4 = vmor %vm72_vm3, %vm73_vm2  ;;  %vm82_vm7 = vweird.f32 %v64_v35 }
  0xff   :  { %v68_v38 = vmul.f32 %v208_v34, %v67_v37 }
 0x101   :  { %v69_v39 = vmul.f32 0.5, %v68_v38  ;;  %v59_v40 = vpop.xlane.xlu2 %58 }
 0x102   :  { %v62_v41 = vmul.f32 %v59_v40, %v41_v12 }
 0x103   :  { %v70_v42 = vsub.f32 1.5, %v69_v39 }
 0x104   :  { %v210_v43 = vpop.eup %209  ;;  %v65_v44 = vadd.f32 1e-05, %v62_v41 }
 0x105   :  { %v71_v45 = vmul.f32 %v208_v34, %v70_v42  ;;  %v77_v46 = vmul.f32 %v210_v43, %v64_v35  ;;  %vm83_vm5 = vweird.f32 %v210_v43 }
 0x106   :  { %211 = vrsqrt.f32 %v65_v44  ;;  %vm84_vm8 = vmor %vm82_vm7, %vm83_vm5  ;;  %vm92_vm10 = vweird.f32 %v65_v44 }
 0x107   :  { %v75_v48 = vsel %vm74_vm4, %v208_v34, %v71_v45  ;;  %v78_v49 = vmul.f32 %v210_v43, %v77_v46 }
 0x108   :  { %v96_v51 = vmul.f32 %v75_v48, %v45_v15 }
 0x109   :  { %v79_v52 = vmul.f32 0.5, %v78_v49 }
 0x10a   :  { %v103_v53 = vmul.f32 %v203_v47, %v96_v51 }
 0x10b   :  { %v80_v54 = vsub.f32 1.5, %v79_v52 }
 0x10c   :  { %v212_v55 = vpop.eup %211  ;;  %v110_v56 = vadd.f32 %v204_v50, %v103_v53 }
 0x10d   :  { %v81_v57 = vmul.f32 %v210_v43, %v80_v54  ;;  %v87_v58 = vmul.f32 %v212_v55, %v65_v44  ;;  %vm93_vm9 = vweird.f32 %v212_v55 }
 0x10e   :  { %v113_v59 = vpack.c.bf16 %v110_v56, %v110_v56  ;;  %vm94_vm11 = vmor %vm92_vm10, %vm93_vm9 }
 0x10f   :  { %v85_v60 = vsel %vm84_vm8, %v210_v43, %v81_v57  ;;  %v88_v61 = vmul.f32 %v212_v55, %v87_v58 }
 0x110   :  { %117 = vst.msk [vmem:[#allocation2] sm:$0xf] %vm116_vm6, %v113_v59  ;;  %v97_v62 = vmul.f32 %v85_v60, %v46_v22 }
 0x111   :  { %v89_v63 = vmul.f32 0.5, %v88_v61 }
 0x112   :  { %v104_v0 = vmul.f32 %v203_v47, %v97_v62 }
 0x113   :  { %v90_v1 = vsub.f32 1.5, %v89_v63 }
 0x114   :  { %v111_v2 = vadd.f32 %v204_v50, %v104_v0 }
 0x115   :  { %v91_v3 = vmul.f32 %v212_v55, %v90_v1 }
 0x116   :  { %v114_v4 = vpack.c.bf16 %v111_v2, %v111_v2 }
 0x117   :  { %v95_v5 = vsel %vm94_vm11, %v212_v55, %v91_v3 }
 0x118   :  { %118 = vst.msk [vmem:[#allocation2 + $0x4] sm:$0xf] %vm116_vm6, %v114_v4  ;;  %v98_v6 = vmul.f32 %v95_v5, %v252_v23 }
 0x11a   :  { %v105_v7 = vmul.f32 %v203_v47, %v98_v6 }
 0x11c   :  { %v112_v8 = vadd.f32 %v204_v50, %v105_v7 }
 0x11e   :  { %v115_v9 = vpack.c.bf16 %v112_v8, %v112_v8 }
 0x11f   :  { %v197_v10 = vld [vmem:[#allocation2] sm:$0xff] }
 0x120   :  { %119 = vst.msk [vmem:[#allocation2 + $0x8] sm:$0xf] %vm116_vm6, %v115_v9  ;;  %195 = vmatmul.msk.bf16.vlgmr.msra.gmra.mxu0 %vm25_vm0, %v197_v10 }
 0x127   :  { %v122_v11 = vld [vmem:[#allocation2 + $0x8] sm:$0xf] }
 0x128   :  { %v132_v12 = vunpack.c.l.b16 %v122_v11 }
 0x12a   :  { %v134_v13 = vpack.c.b16 %v132_v12, %v132_v12 }
 0x12c   :  { %196 = vmatmul.msk.bf16.vlgmr.msra.gmra.mxu1 %vm25_vm0, %v134_v13 }
 0x19d   :  { %v163_v14 = vpop.f32.mrf.mxu0 }
 0x19e   :  { %v172_v15 = vpack.c.bf16 %v163_v14, %v163_v14 }
 0x1a0   :  { %176 = vst.msk [vmem:[%s289_s4] sm:$0xf] %vm175_vm12, %v172_v15 }
 0x1a5   :  { %v165_v16 = vpop.f32.mrf.mxu0 }
 0x1a6   :  { %v173_v17 = vpack.c.bf16 %v165_v16, %v165_v16 }
 0x1a8   :  { %177 = vst.msk [vmem:[%s289_s4 + $0x4] sm:$0xf] %vm175_vm12, %v173_v17 }
 0x1a9   :  { %v168_v18 = vpop.f32.mrf.mxu1 }
 0x1aa   :  { %v174_v19 = vpack.c.bf16 %v168_v18, %v168_v18 }
 0x1ac   :  { %178 = vst.msk [vmem:[%s289_s4 + $0x8] sm:$0xf] %vm175_vm12, %v174_v19 }
 0x1b1   :  { %v170_v20 = vpop.f32.mrf.mxu1 }

// kernel: _lambda_.51
= control target key start
LH: loop header
LB: loop body
LE: loop exit
PB: predicated region body
PF: predicated region fallthrough
CT: control target
= control target key end

     0   :  { %vm19_vm0 = vcmask 261120   ;;  %v112_v2 = vmov 0.0   ;;  %vm45_vm1 = vcmask 130048   ;;  %s163_s1 = inlined_call_operand.vmem [shape: bf16[16,32], index: 1, kind: input, shape index: {}]   ;;  %s164_s0 = inlined_call_operand.vmem [shape: bf16[24,16], index: 0, kind: input, shape index: {}]   ;;  %s165_s2 = inlined_call_operand.vmem [shape: f32[1,32], index: 2, kind: input, shape index: {}]   ;;  %s166_s3 = inlined_call_operand.vmem [shape: f32[24,32], index: 3, kind: output, shape index: {}]  }
   0x1   :  { %v108_v0 = vld [vmem:[%s163_s1] sm:$0xff]  ;;  %v28_v1 = vld [vmem:[%s164_s0 + $0x8] sm:$0xf]  ;;  %20 = vst.msk [vmem:[#allocation2] sm:$0xff] %vm19_vm0, %v112_v2 }
   0x2   :  { %v107_v3 = vld [vmem:[%s164_s0] sm:$0xff]  ;;  %v36_v4 = vunpack.c.l.b16 %v28_v1  ;;  %21 = vst.msk [vmem:[#allocation2 + $0x8] sm:$0xff] %vm19_vm0, %v112_v2  ;;  %59 = vmatpush.bf16.msra.mxu0 %v108_v0  ;;  %109 = vmatpush.bf16.msra.mxu1 %v108_v0 }
   0x3   :  { %22 = vst.msk [vmem:[#allocation2 + $0x10] sm:$0xff] %vm19_vm0, %v112_v2  ;;  %v111_v13 = vld [vmem:[%s165_s2] ss:$0 sm:$0xff] }
   0x4   :  { %v38_v5 = vpack.c.b16 %v36_v4, %v36_v4 }
   0x5   :  { %105 = vmatmul.msk.bf16.vlgmr.msra.gmra.mxu0 %vm45_vm1, %v107_v3 }
   0x6   :  { %106 = vmatmul.msk.bf16.vlgmr.msra.gmra.mxu1 %vm45_vm1, %v38_v5 }
   0x8   :  { %v23_v6 = vld [vmem:[#allocation2] sm:$0xff] }
   0x9   :  { %v24_v12 = vld [vmem:[#allocation2 + $0x8] sm:$0xff] }
   0xa   :  { %v25_v7 = vld [vmem:[#allocation2 + $0x10] sm:$0xff] }
  0x82   :  { %v61_v8 = vpop.f32.mrf.mxu0 }
  0x83   :  { %v66_v9 = vpop.f32.mrf.mxu1  ;;  %v70_v10 = vadd.f32 %v61_v8, %v23_v6 }
  0x84   :  { %v72_v11 = vadd.f32 %v66_v9, %v25_v7 }
  0x85   :  { %74 = vst.msk [vmem:[#allocation2] sm:$0xff] %vm19_vm0, %v70_v10 }
  0x86   :  { %76 = vst.msk [vmem:[#allocation2 + $0x10] sm:$0xff] %vm19_vm0, %v72_v11 }
  0x8a   :  { %v63_v14 = vpop.f32.mrf.mxu0 }
  0x8b   :  { %v68_v15 = vpop.f32.mrf.mxu1  ;;  %v71_v16 = vadd.f32 %v63_v14, %v24_v12 }
  0x8c   :  { %v80_v17 = vld [vmem:[#allocation2] sm:$0xff] }
  0x8d   :  { %v87_v18 = vadd.f32 %v111_v13, %v80_v17  ;;  %v82_v19 = vld [vmem:[#allocation2 + $0x10] sm:$0xff]  ;;  %75 = vst.msk [vmem:[#allocation2 + $0x8] sm:$0xff] %vm19_vm0, %v71_v16 }
  0x8e   :  { %v89_v20 = vadd.f32 %v111_v13, %v82_v19 }
  0x8f   :  { %90 = vst.msk [vmem:[%s166_s3] sm:$0xff] %vm19_vm0, %v87_v18 }
  0x90   :  { %92 = vst.msk [vmem:[%s166_s3 + $0x10] sm:$0xff] %vm19_vm0, %v89_v20 }
  0x94   :  { %v81_v21 = vld [vmem:[#allocation2 + $0x8] sm:$0xff] }
  0x95   :  { %v88_v22 = vadd.f32 %v111_v13, %v81_v21 }
  0x97   :  { %91 = vst.msk [vmem:[%s166_s3 + $0x8] sm:$0xff] %vm19_vm0, %v88_v22 }

// kernel: _lambda_.53
= control target key start
LH: loop header
LB: loop body
LE: loop exit
PB: predicated region body
PF: predicated region fallthrough
CT: control target
= control target key end

     0   :  { %vm21_vm0 = vcmask 261120   ;;  %v214_v2 = vmov 0.0   ;;  %s300_s1 = inlined_call_operand.vmem [shape: bf16[128,32], index: 1, kind: input, shape index: {}]   ;;  %s301_s2 = inlined_call_operand.vmem [shape: f32[1,32], index: 2, kind: input, shape index: {}]   ;;  %s302_s0 = inlined_call_operand.vmem [shape: bf16[24,128], index: 0, kind: input, shape index: {}]   ;;  %s303_s3 = inlined_call_operand.vmem [shape: f32[24,32], index: 3, kind: input, shape index: {}]   ;;  %s304_s4 = inlined_call_operand.vmem [shape: f32[24,32], index: 4, kind: output, shape index: {}]  }
   0x1   :  { %v203_v0 = vld [vmem:[%s300_s1 + $0x38] sm:$0xff]  ;;  %v202_v1 = vld [vmem:[%s300_s1 + $0x30] sm:$0xff]  ;;  %22 = vst.msk [vmem:[#allocation2] sm:$0xff] %vm21_vm0, %v214_v2  ;;  %v201_v3 = vld [vmem:[%s300_s1 + $0x28] sm:$0xff] }
   0x2   :  { %105 = vmatpush.bf16.msra.mxu0 %v203_v0  ;;  %204 = vmatpush.bf16.msra.mxu1 %v203_v0  ;;  %23 = vst.msk [vmem:[#allocation2 + $0x8] sm:$0xff] %vm21_vm0, %v214_v2  ;;  %v200_v4 = vld [vmem:[%s300_s1 + $0x20] sm:$0xff]  ;;  %v199_v5 = vld [vmem:[%s300_s1 + $0x18] sm:$0xff]  ;;  %v198_v6 = vld [vmem:[%s300_s1 + $0x10] sm:$0xff] }
   0x3   :  { %24 = vst.msk [vmem:[#allocation2 + $0x10] sm:$0xff] %vm21_vm0, %v214_v2  ;;  %v197_v7 = vld [vmem:[%s300_s1 + $0x8] sm:$0xff]  ;;  %v196_v10 = vld [vmem:[%s300_s1] sm:$0xff]  ;;  %v148_v30 = vld [vmem:[%s303_s3 + $0x10] sm:$0xff] }
   0x4   :  { %v30_v8 = vld [vmem:[%s302_s0 + $0x8] sm:$0xf]  ;;  %v195_v11 = vld [vmem:[%s302_s0] sm:$0xff] }
   0x5   :  { %v52_v9 = vunpack.c.l.b16 %v30_v8  ;;  %v213_v20 = vld [vmem:[%s301_s2] ss:$0 sm:$0xff]  ;;  %v147_v36 = vld [vmem:[%s303_s3 + $0x8] sm:$0xff] }
   0x6   :  { %106 = vmatpush.bf16.msra.mxu0 %v202_v1  ;;  %205 = vmatpush.bf16.msra.mxu1 %v202_v1  ;;  %v146_v27 = vld [vmem:[%s303_s3] sm:$0xff] }
   0x7   :  { %v54_v12 = vpack.c.b16 %v52_v9, %v52_v9 }
   0x8   :  { %v25_v13 = vld [vmem:[#allocation2] sm:$0xff] }
   0x9   :  { %v26_v19 = vld [vmem:[#allocation2 + $0x8] sm:$0xff] }
   0xa   :  { %107 = vmatpush.bf16.msra.mxu0 %v201_v3  ;;  %206 = vmatpush.bf16.msra.mxu1 %v201_v3  ;;  %v27_v14 = vld [vmem:[#allocation2 + $0x10] sm:$0xff] }
   0xe   :  { %108 = vmatpush.bf16.msra.mxu0 %v200_v4  ;;  %207 = vmatpush.bf16.msra.mxu1 %v200_v4 }
  0x12   :  { %109 = vmatpush.bf16.msra.mxu0 %v199_v5  ;;  %208 = vmatpush.bf16.msra.mxu1 %v199_v5 }
  0x16   :  { %110 = vmatpush.bf16.msra.mxu0 %v198_v6  ;;  %209 = vmatpush.bf16.msra.mxu1 %v198_v6 }
  0x1a   :  { %111 = vmatpush.bf16.msra.mxu0 %v197_v7  ;;  %210 = vmatpush.bf16.msra.mxu1 %v197_v7 }
  0x1e   :  { %112 = vmatpush.bf16.msra.mxu0 %v196_v10  ;;  %211 = vmatpush.bf16.msra.mxu1 %v196_v10 }
  0x21   :  { %113 = vmatmul.bf16.vlgmr.msra.gmra.mxu0 %v195_v11  ;;  %118 = vmatmul.bf16.vlgmr.msra.gmra.mxu1 %v54_v12 }
  0x9e   :  { %v114_v15 = vpop.f32.mrf.mxu0  ;;  %v119_v16 = vpop.f32.mrf.mxu1 }
  0x9f   :  { %v123_v17 = vadd.f32 %v114_v15, %v25_v13  ;;  %v125_v18 = vadd.f32 %v119_v16, %v27_v14 }
  0xa1   :  { %127 = vst.msk [vmem:[#allocation2] sm:$0xff] %vm21_vm0, %v123_v17 }
  0xa2   :  { %129 = vst.msk [vmem:[#allocation2 + $0x10] sm:$0xff] %vm21_vm0, %v125_v18 }
  0xa6   :  { %v116_v21 = vpop.f32.mrf.mxu0  ;;  %v121_v22 = vpop.f32.mrf.mxu1 }
  0xa7   :  { %v124_v23 = vadd.f32 %v116_v21, %v26_v19 }
  0xa8   :  { %v133_v24 = vld [vmem:[#allocation2] sm:$0xff] }
  0xa9   :  { %v140_v25 = vadd.f32 %v213_v20, %v133_v24  ;;  %v135_v26 = vld [vmem:[#allocation2 + $0x10] sm:$0xff]  ;;  %128 = vst.msk [vmem:[#allocation2 + $0x8] sm:$0xff] %vm21_vm0, %v124_v23 }
  0xaa   :  { %v142_v28 = vadd.f32 %v213_v20, %v135_v26 }
  0xab   :  { %v143_v29 = vmul.f32 0.5, %v140_v25 }
  0xac   :  { %v145_v31 = vmul.f32 0.5, %v142_v28 }
  0xad   :  { %v149_v32 = vadd.f32 %v146_v27, %v143_v29 }
  0xae   :  { %v151_v33 = vadd.f32 %v148_v30, %v145_v31 }
  0xaf   :  { %152 = vst.msk [vmem:[%s304_s4] sm:$0xff] %vm21_vm0, %v149_v32 }
  0xb0   :  { %154 = vst.msk [vmem:[%s304_s4 + $0x10] sm:$0xff] %vm21_vm0, %v151_v33  ;;  %v134_v34 = vld [vmem:[#allocation2 + $0x8] sm:$0xff] }
  0xb1   :  { %v141_v35 = vadd.f32 %v213_v20, %v134_v34 }
  0xb3   :  { %v144_v37 = vmul.f32 0.5, %v141_v35 }
  0xb5   :  { %v150_v38 = vadd.f32 %v147_v36, %v144_v37 }
  0xb7   :  { %153 = vst.msk [vmem:[%s304_s4 + $0x8] sm:$0xff] %vm21_vm0, %v150_v38 }

// kernel: _lambda_.55
= control target key start
LH: loop header
LB: loop body
LE: loop exit
PB: predicated region body
PF: predicated region fallthrough
CT: control target
= control target key end

     0   :  { %vm103_vm0 = vcmask 1043456   ;;  %vm16_vm1 = vcmask 187392   ;;  %v242_v1 = vmov 0.0   ;;  %vm84_vm2 = vcmask 64512   ;;  %s357_s1 = inlined_call_operand.vmem [shape: bf16[8,23], index: 1, kind: input, shape index: {}]   ;;  %s358_s0 = inlined_call_operand.vmem [shape: bf16[96,8], index: 0, kind: input, shape index: {}]   ;;  %s359_s2 = inlined_call_operand.vmem [shape: f32[96,23], index: 2, kind: output, shape index: {}]  }
   0x1   :  { %v53_v0 = vld [vmem:[%s357_s1] sm:$0xf]  ;;  %19 = vst.msk [vmem:[#allocation2 + $0x10] sm:$0xff] %vm16_vm1, %v242_v1  ;;  %v233_v3 = vld [vmem:[%s358_s0 + $0x8] sm:$0xff]  ;;  %v235_v4 = vld [vmem:[%s358_s0 + $0x18] sm:$0xff] }
   0x2   :  { %v105_v2 = vsel %vm103_vm0, %v53_v0, 0  ;;  %17 = vst.msk [vmem:[#allocation2] sm:$0xff] %vm16_vm1, %v242_v1  ;;  %v237_v5 = vld [vmem:[%s358_s0 + $0x28] sm:$0xff]  ;;  %v232_v6 = vld [vmem:[%s358_s0] sm:$0xff]  ;;  %v234_v7 = vld [vmem:[%s358_s0 + $0x10] sm:$0xff] }
   0x3   :  { %238 = vmatpush.bf16.msra.mxu1 %v105_v2  ;;  %239 = vmatpush.bf16.msra.mxu2 %v105_v2  ;;  %18 = vst.msk [vmem:[#allocation2 + $0x8] sm:$0xff] %vm16_vm1, %v242_v1  ;;  %v236_v8 = vld [vmem:[%s358_s0 + $0x20] sm:$0xff] }
   0x4   :  { %240 = vmatpush.bf16.msra.mxu3 %v105_v2  ;;  %114 = vmatpush.bf16.msra.mxu0 %v105_v2  ;;  %20 = vst.msk [vmem:[#allocation2 + $0x18] sm:$0xff] %vm16_vm1, %v242_v1 }
   0x5   :  { %21 = vst.msk [vmem:[#allocation2 + $0x20] sm:$0xff] %vm16_vm1, %v242_v1 }
   0x6   :  { %227 = vmatmul.msk.bf16.vlgmr.msra.gmra.mxu1 %vm84_vm2, %v233_v3  ;;  %229 = vmatmul.msk.bf16.vlgmr.msra.gmra.mxu2 %vm84_vm2, %v235_v4  ;;  %22 = vst.msk [vmem:[#allocation2 + $0x28] sm:$0xff] %vm16_vm1, %v242_v1 }
   0x7   :  { %231 = vmatmul.msk.bf16.vlgmr.msra.gmra.mxu3 %vm84_vm2, %v237_v5  ;;  %226 = vmatmul.msk.bf16.vlgmr.msra.gmra.mxu0 %vm84_vm2, %v232_v6  ;;  %23 = vst.msk [vmem:[#allocation2 + $0x30] sm:$0xff] %vm16_vm1, %v242_v1 }
   0x8   :  { %24 = vst.msk [vmem:[#allocation2 + $0x38] sm:$0xff] %vm16_vm1, %v242_v1  ;;  %v31_v9 = vld [vmem:[#allocation2 + $0x10] sm:$0xff] }
   0x9   :  { %25 = vst.msk [vmem:[#allocation2 + $0x40] sm:$0xff] %vm16_vm1, %v242_v1  ;;  %v29_v10 = vld [vmem:[#allocation2] sm:$0xff] }
   0xa   :  { %26 = vst.msk [vmem:[#allocation2 + $0x48] sm:$0xff] %vm16_vm1, %v242_v1  ;;  %v30_v21 = vld [vmem:[#allocation2 + $0x8] sm:$0xff] }
   0xb   :  { %27 = vst.msk [vmem:[#allocation2 + $0x50] sm:$0xff] %vm16_vm1, %v242_v1  ;;  %v32_v18 = vld [vmem:[#allocation2 + $0x18] sm:$0xff] }
   0xc   :  { %28 = vst.msk [vmem:[#allocation2 + $0x58] sm:$0xff] %vm16_vm1, %v242_v1  ;;  %v33_v31 = vld [vmem:[#allocation2 + $0x20] sm:$0xff] }
   0xd   :  { %v34_v44 = vld [vmem:[#allocation2 + $0x28] sm:$0xff] }
   0xe   :  { %v35_v15 = vld [vmem:[#allocation2 + $0x30] sm:$0xff] }
   0xf   :  { %v36_v29 = vld [vmem:[#allocation2 + $0x38] sm:$0xff] }
  0x10   :  { %v37_v41 = vld [vmem:[#allocation2 + $0x40] sm:$0xff] }
  0x11   :  { %v38_v50 = vld [vmem:[#allocation2 + $0x48] sm:$0xff] }
  0x12   :  { %v39_v16 = vld [vmem:[#allocation2 + $0x50] sm:$0xff] }
  0x13   :  { %v40_v35 = vld [vmem:[#allocation2 + $0x58] sm:$0xff] }
  0x16   :  { %228 = vmatmul.msk.bf16.gmra.mxu1 %vm84_vm2, %v234_v7  ;;  %230 = vmatmul.msk.bf16.gmra.mxu2 %vm84_vm2, %v236_v8 }
  0x83   :  { %v121_v11 = vpop.f32.mrf.mxu1 }
  0x84   :  { %v148_v12 = vadd.f32 %v121_v11, %v31_v9  ;;  %v116_v13 = vpop.f32.mrf.mxu0 }
  0x85   :  { %v146_v14 = vadd.f32 %v116_v13, %v29_v10 }
  0x86   :  { %161 = vst.msk [vmem:[#allocation2 + $0x10] sm:$0xff] %vm16_vm1, %v148_v12 }
  0x87   :  { %159 = vst.msk [vmem:[#allocation2] sm:$0xff] %vm16_vm1, %v146_v14 }
  0x89   :  { %v131_v17 = vpop.f32.mrf.mxu2 }
  0x8a   :  { %v152_v19 = vadd.f32 %v131_v17, %v35_v15  ;;  %v141_v20 = vpop.f32.mrf.mxu3 }
  0x8b   :  { %v123_v22 = vpop.f32.mrf.mxu1  ;;  %v156_v23 = vadd.f32 %v141_v20, %v39_v16 }
  0x8c   :  { %165 = vst.msk [vmem:[#allocation2 + $0x30] sm:$0xff] %vm16_vm1, %v152_v19  ;;  %v149_v24 = vadd.f32 %v123_v22, %v32_v18  ;;  %v118_v25 = vpop.f32.mrf.mxu0 }
  0x8d   :  { %v176_v26 = vld [vmem:[#allocation2 + $0x10] sm:$0xff]  ;;  %169 = vst.msk [vmem:[#allocation2 + $0x50] sm:$0xff] %vm16_vm1, %v156_v23  ;;  %v147_v27 = vadd.f32 %v118_v25, %v30_v21 }
  0x8e   :  { %188 = vst.msk [vmem:[%s359_s2 + $0x10] sm:$0xff] %vm16_vm1, %v176_v26  ;;  %v174_v28 = vld [vmem:[#allocation2] sm:$0xff] }
  0x8f   :  { %162 = vst.msk [vmem:[#allocation2 + $0x18] sm:$0xff] %vm16_vm1, %v149_v24 }
  0x90   :  { %186 = vst.msk [vmem:[%s359_s2] sm:$0xff] %vm16_vm1, %v174_v28 }
  0x91   :  { %v133_v30 = vpop.f32.mrf.mxu2  ;;  %160 = vst.msk [vmem:[#allocation2 + $0x8] sm:$0xff] %vm16_vm1, %v147_v27 }
  0x92   :  { %v153_v32 = vadd.f32 %v133_v30, %v36_v29  ;;  %v143_v36 = vpop.f32.mrf.mxu3 }
  0x93   :  { %v180_v33 = vld [vmem:[#allocation2 + $0x30] sm:$0xff]  ;;  %v126_v34 = vpop.f32.mrf.mxu1  ;;  %v157_v40 = vadd.f32 %v143_v36, %v40_v35 }
  0x94   :  { %192 = vst.msk [vmem:[%s359_s2 + $0x30] sm:$0xff] %vm16_vm1, %v180_v33  ;;  %v184_v37 = vld [vmem:[#allocation2 + $0x50] sm:$0xff]  ;;  %v150_v38 = vadd.f32 %v126_v34, %v33_v31 }
  0x95   :  { %166 = vst.msk [vmem:[#allocation2 + $0x38] sm:$0xff] %vm16_vm1, %v153_v32 }
  0x96   :  { %v177_v39 = vld [vmem:[#allocation2 + $0x18] sm:$0xff]  ;;  %196 = vst.msk [vmem:[%s359_s2 + $0x50] sm:$0xff] %vm16_vm1, %v184_v37 }
  0x97   :  { %189 = vst.msk [vmem:[%s359_s2 + $0x18] sm:$0xff] %vm16_vm1, %v177_v39 }
  0x98   :  { %163 = vst.msk [vmem:[#allocation2 + $0x20] sm:$0xff] %vm16_vm1, %v150_v38  ;;  %v175_v42 = vld [vmem:[#allocation2 + $0x8] sm:$0xff] }
  0x99   :  { %187 = vst.msk [vmem:[%s359_s2 + $0x8] sm:$0xff] %vm16_vm1, %v175_v42  ;;  %v136_v43 = vpop.f32.mrf.mxu2 }
  0x9a   :  { %v154_v45 = vadd.f32 %v136_v43, %v37_v41  ;;  %170 = vst.msk [vmem:[#allocation2 + $0x58] sm:$0xff] %vm16_vm1, %v157_v40 }
  0x9b   :  { %v128_v46 = vpop.f32.mrf.mxu1 }
  0x9c   :  { %v181_v47 = vld [vmem:[#allocation2 + $0x38] sm:$0xff]  ;;  %167 = vst.msk [vmem:[#allocation2 + $0x40] sm:$0xff] %vm16_vm1, %v154_v45  ;;  %v151_v48 = vadd.f32 %v128_v46, %v34_v44 }
  0x9d   :  { %193 = vst.msk [vmem:[%s359_s2 + $0x38] sm:$0xff] %vm16_vm1, %v181_v47 }
  0x9e   :  { %164 = vst.msk [vmem:[#allocation2 + $0x28] sm:$0xff] %vm16_vm1, %v151_v48 }
  0x9f   :  { %v178_v49 = vld [vmem:[#allocation2 + $0x20] sm:$0xff] }
  0xa0   :  { %190 = vst.msk [vmem:[%s359_s2 + $0x20] sm:$0xff] %vm16_vm1, %v178_v49 }
  0xa1   :  { %v185_v51 = vld [vmem:[#allocation2 + $0x58] sm:$0xff]  ;;  %v138_v52 = vpop.f32.mrf.mxu2 }
  0xa2   :  { %197 = vst.msk [vmem:[%s359_s2 + $0x58] sm:$0xff] %vm16_vm1, %v185_v51  ;;  %v155_v53 = vadd.f32 %v138_v52, %v38_v50 }
  0xa3   :  { %v182_v54 = vld [vmem:[#allocation2 + $0x40] sm:$0xff] }
  0xa4   :  { %194 = vst.msk [vmem:[%s359_s2 + $0x40] sm:$0xff] %vm16_vm1, %v182_v54 }
  0xa5   :  { %v179_v55 = vld [vmem:[#allocation2 + $0x28] sm:$0xff]  ;;  %168 = vst.msk [vmem:[#allocation2 + $0x48] sm:$0xff] %vm16_vm1, %v155_v53 }
  0xa6   :  { %191 = vst.msk [vmem:[%s359_s2 + $0x28] sm:$0xff] %vm16_vm1, %v179_v55 }
  0xac   :  { %v183_v56 = vld [vmem:[#allocation2 + $0x48] sm:$0xff] }
  0xad   :  { %195 = vst.msk [vmem:[%s359_s2 + $0x48] sm:$0xff] %vm16_vm1, %v183_v56 }

// kernel: _lambda_.56
= control target key start
LH: loop header
LB: loop body
LE: loop exit
PB: predicated region body
PF: predicated region fallthrough
CT: control target
= control target key end

     0   :  { %s846_s15 = smov 0   ;;  %s848_s16 = smov 0   ;;  %s918_s0 = inlined_call_operand.vmem [shape: bf16[2,4,12,8], index: 0, kind: input, shape index: {}]   ;;  %s919_s1 = inlined_call_operand.vmem [shape: bf16[2,4,12,8], index: 1, kind: input, shape index: {}]   ;;  %s920_s2 = inlined_call_operand.vmem [shape: bf16[2,4,12,8], index: 2, kind: input, shape index: {}]   ;;  %s921_s3 = inlined_call_operand.vmem [shape: bf16[2,4,12,12], index: 3, kind: input, shape index: {}]   ;;  %s922_s4 = inlined_call_operand.vmem [shape: bf16[2,4,12,8], index: 4, kind: output, shape index: {}]  }
   0x1   :  { %s850_s17 = smov 0   ;;  %s852_s18 = smov 0  }
   0x2   :  { %s854_s19 = smov 0  }
   0x3 LB: > { %s29_s20 = sadd.s32 1, %s811_s17  ;;  %s33_s21 = sadd.s32 1, %s815_s18  ;;  %s819_s19 = sphi %s854_s19, %s14_s19   ;;  %s815_s18 = sphi %s852_s18, %s926_s18   ;;  %s811_s17 = sphi %s850_s17, %s925_s17   ;;  %s807_s16 = sphi %s848_s16, %s924_s16   ;;  %s803_s15 = sphi %s846_s15, %s923_s15  }
   0x4   : > { %p31_p0 = scmp.ge.s32.totalorder %s29_s20, 4  ;;  %p698_p1 = scmp.ge.s32.totalorder %s819_s19, 1 }
   0x5   : > { %p253_p2 = scmp.lt.s32.totalorder %s819_s19, 9 }
   0x6   : > { %s928_s20 = smov (%p31_p0, %s29_s20), 0  ;;  %s930_s21 = smov (!%p31_p0, %s33_s21), %s815_s18 }
   0x7   : > { %p254_p3 = pnand %p698_p1, %p253_p2  ;;  %p35_p4 = scmp.ge.s32.totalorder %s930_s21, 2 }
   0x8   : > { %p327_p5 = scmp.lt.s32.totalorder (!%p254_p3), %s807_s16, 1  ;;  %p329_p6 = scmp.lt.s32.totalorder (!%p254_p3), %s803_s15, 3 }
   0x9   : > { %s932_s21 = smov (%p35_p4, %s930_s21), 0  ;;  %257 = sbr.rel (%p254_p3) target bundleno = 571 (0x23b), region = 36 }
   0xe   : > { %s934_s16 = smov (!%p327_p5, %s807_s16), 1  ;;  %s936_s15 = smov (!%p329_p6, %s803_s15), 3  ;;  %vm407_vm0 = vcmask 64512   ;;  %vm430_vm1 = vcmask 97280   ;;  %vm434_vm2 = vcmask 93184   ;;  %vm489_vm3 = vcmask 1045504  }
   0xf   : > { %s700_s22 = sshll.u32 %s934_s16, 3  ;;  %s699_s23 = sshll.u32 %s936_s15, 1  ;;  %vm509_vm12 = vcmask 60416   ;;  %vm511_vm13 = vcmask 58368  }
  0x10   : > { %s336_s24 = sadd.s32 %s700_s22, %s699_s23 }
  0x11   : > { %s876_s25 = sshll.u32 %s336_s24, 2 }
  0x12   : > { %s348_s28 = scalar_lea.vmem %s919_s1, %s876_s25  ;;  %s338_s5 = scalar_lea.vmem %s918_s0, %s876_s25 }
  0x13   : > { %v720_v0 = vld [vmem:[%s348_s28] sm:$0xf]  ;;  %v731_v1 = vld [vmem:[%s348_s28] sm:$0x30]  ;;  %s370_s8 = scalar_lea.vmem %s921_s3, %s876_s25  ;;  %s357_s11 = scalar_lea.vmem %s920_s2, %s876_s25 }
  0x14   : > { %v721_v2 = vor.u32 %v731_v1, %v720_v0  ;;  %v716_v4 = vld [vmem:[%s338_s5] sm:$0xf]  ;;  %v730_v5 = vld [vmem:[%s338_s5] sm:$0x30]  ;;  %s384_s14 = scalar_lea.vmem %s922_s4, %s876_s25 }
  0x15   : > { %v717_v6 = vor.u32 %v730_v5, %v716_v4  ;;  %v393_v7 = vld [vmem:[%s370_s8] sm:$0xf]  ;;  %v394_v11 = vld [vmem:[%s370_s8 + $0x4] sm:$0x3] }
  0x16   : > { %v412_v3 = vsel %vm407_vm0, %v721_v2, 0  ;;  %v395_v8 = vunpack.c.l.bf16 %v393_v7  ;;  %v396_v14 = vunpack.c.l.bf16 %v394_v11  ;;  %v725_v29 = vld [vmem:[%s357_s11] sm:$0xf]  ;;  %v732_v30 = vld [vmem:[%s357_s11] sm:$0x30] }
  0x17   : > { %421 = vmatpush.bf16.xpose.msra.mxu0 %v412_v3  ;;  %v726_v31 = vor.u32 %v732_v30, %v725_v29 }
  0x19   : > { %v491_v32 = vsel %vm489_vm3, %v726_v31, 0 }
  0x1a   : > { %500 = vmatpush.bf16.msra.mxu1 %v491_v32 }
  0x1e   : > { %722 = vmatmul.msk.bf16.vlgmr.msra.gmra.mxu0 %vm407_vm0, %v717_v6 }
  0x9b   : > { %v423_v9 = vpop.f32.mrf.mxu0 }
  0x9c   : > { %v424_v10 = vadd.f32 %v423_v9, %v395_v8 }
  0x9e   : > { %v428_v12 = vmul.f32 0.35355338, %v424_v10 }
  0xa0   : > { %v431_v13 = vsel %vm430_vm1, %v428_v12, -inf }
  0xa1   : > { %432 = vmax.xlane.f32.xlu0 %v431_v13 }
  0xa3   : > { %v425_v15 = vpop.f32.mrf.mxu0 }
  0xa4   : > { %v426_v16 = vadd.f32 %v425_v15, %v396_v14 }
  0xa6   : > { %v429_v17 = vmul.f32 0.35355338, %v426_v16 }
  0xa8   : > { %v435_v18 = vsel %vm434_vm2, %v429_v17, -inf }
  0xa9   : > { %436 = vmax.xlane.f32.xlu0 %v435_v18 }
 0x114   : > { %v433_v19 = vpop.xlane.xlu0 %432 }
 0x115   : > { %v438_v20 = vsub.f32 %v428_v12, %v433_v19 }
 0x117   : > { %v440_v21 = vmul.f32 1.442695, %v438_v20 }
 0x119   : > { %773 = vpow2.f32 %v440_v21 }
 0x11c   : > { %v437_v22 = vpop.xlane.xlu0 %436 }
 0x11d   : > { %v439_v23 = vsub.f32 %v429_v17, %v437_v22 }
 0x11f   : > { %v774_v24 = vpop.eup %773  ;;  %v442_v25 = vmul.f32 1.442695, %v439_v23 }
 0x120   : > { %v444_v26 = vsel %vm430_vm1, %v774_v24, 0.0 }
 0x121   : > { %775 = vpow2.f32 %v442_v25  ;;  %445 = vadd.xlane.f32.xlu1 %v444_v26 }
 0x127   : > { %v776_v27 = vpop.eup %775 }
 0x128   : > { %v447_v28 = vsel %vm434_vm2, %v776_v27, 0.0 }
 0x129   : > { %448 = vadd.xlane.f32.xlu1 %v447_v28 }
 0x194   : > { %v446_v33 = vpop.xlane.xlu1 %445 }
 0x195   : > { %777 = vrcp.f32 %v446_v33  ;;  %v461_v42 = vand.u32 2147483648, %v446_v33  ;;  %vm455_vm5 = vweird.f32 %v446_v33  ;;  %v459_v43 = vand.u32 2147483647, %v446_v33 }
 0x197   : > { %v462_v49 = vor.u32 1.1754944e-38, %v461_v42  ;;  %vm460_vm8 = vcmp.eq.f32.partialorder %v459_v43, 8.507059e+37 }
 0x19b   : > { %v778_v34 = vpop.eup %777 }
 0x19c   : > { %v451_v35 = vmul.f32 %v778_v34, %v446_v33  ;;  %v449_v36 = vpop.xlane.xlu1 %448  ;;  %vm456_vm4 = vweird.f32 %v778_v34 }
 0x19d   : > { %779 = vrcp.f32 %v449_v36  ;;  %vm457_vm6 = vmor %vm455_vm5, %vm456_vm4  ;;  %v476_v45 = vand.u32 2147483648, %v449_v36  ;;  %v474_v47 = vand.u32 2147483647, %v449_v36  ;;  %vm470_vm9 = vweird.f32 %v449_v36 }
 0x19e   : > { %v452_v37 = vsub.f32 1.0, %v451_v35 }
 0x19f   : > { %v477_v51 = vor.u32 1.1754944e-38, %v476_v45  ;;  %vm475_vm11 = vcmp.eq.f32.partialorder %v474_v47, 8.507059e+37 }
 0x1a0   : > { %v453_v38 = vmul.f32 %v778_v34, %v452_v37 }
 0x1a2   : > { %v454_v40 = vadd.f32 %v778_v34, %v453_v38 }
 0x1a3   : > { %v780_v39 = vpop.eup %779 }
 0x1a4   : > { %v466_v41 = vmul.f32 %v780_v39, %v449_v36  ;;  %vm471_vm7 = vweird.f32 %v780_v39  ;;  %v458_v48 = vsel %vm457_vm6, %v778_v34, %v454_v40 }
 0x1a5   : > { %vm472_vm10 = vmor %vm470_vm9, %vm471_vm7  ;;  %v463_v52 = vsel %vm460_vm8, %v462_v49, %v458_v48 }
 0x1a6   : > { %v467_v44 = vsub.f32 1.0, %v466_v41  ;;  %v464_v55 = vmul.f32 %v774_v24, %v463_v52 }
 0x1a8   : > { %v468_v46 = vmul.f32 %v780_v39, %v467_v44 }
 0x1aa   : > { %v469_v50 = vadd.f32 %v780_v39, %v468_v46 }
 0x1ac   : > { %v473_v53 = vsel %vm472_vm10, %v780_v39, %v469_v50 }
 0x1ad   : > { %v478_v54 = vsel %vm475_vm11, %v477_v51, %v473_v53 }
 0x1ae   : > { %v479_v56 = vmul.f32 %v776_v27, %v478_v54 }
 0x1b0   : > { %v480_v57 = vpack.c.bf16 %v479_v56, %v464_v55 }
 0x1b2   : > { %727 = vmatmul.msk.bf16.vlgmr.msra.gmra.mxu1 %vm430_vm1, %v480_v57 }
 0x22f   : > { %v502_v58 = vpop.f32.mrf.mxu1 }
 0x230   : > { %v507_v59 = vpack.c.bf16 %v502_v58, %v502_v58 }
 0x232   : > { %510 = vst.msk [vmem:[%s384_s14] sm:$0xf] %vm509_vm12, %v507_v59 }
 0x237   : > { %v504_v60 = vpop.f32.mrf.mxu1 }
 0x238   : > { %v508_v61 = vpack.c.bf16 %v504_v60, %v504_v60 }
 0x23a   : > { %512 = vst.msk [vmem:[%s384_s14 + $0x4] sm:$0x3] %vm511_vm13, %v508_v61 }
 0x23b PF: > { %s14_s19 = sadd.s32 1, %s819_s19   ;;  %s923_s15 = smov %s811_s17 }
 0x23c   : > { %p11_p7 = scmp.ge.s32.totalorder %s14_s19, 10   ;;  %s924_s16 = smov %s815_s18 }
 0x23d   : > { %s925_s17 = smov %s928_s20  ;;  %s926_s18 = smov %s932_s21 }
 0x23e   :  { %13 = sbr.rel (!%p11_p7) target bundleno = 3 (0x3), region = 75 }

// kernel: _lambda_.57
= control target key start
LH: loop header
LB: loop body
LE: loop exit
PB: predicated region body
PF: predicated region fallthrough
CT: control target
= control target key end

     0   :  { %vm22_vm0 = vcmask 261120   ;;  %v134_v1 = vmov 0.0   ;;  %s204_s1 = inlined_call_operand.vmem [shape: bf16[32,32], index: 1, kind: input, shape index: {}]   ;;  %s205_s0 = inlined_call_operand.vmem [shape: bf16[24,32], index: 0, kind: input, shape index: {}]   ;;  %s206_s2 = inlined_call_operand.vmem [shape: f32[1,32], index: 2, kind: input, shape index: {}]   ;;  %s207_s3 = inlined_call_operand.vmem [shape: f32[24,32], index: 3, kind: input, shape index: {}]   ;;  %s208_s4 = inlined_call_operand.vmem [shape: f32[24,32], index: 4, kind: output, shape index: {}]  }
   0x1   :  { %v129_v0 = vld [vmem:[%s204_s1 + $0x8] sm:$0xff]  ;;  %23 = vst.msk [vmem:[#allocation2] sm:$0xff] %vm22_vm0, %v134_v1  ;;  %v128_v3 = vld [vmem:[%s204_s1] sm:$0xff]  ;;  %v102_v22 = vld [vmem:[%s207_s3 + $0x10] sm:$0xff] }
   0x2   :  { %v31_v2 = vld [vmem:[%s205_s0 + $0x8] sm:$0xf]  ;;  %24 = vst.msk [vmem:[#allocation2 + $0x8] sm:$0xff] %vm22_vm0, %v134_v1  ;;  %69 = vmatpush.bf16.msra.mxu0 %v129_v0  ;;  %130 = vmatpush.bf16.msra.mxu1 %v129_v0  ;;  %v127_v5 = vld [vmem:[%s205_s0] sm:$0xff] }
   0x3   :  { %v41_v4 = vunpack.c.l.b16 %v31_v2  ;;  %25 = vst.msk [vmem:[#allocation2 + $0x10] sm:$0xff] %vm22_vm0, %v134_v1  ;;  %v133_v14 = vld [vmem:[%s206_s2] ss:$0 sm:$0xff]  ;;  %v101_v27 = vld [vmem:[%s207_s3 + $0x8] sm:$0xff] }
   0x4   :  { %v100_v19 = vld [vmem:[%s207_s3] sm:$0xff] }
   0x5   :  { %v43_v6 = vpack.c.b16 %v41_v4, %v41_v4 }
   0x6   :  { %70 = vmatpush.bf16.msra.mxu0 %v128_v3  ;;  %131 = vmatpush.bf16.msra.mxu1 %v128_v3 }
   0x8   :  { %v26_v7 = vld [vmem:[#allocation2] sm:$0xff] }
   0x9   :  { %125 = vmatmul.msk.bf16.vlgmr.msra.gmra.mxu0 %vm22_vm0, %v127_v5  ;;  %126 = vmatmul.msk.bf16.vlgmr.msra.gmra.mxu1 %vm22_vm0, %v43_v6  ;;  %v27_v13 = vld [vmem:[#allocation2 + $0x8] sm:$0xff] }
   0xa   :  { %v28_v8 = vld [vmem:[#allocation2 + $0x10] sm:$0xff] }
  0x86   :  { %v72_v9 = vpop.f32.mrf.mxu0  ;;  %v77_v10 = vpop.f32.mrf.mxu1 }
  0x87   :  { %v81_v11 = vadd.f32 %v72_v9, %v26_v7  ;;  %v83_v12 = vadd.f32 %v77_v10, %v28_v8 }
  0x89   :  { %84 = vst.msk [vmem:[#allocation2] sm:$0xff] %vm22_vm0, %v81_v11 }
  0x8a   :  { %86 = vst.msk [vmem:[#allocation2 + $0x10] sm:$0xff] %vm22_vm0, %v83_v12 }
  0x8e   :  { %v74_v15 = vpop.f32.mrf.mxu0  ;;  %v79_v16 = vpop.f32.mrf.mxu1 }
  0x8f   :  { %v82_v17 = vadd.f32 %v74_v15, %v27_v13 }
  0x90   :  { %v90_v18 = vld [vmem:[#allocation2] sm:$0xff] }
  0x91   :  { %v97_v20 = vadd.f32 %v133_v14, %v90_v18  ;;  %v92_v21 = vld [vmem:[#allocation2 + $0x10] sm:$0xff]  ;;  %85 = vst.msk [vmem:[#allocation2 + $0x8] sm:$0xff] %vm22_vm0, %v82_v17 }
  0x92   :  { %v99_v23 = vadd.f32 %v133_v14, %v92_v21 }
  0x93   :  { %v103_v24 = vadd.f32 %v100_v19, %v97_v20 }
  0x94   :  { %v105_v25 = vadd.f32 %v102_v22, %v99_v23 }
  0x95   :  { %106 = vst.msk [vmem:[%s208_s4] sm:$0xff] %vm22_vm0, %v103_v24 }
  0x96   :  { %108 = vst.msk [vmem:[%s208_s4 + $0x10] sm:$0xff] %vm22_vm0, %v105_v25 }
  0x98   :  { %v91_v26 = vld [vmem:[#allocation2 + $0x8] sm:$0xff] }
  0x99   :  { %v98_v28 = vadd.f32 %v133_v14, %v91_v26 }
  0x9b   :  { %v104_v29 = vadd.f32 %v101_v27, %v98_v28 }
  0x9d   :  { %107 = vst.msk [vmem:[%s208_s4 + $0x8] sm:$0xff] %vm22_vm0, %v104_v29 }

// kernel: _lambda_.58
= control target key start
LH: loop header
LB: loop body
LE: loop exit
PB: predicated region body
PF: predicated region fallthrough
CT: control target
= control target key end

     0   :  { %vm28_vm0 = vcmask 261120   ;;  %v225_v6 = vmov 32.0   ;;  %vm119_vm6 = vcmask 257024   ;;  %s302_s0 = inlined_call_operand.vmem [shape: f32[24,32], index: 0, kind: input, shape index: {}]   ;;  %s303_s1 = inlined_call_operand.vmem [shape: f32[1,32], index: 1, kind: input, shape index: {}]   ;;  %s304_s2 = inlined_call_operand.vmem [shape: f32[1,32], index: 2, kind: input, shape index: {}]   ;;  %s305_s4 = inlined_call_operand.vmem [shape: f32[1,128], index: 4, kind: input, shape index: {}]   ;;  %s306_s3 = inlined_call_operand.vmem [shape: bf16[32,128], index: 3, kind: input, shape index: {}]   ;;  %s307_s5 = inlined_call_operand.vmem [shape: bf16[24,128], index: 5, kind: output, shape index: {}]  }
   0x1   :  { %v25_v0 = vld [vmem:[%s302_s0] sm:$0xff]  ;;  %v27_v1 = vld [vmem:[%s302_s0 + $0x10] sm:$0xff]  ;;  %v26_v4 = vld [vmem:[%s302_s0 + $0x8] sm:$0xff]  ;;  %217 = vrcp.f32 %v225_v6 }
   0x2   :  { %v29_v2 = vsel %vm28_vm0, %v25_v0, 0.0  ;;  %v35_v3 = vsel %vm28_vm0, %v27_v1, 0.0  ;;  %v32_v5 = vsel %vm28_vm0, %v26_v4, 0.0  ;;  %v205_v31 = vld [vmem:[%s306_s3 + $0x8] sm:$0xff]  ;;  %v204_v36 = vld [vmem:[%s306_s3] sm:$0xff] }
   0x3   :  { %30 = vadd.xlane.f32.xlu0 %v29_v2  ;;  %36 = vadd.xlane.f32.xlu1 %v35_v3  ;;  %v214_v47 = vld [vmem:[%s303_s1] ss:$0 sm:$0xff] }
   0x4   :  { %167 = vmatpush.bf16.msra.mxu0 %v205_v31  ;;  %211 = vmatpush.bf16.msra.mxu1 %v205_v31  ;;  %v215_v50 = vld [vmem:[%s304_s2] ss:$0 sm:$0xff] }
   0x7   :  { %v218_v7 = vpop.eup %217 }
   0x8   :  { %v39_v8 = vmul.f32 32.0, %v218_v7  ;;  %vm43_vm1 = vweird.f32 %v218_v7  ;;  %168 = vmatpush.bf16.msra.mxu0 %v204_v36  ;;  %212 = vmatpush.bf16.msra.mxu1 %v204_v36 }
   0xa   :  { %v40_v9 = vsub.f32 1.0, %v39_v8 }
   0xb   :  { %33 = vadd.xlane.f32.xlu0 %v32_v5 }
   0xc   :  { %v41_v10 = vmul.f32 %v218_v7, %v40_v9 }
   0xe   :  { %v42_v11 = vadd.f32 %v218_v7, %v41_v10 }
  0x10   :  { %v44_v12 = vsel %vm43_vm1, %v218_v7, %v42_v11 }
  0x76   :  { %v31_v13 = vpop.xlane.xlu0 %30  ;;  %v37_v17 = vpop.xlane.xlu1 %36 }
  0x77   :  { %v45_v14 = vmul.f32 %v44_v12, %v31_v13  ;;  %v47_v21 = vmul.f32 %v44_v12, %v37_v17 }
  0x79   :  { %v48_v15 = vsub.f32 %v25_v0, %v45_v14  ;;  %v269_v23 = vsub.f32 %v27_v1, %v47_v21 }
  0x7b   :  { %v51_v16 = vmul.f32 %v48_v15, %v48_v15  ;;  %v53_v26 = vmul.f32 %v269_v23, %v269_v23 }
  0x7d   :  { %v54_v18 = vsel %vm28_vm0, %v51_v16, 0.0  ;;  %v60_v27 = vsel %vm28_vm0, %v53_v26, 0.0 }
  0x7e   :  { %55 = vadd.xlane.f32.xlu1 %v54_v18  ;;  %v34_v19 = vpop.xlane.xlu0 %33 }
  0x7f   :  { %v46_v20 = vmul.f32 %v44_v12, %v34_v19 }
  0x81   :  { %v49_v22 = vsub.f32 %v26_v4, %v46_v20 }
  0x83   :  { %v52_v24 = vmul.f32 %v49_v22, %v49_v22 }
  0x85   :  { %v57_v25 = vsel %vm28_vm0, %v52_v24, 0.0 }
  0x86   :  { %58 = vadd.xlane.f32.xlu2 %v57_v25 }
  0x8e   :  { %61 = vadd.xlane.f32.xlu2 %v60_v27 }
  0xf1   :  { %v56_v28 = vpop.xlane.xlu1 %55 }
  0xf2   :  { %v63_v29 = vmul.f32 %v56_v28, %v44_v12 }
  0xf4   :  { %v66_v30 = vadd.f32 1e-05, %v63_v29 }
  0xf6   :  { %219 = vrsqrt.f32 %v66_v30  ;;  %vm75_vm3 = vweird.f32 %v66_v30 }
  0xf9   :  { %v59_v32 = vpop.xlane.xlu2 %58 }
  0xfa   :  { %v64_v33 = vmul.f32 %v59_v32, %v44_v12 }
  0xfc   :  { %v220_v34 = vpop.eup %219  ;;  %v67_v35 = vadd.f32 1e-05, %v64_v33 }
  0xfd   :  { %v70_v37 = vmul.f32 %v220_v34, %v66_v30  ;;  %vm76_vm2 = vweird.f32 %v220_v34 }
  0xfe   :  { %221 = vrsqrt.f32 %v67_v35  ;;  %vm77_vm4 = vmor %vm75_vm3, %vm76_vm2  ;;  %vm85_vm7 = vweird.f32 %v67_v35 }
  0xff   :  { %v71_v38 = vmul.f32 %v220_v34, %v70_v37 }
 0x101   :  { %v72_v39 = vmul.f32 0.5, %v71_v38  ;;  %v62_v40 = vpop.xlane.xlu2 %61 }
 0x102   :  { %v65_v41 = vmul.f32 %v62_v40, %v44_v12 }
 0x103   :  { %v73_v42 = vsub.f32 1.5, %v72_v39 }
 0x104   :  { %v222_v43 = vpop.eup %221  ;;  %v68_v44 = vadd.f32 1e-05, %v65_v41 }
 0x105   :  { %v74_v45 = vmul.f32 %v220_v34, %v73_v42  ;;  %v80_v46 = vmul.f32 %v222_v43, %v67_v35  ;;  %vm86_vm5 = vweird.f32 %v222_v43 }
 0x106   :  { %223 = vrsqrt.f32 %v68_v44  ;;  %vm87_vm8 = vmor %vm85_vm7, %vm86_vm5  ;;  %vm95_vm10 = vweird.f32 %v68_v44 }
 0x107   :  { %v78_v48 = vsel %vm77_vm4, %v220_v34, %v74_v45  ;;  %v81_v49 = vmul.f32 %v222_v43, %v80_v46 }
 0x108   :  { %v99_v51 = vmul.f32 %v78_v48, %v48_v15  ;;  %v216_v15 = vld [vmem:[%s305_s4] ss:$0 sm:$0xff] }
 0x109   :  { %v82_v52 = vmul.f32 0.5, %v81_v49 }
 0x10a   :  { %v106_v53 = vmul.f32 %v214_v47, %v99_v51 }
 0x10b   :  { %v83_v54 = vsub.f32 1.5, %v82_v52 }
 0x10c   :  { %v224_v55 = vpop.eup %223  ;;  %v113_v56 = vadd.f32 %v215_v50, %v106_v53 }
 0x10d   :  { %v84_v57 = vmul.f32 %v222_v43, %v83_v54  ;;  %v90_v58 = vmul.f32 %v224_v55, %v68_v44  ;;  %vm96_vm9 = vweird.f32 %v224_v55 }
 0x10e   :  { %v116_v59 = vpack.c.bf16 %v113_v56, %v113_v56  ;;  %vm97_vm11 = vmor %vm95_vm10, %vm96_vm9 }
 0x10f   :  { %v88_v60 = vsel %vm87_vm8, %v222_v43, %v84_v57  ;;  %v91_v61 = vmul.f32 %v224_v55, %v90_v58 }
 0x110   :  { %120 = vst.msk [vmem:[#allocation2] sm:$0xf] %vm119_vm6, %v116_v59  ;;  %v100_v62 = vmul.f32 %v88_v60, %v49_v22 }
 0x111   :  { %v92_v63 = vmul.f32 0.5, %v91_v61 }
 0x112   :  { %v107_v0 = vmul.f32 %v214_v47, %v100_v62 }
 0x113   :  { %v93_v1 = vsub.f32 1.5, %v92_v63 }
 0x114   :  { %v114_v2 = vadd.f32 %v215_v50, %v107_v0 }
 0x115   :  { %v94_v3 = vmul.f32 %v224_v55, %v93_v1 }
 0x116   :  { %v117_v4 = vpack.c.bf16 %v114_v2, %v114_v2 }
 0x117   :  { %v98_v5 = vsel %vm97_vm11, %v224_v55, %v94_v3 }
 0x118   :  { %121 = vst.msk [vmem:[#allocation2 + $0x4] sm:$0xf] %vm119_vm6, %v117_v4  ;;  %v101_v6 = vmul.f32 %v98_v5, %v269_v23 }
 0x11a   :  { %v108_v7 = vmul.f32 %v214_v47, %v101_v6 }
 0x11c   :  { %v115_v8 = vadd.f32 %v215_v50, %v108_v7 }
 0x11e   :  { %v118_v9 = vpack.c.bf16 %v115_v8, %v115_v8 }
 0x11f   :  { %v203_v10 = vld [vmem:[#allocation2] sm:$0xff] }
 0x120   :  { %122 = vst.msk [vmem:[#allocation2 + $0x8] sm:$0xf] %vm119_vm6, %v118_v9  ;;  %201 = vmatmul.msk.bf16.vlgmr.msra.gmra.mxu0 %vm28_vm0, %v203_v10 }
 0x127   :  { %v125_v11 = vld [vmem:[#allocation2 + $0x8] sm:$0xf] }
 0x128   :  { %v139_v12 = vunpack.c.l.b16 %v125_v11 }
 0x12a   :  { %v141_v13 = vpack.c.b16 %v139_v12, %v139_v12 }
 0x12c   :  { %202 = vmatmul.msk.bf16.vlgmr.msra.gmra.mxu1 %vm28_vm0, %v141_v13 }
 0x19d   :  { %v170_v14 = vpop.f32.mrf.mxu0 }
 0x19e   :  { %v171_v17 = vadd.f32 %v216_v15, %v170_v14 }
 0x1a5   :  { %v172_v16 = vpop.f32.mrf.mxu0 }
 0x1a6   :  { %v173_v18 = vadd.f32 %v216_v15, %v172_v16 }
 0x1a8   :  { %v209_v19 = vpack.c.bf16 %v173_v18, %v171_v17 }
 0x1a9   :  { %v175_v20 = vpop.f32.mrf.mxu1 }
 0x1aa   :  { %v176_v21 = vadd.f32 %v216_v15, %v175_v20  ;;  %210 = vst [vmem:[%s307_s5] sm:$0xff] %v209_v19  }
 0x1ac   :  { %v181_v22 = vpack.c.bf16 %v176_v21, %v176_v21 }
 0x1ae   :  { %184 = vst [vmem:[%s307_s5 + $0x8] sm:$0xf] %v181_v22 }
 0x1b1   :  { %v177_v23 = vpop.f32.mrf.mxu1 }

// kernel: _lambda_.63
= control target key start
LH: loop header
LB: loop body
LE: loop exit
PB: predicated region body
PF: predicated region fallthrough
CT: control target
= control target key end

     0   :  { %vm17_vm0 = vcmask 261120   ;;  %v123_v6 = vmov 32.0   ;;  %s177_s0 = inlined_call_operand.vmem [shape: f32[24,32], index: 0, kind: input, shape index: {}]   ;;  %s178_s1 = inlined_call_operand.vmem [shape: f32[1,32], index: 1, kind: input, shape index: {}]   ;;  %s179_s2 = inlined_call_operand.vmem [shape: f32[1,32], index: 2, kind: input, shape index: {}]   ;;  %s180_s3 = inlined_call_operand.vmem [shape: f32[24,32], index: 3, kind: output, shape index: {}]  }
   0x1   :  { %v14_v0 = vld [vmem:[%s177_s0] sm:$0xff]  ;;  %v16_v1 = vld [vmem:[%s177_s0 + $0x10] sm:$0xff]  ;;  %v15_v4 = vld [vmem:[%s177_s0 + $0x8] sm:$0xff]  ;;  %115 = vrcp.f32 %v123_v6 }
   0x2   :  { %v18_v2 = vsel %vm17_vm0, %v14_v0, 0.0  ;;  %v24_v3 = vsel %vm17_vm0, %v16_v1, 0.0  ;;  %v21_v5 = vsel %vm17_vm0, %v15_v4, 0.0  ;;  %v113_v45 = vld [vmem:[%s178_s1] ss:$0 sm:$0xff] }
   0x3   :  { %19 = vadd.xlane.f32.xlu0 %v18_v2  ;;  %25 = vadd.xlane.f32.xlu1 %v24_v3  ;;  %v114_v48 = vld [vmem:[%s179_s2] ss:$0 sm:$0xff] }
   0x7   :  { %v116_v7 = vpop.eup %115 }
   0x8   :  { %v28_v8 = vmul.f32 32.0, %v116_v7  ;;  %vm32_vm1 = vweird.f32 %v116_v7 }
   0xa   :  { %v29_v9 = vsub.f32 1.0, %v28_v8 }
   0xb   :  { %22 = vadd.xlane.f32.xlu0 %v21_v5 }
   0xc   :  { %v30_v10 = vmul.f32 %v116_v7, %v29_v9 }
   0xe   :  { %v31_v11 = vadd.f32 %v116_v7, %v30_v10 }
  0x10   :  { %v33_v12 = vsel %vm32_vm1, %v116_v7, %v31_v11 }
  0x76   :  { %v20_v13 = vpop.xlane.xlu0 %19  ;;  %v26_v17 = vpop.xlane.xlu1 %25 }
  0x77   :  { %v34_v14 = vmul.f32 %v33_v12, %v20_v13  ;;  %v36_v21 = vmul.f32 %v33_v12, %v26_v17 }
  0x79   :  { %v37_v15 = vsub.f32 %v14_v0, %v34_v14  ;;  %v39_v23 = vsub.f32 %v16_v1, %v36_v21 }
  0x7b   :  { %v40_v16 = vmul.f32 %v37_v15, %v37_v15  ;;  %v42_v26 = vmul.f32 %v39_v23, %v39_v23 }
  0x7d   :  { %v43_v18 = vsel %vm17_vm0, %v40_v16, 0.0  ;;  %v49_v27 = vsel %vm17_vm0, %v42_v26, 0.0 }
  0x7e   :  { %44 = vadd.xlane.f32.xlu1 %v43_v18  ;;  %v23_v19 = vpop.xlane.xlu0 %22 }
  0x7f   :  { %v35_v20 = vmul.f32 %v33_v12, %v23_v19 }
  0x81   :  { %v38_v22 = vsub.f32 %v15_v4, %v35_v20 }
  0x83   :  { %v41_v24 = vmul.f32 %v38_v22, %v38_v22 }
  0x85   :  { %v46_v25 = vsel %vm17_vm0, %v41_v24, 0.0 }
  0x86   :  { %47 = vadd.xlane.f32.xlu2 %v46_v25 }
  0x8e   :  { %50 = vadd.xlane.f32.xlu2 %v49_v27 }
  0xf1   :  { %v45_v28 = vpop.xlane.xlu1 %44 }
  0xf2   :  { %v52_v29 = vmul.f32 %v45_v28, %v33_v12 }
  0xf4   :  { %v55_v30 = vadd.f32 1e-05, %v52_v29 }
  0xf6   :  { %117 = vrsqrt.f32 %v55_v30  ;;  %vm64_vm3 = vweird.f32 %v55_v30 }
  0xf9   :  { %v48_v31 = vpop.xlane.xlu2 %47 }
  0xfa   :  { %v53_v32 = vmul.f32 %v48_v31, %v33_v12 }
  0xfc   :  { %v118_v33 = vpop.eup %117  ;;  %v56_v34 = vadd.f32 1e-05, %v53_v32 }
  0xfd   :  { %v59_v35 = vmul.f32 %v118_v33, %v55_v30  ;;  %vm65_vm2 = vweird.f32 %v118_v33 }
  0xfe   :  { %119 = vrsqrt.f32 %v56_v34  ;;  %vm66_vm4 = vmor %vm64_vm3, %vm65_vm2  ;;  %vm74_vm6 = vweird.f32 %v56_v34 }
  0xff   :  { %v60_v36 = vmul.f32 %v118_v33, %v59_v35 }
 0x101   :  { %v61_v37 = vmul.f32 0.5, %v60_v36  ;;  %v51_v38 = vpop.xlane.xlu2 %50 }
 0x102   :  { %v54_v39 = vmul.f32 %v51_v38, %v33_v12 }
 0x103   :  { %v62_v40 = vsub.f32 1.5, %v61_v37 }
 0x104   :  { %v120_v41 = vpop.eup %119  ;;  %v57_v42 = vadd.f32 1e-05, %v54_v39 }
 0x105   :  { %v63_v43 = vmul.f32 %v118_v33, %v62_v40  ;;  %v69_v44 = vmul.f32 %v120_v41, %v56_v34  ;;  %vm75_vm5 = vweird.f32 %v120_v41 }
 0x106   :  { %121 = vrsqrt.f32 %v57_v42  ;;  %vm76_vm7 = vmor %vm74_vm6, %vm75_vm5  ;;  %vm84_vm9 = vweird.f32 %v57_v42 }
 0x107   :  { %v67_v46 = vsel %vm66_vm4, %v118_v33, %v63_v43  ;;  %v70_v47 = vmul.f32 %v120_v41, %v69_v44 }
 0x108   :  { %v88_v49 = vmul.f32 %v67_v46, %v37_v15 }
 0x109   :  { %v71_v50 = vmul.f32 0.5, %v70_v47 }
 0x10a   :  { %v95_v51 = vmul.f32 %v113_v45, %v88_v49 }
 0x10b   :  { %v72_v52 = vsub.f32 1.5, %v71_v50 }
 0x10c   :  { %v122_v53 = vpop.eup %121  ;;  %v102_v54 = vadd.f32 %v114_v48, %v95_v51 }
 0x10d   :  { %v73_v55 = vmul.f32 %v120_v41, %v72_v52  ;;  %v79_v56 = vmul.f32 %v122_v53, %v57_v42  ;;  %vm85_vm8 = vweird.f32 %v122_v53 }
 0x10e   :  { %105 = vst.msk [vmem:[%s180_s3] sm:$0xff] %vm17_vm0, %v102_v54  ;;  %vm86_vm10 = vmor %vm84_vm9, %vm85_vm8 }
 0x10f   :  { %v77_v57 = vsel %vm76_vm7, %v120_v41, %v73_v55  ;;  %v80_v58 = vmul.f32 %v122_v53, %v79_v56 }
 0x110   :  { %v89_v59 = vmul.f32 %v77_v57, %v38_v22 }
 0x111   :  { %v81_v60 = vmul.f32 0.5, %v80_v58 }
 0x112   :  { %v96_v61 = vmul.f32 %v113_v45, %v89_v59 }
 0x113   :  { %v82_v62 = vsub.f32 1.5, %v81_v60 }
 0x114   :  { %v103_v63 = vadd.f32 %v114_v48, %v96_v61 }
 0x115   :  { %v83_v0 = vmul.f32 %v122_v53, %v82_v62 }
 0x116   :  { %106 = vst.msk [vmem:[%s180_s3 + $0x8] sm:$0xff] %vm17_vm0, %v103_v63 }
 0x117   :  { %v87_v1 = vsel %vm86_vm10, %v122_v53, %v83_v0 }
 0x118   :  { %v90_v2 = vmul.f32 %v87_v1, %v39_v23 }
 0x11a   :  { %v97_v3 = vmul.f32 %v113_v45, %v90_v2 }
 0x11c   :  { %v104_v4 = vadd.f32 %v114_v48, %v97_v3 }
 0x11e   :  { %107 = vst.msk [vmem:[%s180_s3 + $0x10] sm:$0xff] %vm17_vm0, %v104_v4 }

// kernel: _lambda_.59
= control target key start
LH: loop header
LB: loop body
LE: loop exit
PB: predicated region body
PF: predicated region fallthrough
CT: control target
= control target key end

     0   :  { %s565_s15 = smov 0   ;;  %s632_s0 = inlined_call_operand.vmem [shape: bf16[2,18,128], index: 0, kind: input, shape index: {}]   ;;  %s633_s1 = inlined_call_operand.vmem [shape: f32[7,64], index: 1, kind: input, shape index: {}]   ;;  %s634_s2 = inlined_call_operand.vmem [shape: f32[1,64], index: 2, kind: input, shape index: {}]   ;;  %s635_s3 = inlined_call_operand.vmem [shape: f32[1,64], index: 3, kind: input, shape index: {}]   ;;  %s636_s4 = inlined_call_operand.vmem [shape: bf16[2,12,64], index: 4, kind: output, shape index: {}]  }
   0x1 LB: > { %s479_s16 = sadd.s32 4294967295, %s537_s15   ;;  %p483_p0 = scmp.ge.s32.totalorder %s537_s15, 1  ;;  %s537_s15 = sphi %s565_s15, %s14_s15  }
   0x2   : > { %p162_p1 = scmp.lt.s32.totalorder %s537_s15, 3 }
   0x4   : > { %p163_p2 = pnand %p483_p0, %p162_p1 }
   0x5   : > { %p188_p3 = scmp.lt.s32.totalorder (!%p163_p2), %s479_s16, 1  ;;  %s539_s21 = smov (!%p163_p2), 64  }
   0x6   : > { %166 = sbr.rel (%p163_p2) target bundleno = 225 (0xe1), region = 36 }
   0xb   : > { %s642_s16 = smov (!%p188_p3, %s479_s16), 1  ;;  %v276_v47 = vld [vmem:[%s633_s1] sm:$0x7f]  ;;  %vm285_vm12 = vcmask 1046528   ;;  %vm298_vm13 = vcmask 1045504   ;;  %vm311_vm14 = vcmask 1044480  }
   0xc   : > { %s499_s17 = smul.u32 12, %s642_s16  ;;  %v280_v49 = vperm.slane %v276_v47, 1  ;;  %v293_v50 = vperm.slane %v276_v47, 2  ;;  %v306_v52 = vperm.slane %v276_v47, 3  ;;  %v277_v55 = vperm.slane %v276_v47, 0  ;;  %s494_s28 = sshll.u32 %s642_s16, 3 }
   0xd   : > { %v319_v56 = vperm.slane %v276_v47, 4  ;;  %v332_v57 = vperm.slane %v276_v47, 5  ;;  %v349_v59 = vperm.slane %v276_v47, 6  ;;  %vm324_vm15 = vcmask 1043456   ;;  %s197_s5 = scalar_lea.vmem %s636_s4, %s494_s28 }
   0xe   : > { %s192_s20 = scalar_lea.vmem %s632_s0, %s499_s17 }
   0xf   : > { %v579_v0 = vld [vmem:[%s192_s20] sm:$0xff]   ;;  %v581_v1 = vld [vmem:[%s192_s20 + $0x8] sm:$0x1] }
  0x10   : > { %v497_v2 = vunpack.c.l.bf16 %v579_v0  ;;  %v203_v3 = vunpack.c.l.bf16 %v581_v1  ;;  %v498_v4 = vunpack.c.h.bf16 %v579_v0 }
  0x12   : > { %v487_v5 = vmul.f32 -1.442695, %v497_v2  ;;  %v489_v6 = vmul.f32 -1.442695, %v203_v3  ;;  %v488_v7 = vmul.f32 -1.442695, %v498_v4 }
  0x14   : > { %511 = vpow2.f32 %v487_v5 }
  0x15   : > { %513 = vpow2.f32 %v489_v6 }
  0x16   : > { %515 = vpow2.f32 %v488_v7 }
  0x1a   : > { %v512_v8 = vpop.eup %511 }
  0x1b   : > { %v514_v9 = vpop.eup %513  ;;  %v213_v10 = vadd.f32 1.0, %v512_v8 }
  0x1c   : > { %v516_v11 = vpop.eup %515  ;;  %v215_v12 = vadd.f32 1.0, %v514_v9 }
  0x1d   : > { %517 = vrcp.f32 %v213_v10  ;;  %v214_v13 = vadd.f32 1.0, %v516_v11  ;;  %v225_v17 = vand.u32 2147483647, %v213_v10  ;;  %v227_v18 = vand.u32 2147483648, %v213_v10 }
  0x1e   : > { %519 = vrcp.f32 %v215_v12  ;;  %v257_v20 = vand.u32 2147483648, %v215_v12  ;;  %vm221_vm0 = vweird.f32 %v213_v10  ;;  %vm251_vm2 = vweird.f32 %v215_v12 }
  0x1f   : > { %521 = vrcp.f32 %v214_v13  ;;  %v255_v24 = vand.u32 2147483647, %v215_v12  ;;  %vm226_vm5 = vcmp.eq.f32.partialorder %v225_v17, 8.507059e+37  ;;  %v228_v28 = vor.u32 1.1754944e-38, %v227_v18 }
  0x20   : > { %v258_v30 = vor.u32 1.1754944e-38, %v257_v20  ;;  %vm236_vm7 = vweird.f32 %v214_v13  ;;  %v242_v35 = vand.u32 2147483648, %v214_v13  ;;  %v240_v38 = vand.u32 2147483647, %v214_v13 }
  0x21   : > { %vm256_vm9 = vcmp.eq.f32.partialorder %v255_v24, 8.507059e+37 }
  0x22   : > { %v243_v43 = vor.u32 1.1754944e-38, %v242_v35  ;;  %vm241_vm11 = vcmp.eq.f32.partialorder %v240_v38, 8.507059e+37 }
  0x23   : > { %v518_v14 = vpop.eup %517 }
  0x24   : > { %v520_v15 = vpop.eup %519  ;;  %v217_v16 = vmul.f32 %v518_v14, %v213_v10  ;;  %vm222_vm1 = vweird.f32 %v518_v14 }
  0x25   : > { %v247_v19 = vmul.f32 %v520_v15, %v215_v12  ;;  %v522_v22 = vpop.eup %521  ;;  %vm252_vm3 = vweird.f32 %v520_v15  ;;  %vm592_vm4 = vmor %vm221_vm0, %vm222_vm1  ;;  %vm339_vm0 = vcmask 1042432   ;;  %vm356_vm1 = vcmask 1041408  }
  0x26   : > { %v218_v21 = vsub.f32 1.0, %v217_v16  ;;  %v232_v26 = vmul.f32 %v522_v22, %v214_v13  ;;  %vm596_vm6 = vmor %vm251_vm2, %vm252_vm3  ;;  %vm237_vm8 = vweird.f32 %v522_v22 }
  0x27   : > { %v248_v23 = vsub.f32 1.0, %v247_v19  ;;  %vm238_vm10 = vmor %vm236_vm7, %vm237_vm8 }
  0x28   : > { %v219_v25 = vmul.f32 %v518_v14, %v218_v21  ;;  %v233_v33 = vsub.f32 1.0, %v232_v26 }
  0x29   : > { %v249_v29 = vmul.f32 %v520_v15, %v248_v23 }
  0x2a   : > { %v220_v31 = vadd.f32 %v518_v14, %v219_v25  ;;  %v234_v37 = vmul.f32 %v522_v22, %v233_v33 }
  0x2b   : > { %v250_v34 = vadd.f32 %v520_v15, %v249_v29 }
  0x2c   : > { %v224_v36 = vsel %vm592_vm4, %v518_v14, %v220_v31  ;;  %v235_v42 = vadd.f32 %v522_v22, %v234_v37 }
  0x2d   : > { %v229_v39 = vsel %vm226_vm5, %v228_v28, %v224_v36  ;;  %v254_v40 = vsel %vm596_vm6, %v520_v15, %v250_v34 }
  0x2e   : > { %264 = vrot.lane.b32.xlu0 %v229_v39, %s539_s21  ;;  %v259_v41 = vsel %vm256_vm9, %v258_v30, %v254_v40  ;;  %v239_v44 = vsel %vm238_vm10, %v522_v22, %v235_v42  ;;  %v509_v39 = vld [vmem:[%s634_s2] ss:$0 sm:$0xff]  ;;  %vm422_vm10 = vcmask 517120  }
  0x2f   : > { %268 = vrot.lane.b32.xlu1 %v259_v41, %s539_s21  ;;  %v244_v45 = vsel %vm241_vm11, %v243_v43, %v239_v44  ;;  %v510_v44 = vld [vmem:[%s635_s3] ss:$0 sm:$0xff]  ;;  %vm420_vm11 = vcmask 519168  }
  0x36   : > { %266 = vrot.lane.b32.xlu0 %v244_v45, %s539_s21 }
  0xa0   : > { %v265_v46 = vpop.permute.xlu0 %264 }
  0xa1   : > { %v273_v48 = vmul.f32 %v497_v2, %v265_v46  ;;  %v269_v51 = vpop.permute.xlu1 %268 }
  0xa2   : > { %v275_v60 = vmul.f32 %v269_v51, %v203_v3 }
  0xa3   : > { %v281_v53 = vmul.f32 %v280_v49, %v273_v48  ;;  %v294_v61 = vmul.f32 %v293_v50, %v273_v48  ;;  %v307_v6 = vmul.f32 %v306_v52, %v273_v48  ;;  %v278_v0 = vmul.f32 %v277_v55, %v273_v48 }
  0xa4   : > { %v335_v11 = vmul.f32 %v332_v57, %v275_v60  ;;  %v333_v15 = vmul.f32 %v332_v57, %v273_v48  ;;  %v352_v16 = vmul.f32 %v349_v59, %v275_v60  ;;  %v350_v27 = vmul.f32 %v349_v59, %v273_v48 }
  0xa5   : > { %v286_v5 = vrot.slane %v281_v53, 1  ;;  %v299_v1 = vrot.slane %v294_v61, 2  ;;  %v312_v19 = vrot.slane %v307_v6, 3 }
  0xa6   : > { %v343_v23 = vrot.slane %v335_v11, 5  ;;  %v360_v30 = vrot.slane %v352_v16, 6  ;;  %v340_v33 = vrot.slane %v333_v15, 5  ;;  %v357_v38 = vrot.slane %v350_v27, 6 }
  0xa8   : > { %v267_v54 = vpop.permute.xlu0 %266 }
  0xa9   : > { %v274_v58 = vmul.f32 %v498_v4, %v267_v54  ;;  %v320_v4 = vmul.f32 %v319_v56, %v273_v48 }
  0xab   : > { %v282_v62 = vmul.f32 %v280_v49, %v274_v58  ;;  %v295_v63 = vmul.f32 %v293_v50, %v274_v58  ;;  %v308_v2 = vmul.f32 %v306_v52, %v274_v58  ;;  %v279_v7 = vmul.f32 %v277_v55, %v274_v58 }
  0xac   : > { %v321_v10 = vmul.f32 %v319_v56, %v274_v58  ;;  %v334_v12 = vmul.f32 %v332_v57, %v274_v58  ;;  %v351_v18 = vmul.f32 %v349_v59, %v274_v58  ;;  %v325_v26 = vrot.slane %v320_v4, 4 }
  0xad   : > { %v287_v8 = vrot.slane %v282_v62, 1  ;;  %v300_v9 = vrot.slane %v295_v63, 2  ;;  %v313_v14 = vrot.slane %v308_v2, 3 }
  0xae   : > { %v326_v22 = vrot.slane %v321_v10, 4  ;;  %v341_v25 = vrot.slane %v334_v12, 5  ;;  %v358_v32 = vrot.slane %v351_v18, 6 }
  0xaf   : > { %v288_v3 = vsel %vm285_vm12, %v286_v5, %v287_v8  ;;  %v292_v13 = vadd.f32 %v287_v8, %v279_v7  ;;  %v301_v20 = vsel %vm298_vm13, %v299_v1, %v300_v9  ;;  %v314_v28 = vsel %vm311_vm14, %v312_v19, %v313_v14 }
  0xb0   : > { %v291_v17 = vadd.f32 %v288_v3, %v278_v0  ;;  %v327_v34 = vsel %vm324_vm15, %v325_v26, %v326_v22  ;;  %v344_v37 = vsel %vm339_vm0, %v341_v25, %v343_v23  ;;  %v342_v40 = vsel %vm339_vm0, %v340_v33, %v341_v25 }
  0xb1   : > { %v305_v21 = vadd.f32 %v300_v9, %v292_v13  ;;  %v361_v43 = vsel %vm356_vm1, %v358_v32, %v360_v30  ;;  %v359_v45 = vsel %vm356_vm1, %v357_v38, %v358_v32 }
  0xb2   : > { %v304_v24 = vadd.f32 %v301_v20, %v291_v17 }
  0xb3   : > { %v318_v29 = vadd.f32 %v313_v14, %v305_v21 }
  0xb4   : > { %v317_v31 = vadd.f32 %v314_v28, %v304_v24 }
  0xb5   : > { %v331_v35 = vadd.f32 %v326_v22, %v318_v29 }
  0xb6   : > { %v330_v36 = vadd.f32 %v327_v34, %v317_v31 }
  0xb7   : > { %v348_v41 = vadd.f32 %v344_v37, %v331_v35 }
  0xb8   : > { %v347_v42 = vadd.f32 %v342_v40, %v330_v36 }
  0xb9   : > { %v365_v46 = vadd.f32 %v361_v43, %v348_v41 }
  0xba   : > { %v364_v47 = vadd.f32 %v359_v45, %v347_v42 }
  0xbb   : > { %v371_v48 = vmul.f32 %v509_v39, %v365_v46 }
  0xbc   : > { %v370_v49 = vmul.f32 %v509_v39, %v364_v47 }
  0xbd   : > { %v377_v50 = vadd.f32 %v510_v44, %v371_v48 }
  0xbe   : > { %v376_v51 = vadd.f32 %v510_v44, %v370_v49 }
  0xbf   : > { %v491_v52 = vmul.f32 -1.442695, %v377_v50 }
  0xc0   : > { %v490_v53 = vmul.f32 -1.442695, %v376_v51 }
  0xc1   : > { %523 = vpow2.f32 %v491_v52 }
  0xc2   : > { %525 = vpow2.f32 %v490_v53 }
  0xc7   : > { %v524_v54 = vpop.eup %523 }
  0xc8   : > { %v526_v55 = vpop.eup %525  ;;  %v385_v56 = vadd.f32 1.0, %v524_v54 }
  0xc9   : > { %v384_v57 = vadd.f32 1.0, %v526_v55 }
  0xca   : > { %527 = vrcp.f32 %v385_v56  ;;  %v412_v2 = vand.u32 2147483648, %v385_v56  ;;  %v410_v7 = vand.u32 2147483647, %v385_v56  ;;  %vm406_vm4 = vweird.f32 %v385_v56 }
  0xcb   : > { %529 = vrcp.f32 %v384_v57  ;;  %v397_v5 = vand.u32 2147483648, %v384_v57  ;;  %v395_v9 = vand.u32 2147483647, %v384_v57  ;;  %vm391_vm5 = vweird.f32 %v384_v57 }
  0xcc   : > { %v413_v4 = vor.u32 1.1754944e-38, %v412_v2  ;;  %vm411_vm8 = vcmp.eq.f32.partialorder %v410_v7, 8.507059e+37 }
  0xcd   : > { %v398_v11 = vor.u32 1.1754944e-38, %v397_v5  ;;  %vm396_vm9 = vcmp.eq.f32.partialorder %v395_v9, 8.507059e+37 }
  0xd0   : > { %v528_v58 = vpop.eup %527 }
  0xd1   : > { %v530_v59 = vpop.eup %529  ;;  %v402_v60 = vmul.f32 %v528_v58, %v385_v56  ;;  %vm407_vm2 = vweird.f32 %v528_v58 }
  0xd2   : > { %v387_v61 = vmul.f32 %v530_v59, %v384_v57  ;;  %vm392_vm3 = vweird.f32 %v530_v59  ;;  %vm408_vm6 = vmor %vm406_vm4, %vm407_vm2 }
  0xd3   : > { %v403_v62 = vsub.f32 1.0, %v402_v60  ;;  %vm393_vm7 = vmor %vm391_vm5, %vm392_vm3 }
  0xd4   : > { %v388_v63 = vsub.f32 1.0, %v387_v61 }
  0xd5   : > { %v404_v6 = vmul.f32 %v528_v58, %v403_v62 }
  0xd6   : > { %v389_v8 = vmul.f32 %v530_v59, %v388_v63 }
  0xd7   : > { %v405_v10 = vadd.f32 %v528_v58, %v404_v6 }
  0xd8   : > { %v390_v0 = vadd.f32 %v530_v59, %v389_v8 }
  0xd9   : > { %v409_v12 = vsel %vm408_vm6, %v528_v58, %v405_v10 }
  0xda   : > { %v394_v1 = vsel %vm393_vm7, %v530_v59, %v390_v0  ;;  %v414_v3 = vsel %vm411_vm8, %v413_v4, %v409_v12 }
  0xdb   : > { %v399_v13 = vsel %vm396_vm9, %v398_v11, %v394_v1  ;;  %v417_v14 = vmul.f32 %v414_v3, %v377_v50 }
  0xdc   : > { %v416_v15 = vmul.f32 %v399_v13, %v376_v51 }
  0xdd   : > { %v419_v16 = vpack.c.bf16 %v417_v14, %v417_v14 }
  0xde   : > { %v418_v17 = vpack.c.bf16 %v416_v15, %v416_v15 }
  0xdf   : > { %423 = vst.msk [vmem:[%s197_s5 + $0x4] sm:$0x3] %vm422_vm10, %v419_v16 }
  0xe0   : > { %421 = vst.msk [vmem:[%s197_s5] sm:$0xf] %vm420_vm11, %v418_v17 }
  0xe1 PF: > { %s14_s15 = sadd.s32 1, %s537_s15  }
  0xe2   : > { %p11_p4 = scmp.ge.s32.totalorder %s14_s15, 4  }
  0xe4   :  { %13 = sbr.rel (!%p11_p4) target bundleno = 1 (0x1), region = 66 }

// kernel: _lambda_.60
= control target key start
LH: loop header
LB: loop body
LE: loop exit
PB: predicated region body
PF: predicated region fallthrough
CT: control target
= control target key end

     0   :  { %vm22_vm0 = vcmask 261120   ;;  %v163_v1 = vmov 0.0   ;;  %vm72_vm1 = vcmask 523264   ;;  %s237_s1 = inlined_call_operand.vmem [shape: bf16[64,32], index: 1, kind: input, shape index: {}]   ;;  %s238_s2 = inlined_call_operand.vmem [shape: f32[1,32], index: 2, kind: input, shape index: {}]   ;;  %s239_s0 = inlined_call_operand.vmem [shape: bf16[24,64], index: 0, kind: input, shape index: {}]   ;;  %s240_s3 = inlined_call_operand.vmem [shape: f32[24,32], index: 3, kind: input, shape index: {}]   ;;  %s241_s4 = inlined_call_operand.vmem [shape: f32[24,32], index: 4, kind: output, shape index: {}]  }
   0x1   :  { %v156_v0 = vld [vmem:[%s237_s1 + $0x18] sm:$0xff]  ;;  %23 = vst.msk [vmem:[#allocation2] sm:$0xff] %vm22_vm0, %v163_v1  ;;  %v155_v2 = vld [vmem:[%s237_s1 + $0x10] sm:$0xff]  ;;  %v154_v3 = vld [vmem:[%s237_s1 + $0x8] sm:$0xff] }
   0x2   :  { %24 = vst.msk [vmem:[#allocation2 + $0x8] sm:$0xff] %vm22_vm0, %v163_v1  ;;  %83 = vmatpush.bf16.msra.mxu0 %v156_v0  ;;  %157 = vmatpush.bf16.msra.mxu1 %v156_v0  ;;  %v31_v4 = vld [vmem:[%s239_s0 + $0x8] sm:$0xf]  ;;  %v153_v6 = vld [vmem:[%s237_s1] sm:$0xff]  ;;  %v119_v24 = vld [vmem:[%s240_s3 + $0x10] sm:$0xff] }
   0x3   :  { %25 = vst.msk [vmem:[#allocation2 + $0x10] sm:$0xff] %vm22_vm0, %v163_v1  ;;  %v45_v5 = vunpack.c.l.b16 %v31_v4  ;;  %v152_v7 = vld [vmem:[%s239_s0] sm:$0xff]  ;;  %v118_v29 = vld [vmem:[%s240_s3 + $0x8] sm:$0xff] }
   0x4   :  { %v162_v16 = vld [vmem:[%s238_s2] ss:$0 sm:$0xff] }
   0x5   :  { %v47_v8 = vpack.c.b16 %v45_v5, %v45_v5  ;;  %v117_v21 = vld [vmem:[%s240_s3] sm:$0xff] }
   0x6   :  { %84 = vmatpush.bf16.msra.mxu0 %v155_v2  ;;  %158 = vmatpush.bf16.msra.mxu1 %v155_v2 }
   0x8   :  { %v26_v9 = vld [vmem:[#allocation2] sm:$0xff] }
   0x9   :  { %v27_v15 = vld [vmem:[#allocation2 + $0x8] sm:$0xff] }
   0xa   :  { %85 = vmatpush.bf16.msra.mxu0 %v154_v3  ;;  %159 = vmatpush.bf16.msra.mxu1 %v154_v3  ;;  %v28_v10 = vld [vmem:[#allocation2 + $0x10] sm:$0xff] }
   0xe   :  { %86 = vmatpush.bf16.msra.mxu0 %v153_v6  ;;  %160 = vmatpush.bf16.msra.mxu1 %v153_v6 }
  0x11   :  { %150 = vmatmul.msk.bf16.vlgmr.msra.gmra.mxu0 %vm72_vm1, %v152_v7  ;;  %151 = vmatmul.msk.bf16.vlgmr.msra.gmra.mxu1 %vm72_vm1, %v47_v8 }
  0x8e   :  { %v88_v11 = vpop.f32.mrf.mxu0  ;;  %v93_v12 = vpop.f32.mrf.mxu1 }
  0x8f   :  { %v97_v13 = vadd.f32 %v88_v11, %v26_v9  ;;  %v99_v14 = vadd.f32 %v93_v12, %v28_v10 }
  0x91   :  { %101 = vst.msk [vmem:[#allocation2] sm:$0xff] %vm22_vm0, %v97_v13 }
  0x92   :  { %103 = vst.msk [vmem:[#allocation2 + $0x10] sm:$0xff] %vm22_vm0, %v99_v14 }
  0x96   :  { %v90_v17 = vpop.f32.mrf.mxu0  ;;  %v95_v18 = vpop.f32.mrf.mxu1 }
  0x97   :  { %v98_v19 = vadd.f32 %v90_v17, %v27_v15 }
  0x98   :  { %v107_v20 = vld [vmem:[#allocation2] sm:$0xff] }
  0x99   :  { %v114_v22 = vadd.f32 %v162_v16, %v107_v20  ;;  %v109_v23 = vld [vmem:[#allocation2 + $0x10] sm:$0xff]  ;;  %102 = vst.msk [vmem:[#allocation2 + $0x8] sm:$0xff] %vm22_vm0, %v98_v19 }
  0x9a   :  { %v116_v25 = vadd.f32 %v162_v16, %v109_v23 }
  0x9b   :  { %v120_v26 = vadd.f32 %v117_v21, %v114_v22 }
  0x9c   :  { %v122_v27 = vadd.f32 %v119_v24, %v116_v25 }
  0x9d   :  { %123 = vst.msk [vmem:[%s241_s4] sm:$0xff] %vm22_vm0, %v120_v26 }
  0x9e   :  { %125 = vst.msk [vmem:[%s241_s4 + $0x10] sm:$0xff] %vm22_vm0, %v122_v27 }
  0xa0   :  { %v108_v28 = vld [vmem:[#allocation2 + $0x8] sm:$0xff] }
  0xa1   :  { %v115_v30 = vadd.f32 %v162_v16, %v108_v28 }
  0xa3   :  { %v121_v31 = vadd.f32 %v118_v29, %v115_v30 }
  0xa5   :  { %124 = vst.msk [vmem:[%s241_s4 + $0x8] sm:$0xff] %vm22_vm0, %v121_v31 }

// kernel: _lambda_.81
= control target key start
LH: loop header
LB: loop body
LE: loop exit
PB: predicated region body
PF: predicated region fallthrough
CT: control target
= control target key end

     0   :  { %vm19_vm0 = vcmask 523264   ;;  %v130_v1 = vmov 0.0   ;;  %vm53_vm1 = vcmask 261120   ;;  %vm101_vm2 = vcmask 519168   ;;  %s181_s1 = inlined_call_operand.vmem [shape: bf16[32,64], index: 1, kind: input, shape index: {}]   ;;  %s182_s0 = inlined_call_operand.vmem [shape: bf16[24,32], index: 0, kind: input, shape index: {}]   ;;  %s183_s2 = inlined_call_operand.vmem [shape: f32[1,64], index: 2, kind: input, shape index: {}]   ;;  %s184_s3 = inlined_call_operand.vmem [shape: bf16[24,64], index: 3, kind: output, shape index: {}]  }
   0x1   :  { %v125_v0 = vld [vmem:[%s181_s1 + $0x8] sm:$0xff]  ;;  %20 = vst.msk [vmem:[#allocation2] sm:$0xff] %vm19_vm0, %v130_v1  ;;  %v124_v3 = vld [vmem:[%s181_s1] sm:$0xff] }
   0x2   :  { %v28_v2 = vld [vmem:[%s182_s0 + $0x8] sm:$0xf]  ;;  %21 = vst.msk [vmem:[#allocation2 + $0x8] sm:$0xff] %vm19_vm0, %v130_v1  ;;  %66 = vmatpush.bf16.msra.mxu0 %v125_v0  ;;  %126 = vmatpush.bf16.msra.mxu1 %v125_v0  ;;  %v123_v5 = vld [vmem:[%s182_s0] sm:$0xff] }
   0x3   :  { %v38_v4 = vunpack.c.l.b16 %v28_v2  ;;  %22 = vst.msk [vmem:[#allocation2 + $0x10] sm:$0xff] %vm19_vm0, %v130_v1  ;;  %v129_v14 = vld [vmem:[%s183_s2] ss:$0 sm:$0xff] }
   0x5   :  { %v40_v6 = vpack.c.b16 %v38_v4, %v38_v4 }
   0x6   :  { %67 = vmatpush.bf16.msra.mxu0 %v124_v3  ;;  %127 = vmatpush.bf16.msra.mxu1 %v124_v3 }
   0x8   :  { %v23_v7 = vld [vmem:[#allocation2] sm:$0xff] }
   0x9   :  { %121 = vmatmul.msk.bf16.vlgmr.msra.gmra.mxu0 %vm53_vm1, %v123_v5  ;;  %122 = vmatmul.msk.bf16.vlgmr.msra.gmra.mxu1 %vm53_vm1, %v40_v6  ;;  %v24_v13 = vld [vmem:[#allocation2 + $0x8] sm:$0xff] }
   0xa   :  { %v25_v8 = vld [vmem:[#allocation2 + $0x10] sm:$0xff] }
  0x86   :  { %v69_v9 = vpop.f32.mrf.mxu0  ;;  %v74_v10 = vpop.f32.mrf.mxu1 }
  0x87   :  { %v78_v11 = vadd.f32 %v69_v9, %v23_v7  ;;  %v80_v12 = vadd.f32 %v74_v10, %v25_v8 }
  0x89   :  { %82 = vst.msk [vmem:[#allocation2] sm:$0xff] %vm19_vm0, %v78_v11 }
  0x8a   :  { %84 = vst.msk [vmem:[#allocation2 + $0x10] sm:$0xff] %vm19_vm0, %v80_v12 }
  0x8e   :  { %v71_v15 = vpop.f32.mrf.mxu0  ;;  %v76_v16 = vpop.f32.mrf.mxu1 }
  0x8f   :  { %v79_v17 = vadd.f32 %v71_v15, %v24_v13 }
  0x90   :  { %v88_v18 = vld [vmem:[#allocation2] sm:$0xff] }
  0x91   :  { %v95_v19 = vadd.f32 %v129_v14, %v88_v18  ;;  %v90_v20 = vld [vmem:[#allocation2 + $0x10] sm:$0xff]  ;;  %83 = vst.msk [vmem:[#allocation2 + $0x8] sm:$0xff] %vm19_vm0, %v79_v17 }
  0x92   :  { %v97_v21 = vadd.f32 %v129_v14, %v90_v20 }
  0x93   :  { %v98_v22 = vpack.c.bf16 %v95_v19, %v95_v19 }
  0x94   :  { %v100_v23 = vpack.c.bf16 %v97_v21, %v97_v21 }
  0x95   :  { %102 = vst.msk [vmem:[%s184_s3] sm:$0xf] %vm101_vm2, %v98_v22 }
  0x96   :  { %104 = vst.msk [vmem:[%s184_s3 + $0x8] sm:$0xf] %vm101_vm2, %v100_v23 }
  0x98   :  { %v89_v24 = vld [vmem:[#allocation2 + $0x8] sm:$0xff] }
  0x99   :  { %v96_v25 = vadd.f32 %v129_v14, %v89_v24 }
  0x9b   :  { %v99_v26 = vpack.c.bf16 %v96_v25, %v96_v25 }
  0x9d   :  { %103 = vst.msk [vmem:[%s184_s3 + $0x4] sm:$0xf] %vm101_vm2, %v99_v26 }

// kernel: _lambda_.76
= control target key start
LH: loop header
LB: loop body
LE: loop exit
PB: predicated region body
PF: predicated region fallthrough
CT: control target
= control target key end

     0   :  { %vm19_vm0 = vcmask 785408   ;;  %v108_v1 = vmov 0.0   ;;  %vm47_vm1 = vcmask 261120   ;;  %vm83_vm2 = vcmask 781312   ;;  %s151_s1 = inlined_call_operand.vmem [shape: bf16[32,96], index: 1, kind: input, shape index: {}]   ;;  %s152_s2 = inlined_call_operand.vmem [shape: f32[1,96], index: 2, kind: input, shape index: {}]   ;;  %s153_s0 = inlined_call_operand.vmem [shape: bf16[16,32], index: 0, kind: input, shape index: {}]   ;;  %s154_s3 = inlined_call_operand.vmem [shape: bf16[16,96], index: 3, kind: output, shape index: {}]  }
   0x1   :  { %v105_v0 = vld [vmem:[%s151_s1 + $0x8] sm:$0xff]  ;;  %20 = vst.msk [vmem:[#allocation2] sm:$0xff] %vm19_vm0, %v108_v1  ;;  %v104_v2 = vld [vmem:[%s151_s1] sm:$0xff] }
   0x2   :  { %21 = vst.msk [vmem:[#allocation2 + $0x8] sm:$0xff] %vm19_vm0, %v108_v1  ;;  %57 = vmatpush.bf16.msra.mxu0 %v105_v0  ;;  %v103_v3 = vld [vmem:[%s153_s0] sm:$0xff] }
   0x3   :  { %v107_v8 = vld [vmem:[%s152_s2] ss:$0 sm:$0xff] }
   0x6   :  { %58 = vmatpush.bf16.msra.mxu0 %v104_v2 }
   0x8   :  { %v22_v4 = vld [vmem:[#allocation2] sm:$0xff] }
   0x9   :  { %102 = vmatmul.msk.bf16.vlgmr.msra.gmra.mxu0 %vm47_vm1, %v103_v3  ;;  %v23_v7 = vld [vmem:[#allocation2 + $0x8] sm:$0xff] }
  0x86   :  { %v60_v5 = vpop.f32.mrf.mxu0 }
  0x87   :  { %v65_v6 = vadd.f32 %v60_v5, %v22_v4 }
  0x89   :  { %68 = vst.msk [vmem:[#allocation2] sm:$0xff] %vm19_vm0, %v65_v6 }
  0x8e   :  { %v62_v9 = vpop.f32.mrf.mxu0 }
  0x8f   :  { %v66_v10 = vadd.f32 %v62_v9, %v23_v7 }
  0x90   :  { %v73_v11 = vld [vmem:[#allocation2] sm:$0xff] }
  0x91   :  { %v79_v12 = vadd.f32 %v107_v8, %v73_v11  ;;  %69 = vst.msk [vmem:[#allocation2 + $0x8] sm:$0xff] %vm19_vm0, %v66_v10 }
  0x93   :  { %v81_v13 = vpack.c.bf16 %v79_v12, %v79_v12 }
  0x95   :  { %84 = vst.msk [vmem:[%s154_s3] sm:$0xf] %vm83_vm2, %v81_v13 }
  0x98   :  { %v74_v14 = vld [vmem:[#allocation2 + $0x8] sm:$0xff] }
  0x99   :  { %v80_v15 = vadd.f32 %v107_v8, %v74_v14 }
  0x9b   :  { %v82_v16 = vpack.c.bf16 %v80_v15, %v80_v15 }
  0x9d   :  { %85 = vst.msk [vmem:[%s154_s3 + $0x4] sm:$0xf] %vm83_vm2, %v82_v16 }

// kernel: _lambda_.77
= control target key start
LH: loop header
LB: loop body
LE: loop exit
PB: predicated region body
PF: predicated region fallthrough
CT: control target
= control target key end

     0   :  { %s588_s12 = smov 0   ;;  %s590_s13 = smov 0   ;;  %s651_s0 = inlined_call_operand.vmem [shape: bf16[2,4,6,8], index: 0, kind: input, shape index: {}]   ;;  %s652_s1 = inlined_call_operand.vmem [shape: bf16[2,4,6,8], index: 1, kind: input, shape index: {}]   ;;  %s653_s2 = inlined_call_operand.vmem [shape: bf16[2,4,6,8], index: 2, kind: input, shape index: {}]   ;;  %s654_s3 = inlined_call_operand.vmem [shape: bf16[2,4,6,8], index: 3, kind: output, shape index: {}]  }
   0x1   :  { %s592_s14 = smov 0   ;;  %s594_s15 = smov 0  }
   0x2   :  { %s596_s16 = smov 0  }
   0x3 LB: > { %s22_s17 = sadd.s32 1, %s558_s14  ;;  %s25_s18 = sadd.s32 1, %s562_s15  ;;  %s566_s16 = sphi %s596_s16, %s13_s16   ;;  %s562_s15 = sphi %s594_s15, %s658_s15   ;;  %s558_s14 = sphi %s592_s14, %s657_s14   ;;  %s554_s13 = sphi %s590_s13, %s656_s13   ;;  %s550_s12 = sphi %s588_s12, %s655_s12  }
   0x4   : > { %p23_p0 = scmp.ge.s32.totalorder %s22_s17, 4  ;;  %p471_p1 = scmp.ge.s32.totalorder %s566_s16, 1 }
   0x5   : > { %p186_p2 = scmp.lt.s32.totalorder %s566_s16, 9 }
   0x6   : > { %s660_s17 = smov (%p23_p0, %s22_s17), 0  ;;  %s662_s18 = smov (!%p23_p0, %s25_s18), %s562_s15 }
   0x7   : > { %p187_p3 = pnand %p471_p1, %p186_p2  ;;  %p27_p4 = scmp.ge.s32.totalorder %s662_s18, 2 }
   0x8   : > { %p232_p5 = scmp.lt.s32.totalorder (!%p187_p3), %s554_s13, 1  ;;  %p234_p6 = scmp.lt.s32.totalorder (!%p187_p3), %s550_s12, 3 }
   0x9   : > { %s664_s18 = smov (%p27_p4, %s662_s18), 0  ;;  %190 = sbr.rel (%p187_p3) target bundleno = 557 (0x22d), region = 32 }
   0xe   : > { %s666_s13 = smov (!%p232_p5, %s554_s13), 1  ;;  %s668_s12 = smov (!%p234_p6, %s550_s12), 3  ;;  %vm268_vm0 = vcmask 64512   ;;  %v289_v3 = vlaneseq  ;;  %vm295_vm2 = vcmask 46080   ;;  %vm325_vm3 = vcmask 1042432  }
   0xf   : > { %s472_s19 = sshll.u32 %s666_s13, 2  ;;  %vm321_vm8 = vcmask 48128   ;;  %vm343_vm9 = vcmask 59392  }
  0x10   : > { %s237_s20 = sadd.s32 %s472_s19, %s668_s12  ;;  %v290_v4 = vshrl.u32 %v289_v3, 7  ;;  %v292_v5 = vand.u32 127, %v289_v3 }
  0x11   : > { %s618_s21 = sshll.u32 %s237_s20, 2 }
  0x12   : > { %s247_s24 = scalar_lea.vmem %s652_s1, %s618_s21  ;;  %s239_s27 = scalar_lea.vmem %s651_s0, %s618_s21  ;;  %vm293_vm1 = vcmp.gt.s32.totalorder %v292_v5, %v290_v4 }
  0x13   : > { %v266_v0 = vld [vmem:[%s247_s24] sm:$0x7]  ;;  %s255_s30 = scalar_lea.vmem %s653_s2, %s618_s21  ;;  %s263_s6 = scalar_lea.vmem %s654_s3, %s618_s21 }
  0x14   : > { %v273_v1 = vsel %vm268_vm0, %v266_v0, 0  ;;  %v265_v2 = vld [vmem:[%s239_s27] sm:$0x7] }
  0x15   : > { %282 = vmatpush.bf16.xpose.msra.mxu0 %v273_v1  ;;  %v267_v16 = vld [vmem:[%s255_s30] sm:$0x7] }
  0x16   : > { %v327_v17 = vsel %vm325_vm3, %v267_v16, 0 }
  0x17   : > { %336 = vmatpush.bf16.msra.mxu1 %v327_v17 }
  0x1c   : > { %480 = vmatmul.msk.bf16.vlgmr.msra.gmra.mxu0 %vm268_vm0, %v265_v2 }
  0x99   : > { %v284_v6 = vpop.f32.mrf.mxu0 }
  0x9a   : > { %v288_v7 = vmul.f32 0.35355338, %v284_v6 }
  0x9c   : > { %v294_v8 = vsel %vm293_vm1, -1e+30, %v288_v7 }
  0x9d   : > { %v296_v9 = vsel %vm295_vm2, %v294_v8, -inf }
  0x9e   : > { %297 = vmax.xlane.f32.xlu0 %v296_v9 }
  0xa1   : > { %v286_v10 = vpop.f32.mrf.mxu0 }
 0x111   : > { %v298_v11 = vpop.xlane.xlu0 %297 }
 0x112   : > { %v299_v12 = vsub.f32 %v294_v8, %v298_v11 }
 0x114   : > { %v300_v13 = vmul.f32 1.442695, %v299_v12 }
 0x116   : > { %524 = vpow2.f32 %v300_v13 }
 0x11c   : > { %v525_v14 = vpop.eup %524 }
 0x11d   : > { %v302_v15 = vsel %vm295_vm2, %v525_v14, 0.0 }
 0x11e   : > { %303 = vadd.xlane.f32.xlu0 %v302_v15 }
 0x191   : > { %v304_v18 = vpop.xlane.xlu0 %303 }
 0x192   : > { %526 = vrcp.f32 %v304_v18  ;;  %v316_v22 = vand.u32 2147483648, %v304_v18  ;;  %v314_v24 = vand.u32 2147483647, %v304_v18  ;;  %vm310_vm5 = vweird.f32 %v304_v18 }
 0x194   : > { %v317_v26 = vor.u32 1.1754944e-38, %v316_v22  ;;  %vm315_vm7 = vcmp.eq.f32.partialorder %v314_v24, 8.507059e+37 }
 0x198   : > { %v527_v19 = vpop.eup %526 }
 0x199   : > { %v306_v20 = vmul.f32 %v527_v19, %v304_v18  ;;  %vm311_vm4 = vweird.f32 %v527_v19 }
 0x19a   : > { %vm312_vm6 = vmor %vm310_vm5, %vm311_vm4 }
 0x19b   : > { %v307_v21 = vsub.f32 1.0, %v306_v20 }
 0x19d   : > { %v308_v23 = vmul.f32 %v527_v19, %v307_v21 }
 0x19f   : > { %v309_v25 = vadd.f32 %v527_v19, %v308_v23 }
 0x1a1   : > { %v313_v27 = vsel %vm312_vm6, %v527_v19, %v309_v25 }
 0x1a2   : > { %v318_v28 = vsel %vm315_vm7, %v317_v26, %v313_v27 }
 0x1a3   : > { %v319_v29 = vmul.f32 %v525_v14, %v318_v28 }
 0x1a5   : > { %v320_v30 = vpack.c.bf16 %v319_v29, %v319_v29 }
 0x1a7   : > { %481 = vmatmul.msk.bf16.vlgmr.msra.gmra.mxu1 %vm321_vm8, %v320_v30 }
 0x224   : > { %v338_v31 = vpop.f32.mrf.mxu1 }
 0x225   : > { %v342_v32 = vpack.c.bf16 %v338_v31, %v338_v31 }
 0x227   : > { %344 = vst.msk [vmem:[%s263_s6] sm:$0x7] %vm343_vm9, %v342_v32 }
 0x22c   : > { %v340_v33 = vpop.f32.mrf.mxu1 }
 0x22d PF: > { %s13_s16 = sadd.s32 1, %s566_s16   ;;  %s655_s12 = smov %s558_s14 }
 0x22e   : > { %p10_p7 = scmp.ge.s32.totalorder %s13_s16, 10   ;;  %s656_s13 = smov %s562_s15 }
 0x22f   : > { %s657_s14 = smov %s660_s17  ;;  %s658_s15 = smov %s664_s18 }
 0x230   :  { %12 = sbr.rel (!%p10_p7) target bundleno = 3 (0x3), region = 68 }

// kernel: _lambda_.78
= control target key start
LH: loop header
LB: loop body
LE: loop exit
PB: predicated region body
PF: predicated region fallthrough
CT: control target
= control target key end

     0   :  { %vm22_vm0 = vcmask 261120   ;;  %v111_v1 = vmov 0.0   ;;  %s168_s1 = inlined_call_operand.vmem [shape: bf16[32,32], index: 1, kind: input, shape index: {}]   ;;  %s169_s2 = inlined_call_operand.vmem [shape: f32[1,32], index: 2, kind: input, shape index: {}]   ;;  %s170_s0 = inlined_call_operand.vmem [shape: bf16[16,32], index: 0, kind: input, shape index: {}]   ;;  %s171_s3 = inlined_call_operand.vmem [shape: f32[16,32], index: 3, kind: input, shape index: {}]   ;;  %s172_s4 = inlined_call_operand.vmem [shape: f32[16,32], index: 4, kind: output, shape index: {}]  }
   0x1   :  { %v108_v0 = vld [vmem:[%s168_s1 + $0x8] sm:$0xff]  ;;  %23 = vst.msk [vmem:[#allocation2] sm:$0xff] %vm22_vm0, %v111_v1  ;;  %v107_v2 = vld [vmem:[%s168_s1] sm:$0xff] }
   0x2   :  { %24 = vst.msk [vmem:[#allocation2 + $0x8] sm:$0xff] %vm22_vm0, %v111_v1  ;;  %60 = vmatpush.bf16.msra.mxu0 %v108_v0  ;;  %v106_v3 = vld [vmem:[%s170_s0] sm:$0xff]  ;;  %v84_v16 = vld [vmem:[%s171_s3 + $0x8] sm:$0xff] }
   0x3   :  { %v110_v8 = vld [vmem:[%s169_s2] ss:$0 sm:$0xff] }
   0x4   :  { %v83_v12 = vld [vmem:[%s171_s3] sm:$0xff] }
   0x6   :  { %61 = vmatpush.bf16.msra.mxu0 %v107_v2 }
   0x8   :  { %v25_v4 = vld [vmem:[#allocation2] sm:$0xff] }
   0x9   :  { %105 = vmatmul.msk.bf16.vlgmr.msra.gmra.mxu0 %vm22_vm0, %v106_v3  ;;  %v26_v7 = vld [vmem:[#allocation2 + $0x8] sm:$0xff] }
  0x86   :  { %v63_v5 = vpop.f32.mrf.mxu0 }
  0x87   :  { %v68_v6 = vadd.f32 %v63_v5, %v25_v4 }
  0x89   :  { %70 = vst.msk [vmem:[#allocation2] sm:$0xff] %vm22_vm0, %v68_v6 }
  0x8e   :  { %v65_v9 = vpop.f32.mrf.mxu0 }
  0x8f   :  { %v69_v10 = vadd.f32 %v65_v9, %v26_v7 }
  0x90   :  { %v75_v11 = vld [vmem:[#allocation2] sm:$0xff] }
  0x91   :  { %v81_v13 = vadd.f32 %v110_v8, %v75_v11  ;;  %71 = vst.msk [vmem:[#allocation2 + $0x8] sm:$0xff] %vm22_vm0, %v69_v10 }
  0x93   :  { %v85_v14 = vadd.f32 %v83_v12, %v81_v13 }
  0x95   :  { %87 = vst.msk [vmem:[%s172_s4] sm:$0xff] %vm22_vm0, %v85_v14 }
  0x98   :  { %v76_v15 = vld [vmem:[#allocation2 + $0x8] sm:$0xff] }
  0x99   :  { %v82_v17 = vadd.f32 %v110_v8, %v76_v15 }
  0x9b   :  { %v86_v18 = vadd.f32 %v84_v16, %v82_v17 }
  0x9d   :  { %88 = vst.msk [vmem:[%s172_s4 + $0x8] sm:$0xff] %vm22_vm0, %v86_v18 }

// kernel: _lambda_.79
= control target key start
LH: loop header
LB: loop body
LE: loop exit
PB: predicated region body
PF: predicated region fallthrough
CT: control target
= control target key end

     0   :  { %vm16_vm0 = vcmask 261120   ;;  %v95_v4 = vmov 32.0   ;;  %s140_s0 = inlined_call_operand.vmem [shape: f32[16,32], index: 0, kind: input, shape index: {}]   ;;  %s141_s1 = inlined_call_operand.vmem [shape: f32[1,32], index: 1, kind: input, shape index: {}]   ;;  %s142_s2 = inlined_call_operand.vmem [shape: f32[1,32], index: 2, kind: input, shape index: {}]   ;;  %s143_s3 = inlined_call_operand.vmem [shape: f32[16,32], index: 3, kind: output, shape index: {}]  }
   0x1   :  { %v14_v0 = vld [vmem:[%s140_s0] sm:$0xff]  ;;  %v15_v2 = vld [vmem:[%s140_s0 + $0x8] sm:$0xff]  ;;  %89 = vrcp.f32 %v95_v4 }
   0x2   :  { %v17_v1 = vsel %vm16_vm0, %v14_v0, 0.0  ;;  %v20_v3 = vsel %vm16_vm0, %v15_v2, 0.0  ;;  %v87_v35 = vld [vmem:[%s141_s1] ss:$0 sm:$0xff] }
   0x3   :  { %18 = vadd.xlane.f32.xlu0 %v17_v1  ;;  %v88_v38 = vld [vmem:[%s142_s2] ss:$0 sm:$0xff] }
   0x7   :  { %v90_v5 = vpop.eup %89 }
   0x8   :  { %v24_v6 = vmul.f32 32.0, %v90_v5  ;;  %vm28_vm1 = vweird.f32 %v90_v5 }
   0xa   :  { %v25_v7 = vsub.f32 1.0, %v24_v6 }
   0xb   :  { %21 = vadd.xlane.f32.xlu0 %v20_v3 }
   0xc   :  { %v26_v8 = vmul.f32 %v90_v5, %v25_v7 }
   0xe   :  { %v27_v9 = vadd.f32 %v90_v5, %v26_v8 }
  0x10   :  { %v29_v10 = vsel %vm28_vm1, %v90_v5, %v27_v9 }
  0x76   :  { %v19_v11 = vpop.xlane.xlu0 %18 }
  0x77   :  { %v30_v12 = vmul.f32 %v29_v10, %v19_v11 }
  0x79   :  { %v32_v13 = vsub.f32 %v14_v0, %v30_v12 }
  0x7b   :  { %v34_v14 = vmul.f32 %v32_v13, %v32_v13 }
  0x7d   :  { %v36_v15 = vsel %vm16_vm0, %v34_v14, 0.0 }
  0x7e   :  { %37 = vadd.xlane.f32.xlu1 %v36_v15  ;;  %v22_v16 = vpop.xlane.xlu0 %21 }
  0x7f   :  { %v31_v17 = vmul.f32 %v29_v10, %v22_v16 }
  0x81   :  { %v33_v18 = vsub.f32 %v15_v2, %v31_v17 }
  0x83   :  { %v35_v19 = vmul.f32 %v33_v18, %v33_v18 }
  0x85   :  { %v39_v20 = vsel %vm16_vm0, %v35_v19, 0.0 }
  0x86   :  { %40 = vadd.xlane.f32.xlu1 %v39_v20 }
  0xf1   :  { %v38_v21 = vpop.xlane.xlu1 %37 }
  0xf2   :  { %v42_v22 = vmul.f32 %v38_v21, %v29_v10 }
  0xf4   :  { %v44_v23 = vadd.f32 1e-05, %v42_v22 }
  0xf6   :  { %91 = vrsqrt.f32 %v44_v23  ;;  %vm52_vm3 = vweird.f32 %v44_v23 }
  0xf9   :  { %v41_v24 = vpop.xlane.xlu1 %40 }
  0xfa   :  { %v43_v25 = vmul.f32 %v41_v24, %v29_v10 }
  0xfc   :  { %v92_v26 = vpop.eup %91  ;;  %v45_v27 = vadd.f32 1e-05, %v43_v25 }
  0xfd   :  { %v47_v28 = vmul.f32 %v92_v26, %v44_v23  ;;  %vm53_vm2 = vweird.f32 %v92_v26 }
  0xfe   :  { %93 = vrsqrt.f32 %v45_v27  ;;  %vm54_vm4 = vmor %vm52_vm3, %vm53_vm2  ;;  %vm62_vm6 = vweird.f32 %v45_v27 }
  0xff   :  { %v48_v29 = vmul.f32 %v92_v26, %v47_v28 }
 0x101   :  { %v49_v30 = vmul.f32 0.5, %v48_v29 }
 0x103   :  { %v50_v31 = vsub.f32 1.5, %v49_v30 }
 0x104   :  { %v94_v32 = vpop.eup %93 }
 0x105   :  { %v51_v33 = vmul.f32 %v92_v26, %v50_v31  ;;  %v57_v34 = vmul.f32 %v94_v32, %v45_v27  ;;  %vm63_vm5 = vweird.f32 %v94_v32 }
 0x106   :  { %vm64_vm7 = vmor %vm62_vm6, %vm63_vm5 }
 0x107   :  { %v55_v36 = vsel %vm54_vm4, %v92_v26, %v51_v33  ;;  %v58_v37 = vmul.f32 %v94_v32, %v57_v34 }
 0x108   :  { %v66_v39 = vmul.f32 %v55_v36, %v32_v13 }
 0x109   :  { %v59_v40 = vmul.f32 0.5, %v58_v37 }
 0x10a   :  { %v72_v41 = vmul.f32 %v87_v35, %v66_v39 }
 0x10b   :  { %v60_v42 = vsub.f32 1.5, %v59_v40 }
 0x10c   :  { %v78_v43 = vadd.f32 %v88_v38, %v72_v41 }
 0x10d   :  { %v61_v44 = vmul.f32 %v94_v32, %v60_v42 }
 0x10e   :  { %80 = vst.msk [vmem:[%s143_s3] sm:$0xff] %vm16_vm0, %v78_v43 }
 0x10f   :  { %v65_v45 = vsel %vm64_vm7, %v94_v32, %v61_v44 }
 0x110   :  { %v67_v46 = vmul.f32 %v65_v45, %v33_v18 }
 0x112   :  { %v73_v47 = vmul.f32 %v87_v35, %v67_v46 }
 0x114   :  { %v79_v48 = vadd.f32 %v88_v38, %v73_v47 }
 0x116   :  { %81 = vst.msk [vmem:[%s143_s3 + $0x8] sm:$0xff] %vm16_vm0, %v79_v48 }

// kernel: _lambda_.82
= control target key start
LH: loop header
LB: loop body
LE: loop exit
PB: predicated region body
PF: predicated region fallthrough
CT: control target
= control target key end

     0   :  { %s618_s12 = smov 0   ;;  %s620_s13 = smov 0   ;;  %s682_s0 = inlined_call_operand.vmem [shape: bf16[2,4,6,8], index: 0, kind: input, shape index: {}]   ;;  %s683_s1 = inlined_call_operand.vmem [shape: bf16[2,4,12,8], index: 1, kind: input, shape index: {}]   ;;  %s684_s2 = inlined_call_operand.vmem [shape: bf16[2,4,12,8], index: 2, kind: input, shape index: {}]   ;;  %s685_s3 = inlined_call_operand.vmem [shape: bf16[2,4,6,8], index: 3, kind: output, shape index: {}]  }
   0x1   :  { %s622_s14 = smov 0   ;;  %s624_s15 = smov 0  }
   0x2   :  { %s626_s16 = smov 0  }
   0x3 LB: > { %s22_s17 = sadd.s32 1, %s588_s14  ;;  %s25_s18 = sadd.s32 1, %s592_s15  ;;  %s596_s16 = sphi %s626_s16, %s13_s16   ;;  %s592_s15 = sphi %s624_s15, %s689_s15   ;;  %s588_s14 = sphi %s622_s14, %s688_s14   ;;  %s584_s13 = sphi %s620_s13, %s687_s13   ;;  %s580_s12 = sphi %s618_s12, %s686_s12  }
   0x4   : > { %p23_p0 = scmp.ge.s32.totalorder %s22_s17, 4  ;;  %p489_p1 = scmp.ge.s32.totalorder %s596_s16, 1 }
   0x5   : > { %p188_p2 = scmp.lt.s32.totalorder %s596_s16, 9 }
   0x6   : > { %s691_s17 = smov (%p23_p0, %s22_s17), 0  ;;  %s693_s18 = smov (!%p23_p0, %s25_s18), %s592_s15 }
   0x7   : > { %p189_p3 = pnand %p489_p1, %p188_p2  ;;  %p27_p4 = scmp.ge.s32.totalorder %s693_s18, 2 }
   0x8   : > { %p236_p5 = scmp.lt.s32.totalorder (!%p189_p3), %s584_s13, 1  ;;  %p238_p6 = scmp.lt.s32.totalorder (!%p189_p3), %s580_s12, 3 }
   0x9   : > { %s695_s18 = smov (%p27_p4, %s693_s18), 0  ;;  %192 = sbr.rel (%p189_p3) target bundleno = 558 (0x22e), region = 32 }
   0xe   : > { %s697_s13 = smov (!%p236_p5, %s584_s13), 1  ;;  %s699_s12 = smov (!%p238_p6, %s580_s12), 3  ;;  %vm281_vm0 = vcmask 64512   ;;  %vm302_vm1 = vcmask 95232   ;;  %vm337_vm2 = vcmask 1045504   ;;  %vm333_vm7 = vcmask 97280  }
   0xf   : > { %s493_s19 = sshll.u32 %s697_s13, 3  ;;  %s492_s20 = sshll.u32 %s699_s12, 1  ;;  %vm355_vm8 = vcmask 59392  }
  0x10   : > { %s490_s21 = sshll.u32 %s697_s13, 2  ;;  %s250_s22 = sadd.s32 %s493_s19, %s492_s20 }
  0x11   : > { %s494_s23 = sshll.u32 %s250_s22, 2  ;;  %s651_s27 = sadd.s32 %s490_s21, %s699_s12 }
  0x12   : > { %s252_s26 = scalar_lea.vmem %s683_s1, %s494_s23  ;;  %s491_s28 = sshll.u32 %s651_s27, 2 }
  0x13   : > { %v502_v0 = vld [vmem:[%s252_s26] sm:$0xf]  ;;  %v512_v1 = vld [vmem:[%s252_s26] sm:$0x30]  ;;  %s243_s4 = scalar_lea.vmem %s682_s0, %s491_s28  ;;  %s261_s7 = scalar_lea.vmem %s684_s2, %s494_s23 }
  0x14   : > { %v503_v2 = vor.u32 %v512_v1, %v502_v0  ;;  %v271_v4 = vld [vmem:[%s243_s4] sm:$0x7]  ;;  %v513_v15 = vld [vmem:[%s261_s7] sm:$0x30]  ;;  %s269_s10 = scalar_lea.vmem %s685_s3, %s491_s28 }
  0x15   : > { %v507_v14 = vld [vmem:[%s261_s7] sm:$0xf] }
  0x16   : > { %v286_v3 = vsel %vm281_vm0, %v503_v2, 0  ;;  %v508_v16 = vor.u32 %v513_v15, %v507_v14 }
  0x17   : > { %295 = vmatpush.bf16.xpose.msra.mxu0 %v286_v3 }
  0x18   : > { %v339_v17 = vsel %vm337_vm2, %v508_v16, 0 }
  0x19   : > { %348 = vmatpush.bf16.msra.mxu1 %v339_v17 }
  0x1e   : > { %504 = vmatmul.msk.bf16.vlgmr.msra.gmra.mxu0 %vm281_vm0, %v271_v4 }
  0x9b   : > { %v297_v5 = vpop.f32.mrf.mxu0 }
  0x9c   : > { %v301_v6 = vmul.f32 0.35355338, %v297_v5 }
  0x9e   : > { %v303_v7 = vsel %vm302_vm1, %v301_v6, -inf }
  0x9f   : > { %304 = vmax.xlane.f32.xlu0 %v303_v7 }
  0xa3   : > { %v299_v8 = vpop.f32.mrf.mxu0 }
 0x112   : > { %v305_v9 = vpop.xlane.xlu0 %304 }
 0x113   : > { %v306_v10 = vsub.f32 %v301_v6, %v305_v9 }
 0x115   : > { %v307_v11 = vmul.f32 1.442695, %v306_v10 }
 0x117   : > { %554 = vpow2.f32 %v307_v11 }
 0x11d   : > { %v555_v12 = vpop.eup %554 }
 0x11e   : > { %v309_v13 = vsel %vm302_vm1, %v555_v12, 0.0 }
 0x11f   : > { %310 = vadd.xlane.f32.xlu0 %v309_v13 }
 0x192   : > { %v311_v18 = vpop.xlane.xlu0 %310 }
 0x193   : > { %556 = vrcp.f32 %v311_v18  ;;  %v323_v22 = vand.u32 2147483648, %v311_v18  ;;  %v321_v24 = vand.u32 2147483647, %v311_v18  ;;  %vm317_vm4 = vweird.f32 %v311_v18 }
 0x195   : > { %v324_v26 = vor.u32 1.1754944e-38, %v323_v22  ;;  %vm322_vm6 = vcmp.eq.f32.partialorder %v321_v24, 8.507059e+37 }
 0x199   : > { %v557_v19 = vpop.eup %556 }
 0x19a   : > { %v313_v20 = vmul.f32 %v557_v19, %v311_v18  ;;  %vm318_vm3 = vweird.f32 %v557_v19 }
 0x19b   : > { %vm319_vm5 = vmor %vm317_vm4, %vm318_vm3 }
 0x19c   : > { %v314_v21 = vsub.f32 1.0, %v313_v20 }
 0x19e   : > { %v315_v23 = vmul.f32 %v557_v19, %v314_v21 }
 0x1a0   : > { %v316_v25 = vadd.f32 %v557_v19, %v315_v23 }
 0x1a2   : > { %v320_v27 = vsel %vm319_vm5, %v557_v19, %v316_v25 }
 0x1a3   : > { %v325_v28 = vsel %vm322_vm6, %v324_v26, %v320_v27 }
 0x1a4   : > { %v326_v29 = vmul.f32 %v555_v12, %v325_v28 }
 0x1a6   : > { %v327_v30 = vpack.c.bf16 %v326_v29, %v326_v29 }
 0x1a8   : > { %509 = vmatmul.msk.bf16.vlgmr.msra.gmra.mxu1 %vm333_vm7, %v327_v30 }
 0x225   : > { %v350_v31 = vpop.f32.mrf.mxu1 }
 0x226   : > { %v354_v32 = vpack.c.bf16 %v350_v31, %v350_v31 }
 0x228   : > { %356 = vst.msk [vmem:[%s269_s10] sm:$0x7] %vm355_vm8, %v354_v32 }
 0x22d   : > { %v352_v33 = vpop.f32.mrf.mxu1 }
 0x22e PF: > { %s13_s16 = sadd.s32 1, %s596_s16   ;;  %s686_s12 = smov %s588_s14 }
 0x22f   : > { %p10_p7 = scmp.ge.s32.totalorder %s13_s16, 10   ;;  %s687_s13 = smov %s592_s15 }
 0x230   : > { %s688_s14 = smov %s691_s17  ;;  %s689_s15 = smov %s695_s18 }
 0x231   :  { %12 = sbr.rel (!%p10_p7) target bundleno = 3 (0x3), region = 68 }

// kernel: _lambda_.80
= control target key start
LH: loop header
LB: loop body
LE: loop exit
PB: predicated region body
PF: predicated region fallthrough
CT: control target
= control target key end

     0   :  { %vm19_vm0 = vcmask 261120   ;;  %v107_v1 = vmov 0.0   ;;  %vm82_vm1 = vcmask 257024   ;;  %s151_s1 = inlined_call_operand.vmem [shape: bf16[32,32], index: 1, kind: input, shape index: {}]   ;;  %s152_s2 = inlined_call_operand.vmem [shape: f32[1,32], index: 2, kind: input, shape index: {}]   ;;  %s153_s0 = inlined_call_operand.vmem [shape: bf16[16,32], index: 0, kind: input, shape index: {}]   ;;  %s154_s3 = inlined_call_operand.vmem [shape: bf16[16,32], index: 3, kind: output, shape index: {}]  }
   0x1   :  { %v104_v0 = vld [vmem:[%s151_s1 + $0x8] sm:$0xff]  ;;  %20 = vst.msk [vmem:[#allocation2] sm:$0xff] %vm19_vm0, %v107_v1  ;;  %v103_v2 = vld [vmem:[%s151_s1] sm:$0xff] }
   0x2   :  { %21 = vst.msk [vmem:[#allocation2 + $0x8] sm:$0xff] %vm19_vm0, %v107_v1  ;;  %57 = vmatpush.bf16.msra.mxu0 %v104_v0  ;;  %v102_v3 = vld [vmem:[%s153_s0] sm:$0xff] }
   0x3   :  { %v106_v8 = vld [vmem:[%s152_s2] ss:$0 sm:$0xff] }
   0x6   :  { %58 = vmatpush.bf16.msra.mxu0 %v103_v2 }
   0x8   :  { %v22_v4 = vld [vmem:[#allocation2] sm:$0xff] }
   0x9   :  { %101 = vmatmul.msk.bf16.vlgmr.msra.gmra.mxu0 %vm19_vm0, %v102_v3  ;;  %v23_v7 = vld [vmem:[#allocation2 + $0x8] sm:$0xff] }
  0x86   :  { %v60_v5 = vpop.f32.mrf.mxu0 }
  0x87   :  { %v65_v6 = vadd.f32 %v60_v5, %v22_v4 }
  0x89   :  { %67 = vst.msk [vmem:[#allocation2] sm:$0xff] %vm19_vm0, %v65_v6 }
  0x8e   :  { %v62_v9 = vpop.f32.mrf.mxu0 }
  0x8f   :  { %v66_v10 = vadd.f32 %v62_v9, %v23_v7 }
  0x90   :  { %v72_v11 = vld [vmem:[#allocation2] sm:$0xff] }
  0x91   :  { %v78_v12 = vadd.f32 %v106_v8, %v72_v11  ;;  %68 = vst.msk [vmem:[#allocation2 + $0x8] sm:$0xff] %vm19_vm0, %v66_v10 }
  0x93   :  { %v80_v13 = vpack.c.bf16 %v78_v12, %v78_v12 }
  0x95   :  { %83 = vst.msk [vmem:[%s154_s3] sm:$0xf] %vm82_vm1, %v80_v13 }
  0x98   :  { %v73_v14 = vld [vmem:[#allocation2 + $0x8] sm:$0xff] }
  0x99   :  { %v79_v15 = vadd.f32 %v106_v8, %v73_v14 }
  0x9b   :  { %v81_v16 = vpack.c.bf16 %v79_v15, %v79_v15 }
  0x9d   :  { %84 = vst.msk [vmem:[%s154_s3 + $0x4] sm:$0xf] %vm82_vm1, %v81_v16 }

// kernel: _lambda_.85
= control target key start
LH: loop header
LB: loop body
LE: loop exit
PB: predicated region body
PF: predicated region fallthrough
CT: control target
= control target key end

     0   :  { %vm46_vm0 = vcmask 261120   ;;  %s146_s1 = inlined_call_operand.vmem [shape: bf16[32,128], index: 1, kind: input, shape index: {}]   ;;  %s147_s2 = inlined_call_operand.vmem [shape: f32[1,128], index: 2, kind: input, shape index: {}]   ;;  %s148_s0 = inlined_call_operand.vmem [shape: bf16[16,32], index: 0, kind: input, shape index: {}]   ;;  %s149_s3 = inlined_call_operand.vmem [shape: bf16[16,128], index: 3, kind: output, shape index: {}]  }
   0x1   :  { %v104_v0 = vld [vmem:[%s146_s1 + $0x8] sm:$0xff]  ;;  %v103_v1 = vld [vmem:[%s146_s1] sm:$0xff] }
   0x2   :  { %56 = vmatpush.bf16.msra.mxu0 %v104_v0  ;;  %v102_v2 = vld [vmem:[%s148_s0] sm:$0xff] }
   0x3   :  { %v110_v4 = vld [vmem:[%s147_s2] ss:$0 sm:$0xff] }
   0x6   :  { %57 = vmatpush.bf16.msra.mxu0 %v103_v1 }
   0x9   :  { %101 = vmatmul.msk.bf16.vlgmr.msra.gmra.mxu0 %vm46_vm0, %v102_v2 }
  0x86   :  { %v59_v3 = vpop.f32.mrf.mxu0 }
  0x87   :  { %v77_v5 = vadd.f32 %v110_v4, %v59_v3 }
  0x89   :  { %v79_v8 = vmax.f32 %v77_v5, 0.0 }
  0x8e   :  { %v61_v6 = vpop.f32.mrf.mxu0 }
  0x8f   :  { %v78_v7 = vadd.f32 %v110_v4, %v61_v6 }
  0x91   :  { %v80_v9 = vmax.f32 %v78_v7, 0.0 }
  0x93   :  { %v108_v10 = vpack.c.bf16 %v80_v9, %v79_v8 }
  0x95   :  { %109 = vst [vmem:[%s149_s3] sm:$0xff] %v108_v10  }

// kernel: _lambda_.100
= control target key start
LH: loop header
LB: loop body
LE: loop exit
PB: predicated region body
PF: predicated region fallthrough
CT: control target
= control target key end

     0   :  { %vm19_vm0 = vcmask 89088   ;;  %v105_v1 = vmov 0.0   ;;  %vm47_vm1 = vcmask 261120   ;;  %s150_s1 = inlined_call_operand.vmem [shape: bf16[32,11], index: 1, kind: input, shape index: {}]   ;;  %s151_s2 = inlined_call_operand.vmem [shape: f32[1,11], index: 2, kind: input, shape index: {}]   ;;  %s152_s0 = inlined_call_operand.vmem [shape: bf16[16,32], index: 0, kind: input, shape index: {}]   ;;  %s153_s3 = inlined_call_operand.vmem [shape: f32[16,11], index: 3, kind: output, shape index: {}]  }
   0x1   :  { %v102_v0 = vld [vmem:[%s150_s1 + $0x8] sm:$0xff]  ;;  %20 = vst.msk [vmem:[#allocation2] sm:$0xff] %vm19_vm0, %v105_v1  ;;  %v101_v2 = vld [vmem:[%s150_s1] sm:$0xff] }
   0x2   :  { %21 = vst.msk [vmem:[#allocation2 + $0x8] sm:$0xff] %vm19_vm0, %v105_v1  ;;  %57 = vmatpush.bf16.msra.mxu0 %v102_v0  ;;  %v100_v3 = vld [vmem:[%s152_s0] sm:$0xff] }
   0x3   :  { %v104_v8 = vld [vmem:[%s151_s2] ss:$0 sm:$0xff] }
   0x6   :  { %58 = vmatpush.bf16.msra.mxu0 %v101_v2 }
   0x8   :  { %v22_v4 = vld [vmem:[#allocation2] sm:$0xff] }
   0x9   :  { %99 = vmatmul.msk.bf16.vlgmr.msra.gmra.mxu0 %vm47_vm1, %v100_v3  ;;  %v23_v7 = vld [vmem:[#allocation2 + $0x8] sm:$0xff] }
  0x86   :  { %v60_v5 = vpop.f32.mrf.mxu0 }
  0x87   :  { %v65_v6 = vadd.f32 %v60_v5, %v22_v4 }
  0x89   :  { %68 = vst.msk [vmem:[#allocation2] sm:$0xff] %vm19_vm0, %v65_v6 }
  0x8e   :  { %v62_v9 = vpop.f32.mrf.mxu0 }
  0x8f   :  { %v66_v10 = vadd.f32 %v62_v9, %v23_v7 }
  0x90   :  { %v73_v11 = vld [vmem:[#allocation2] sm:$0xff] }
  0x91   :  { %v79_v12 = vadd.f32 %v104_v8, %v73_v11  ;;  %69 = vst.msk [vmem:[#allocation2 + $0x8] sm:$0xff] %vm19_vm0, %v66_v10 }
  0x93   :  { %81 = vst.msk [vmem:[%s153_s3] sm:$0xff] %vm19_vm0, %v79_v12 }
  0x98   :  { %v74_v13 = vld [vmem:[#allocation2 + $0x8] sm:$0xff] }
  0x99   :  { %v80_v14 = vadd.f32 %v104_v8, %v74_v13 }
  0x9b   :  { %82 = vst.msk [vmem:[%s153_s3 + $0x8] sm:$0xff] %vm19_vm0, %v80_v14 }

// kernel: _lambda_.86
= control target key start
LH: loop header
LB: loop body
LE: loop exit
PB: predicated region body
PF: predicated region fallthrough
CT: control target
= control target key end

     0   :  { %vm21_vm0 = vcmask 261120   ;;  %v185_v2 = vmov 0.0   ;;  %s259_s1 = inlined_call_operand.vmem [shape: bf16[128,32], index: 1, kind: input, shape index: {}]   ;;  %s260_s2 = inlined_call_operand.vmem [shape: f32[1,32], index: 2, kind: input, shape index: {}]   ;;  %s261_s0 = inlined_call_operand.vmem [shape: bf16[16,128], index: 0, kind: input, shape index: {}]   ;;  %s262_s3 = inlined_call_operand.vmem [shape: f32[16,32], index: 3, kind: input, shape index: {}]   ;;  %s263_s4 = inlined_call_operand.vmem [shape: f32[16,32], index: 4, kind: output, shape index: {}]  }
   0x1   :  { %v182_v0 = vld [vmem:[%s259_s1 + $0x38] sm:$0xff]  ;;  %v181_v1 = vld [vmem:[%s259_s1 + $0x30] sm:$0xff]  ;;  %22 = vst.msk [vmem:[#allocation2] sm:$0xff] %vm21_vm0, %v185_v2  ;;  %v180_v3 = vld [vmem:[%s259_s1 + $0x28] sm:$0xff] }
   0x2   :  { %98 = vmatpush.bf16.msra.mxu0 %v182_v0  ;;  %23 = vst.msk [vmem:[#allocation2 + $0x8] sm:$0xff] %vm21_vm0, %v185_v2  ;;  %v179_v4 = vld [vmem:[%s259_s1 + $0x20] sm:$0xff]  ;;  %v178_v5 = vld [vmem:[%s259_s1 + $0x18] sm:$0xff]  ;;  %v177_v6 = vld [vmem:[%s259_s1 + $0x10] sm:$0xff] }
   0x3   :  { %v176_v7 = vld [vmem:[%s259_s1 + $0x8] sm:$0xff]  ;;  %v175_v8 = vld [vmem:[%s259_s1] sm:$0xff] }
   0x4   :  { %v174_v9 = vld [vmem:[%s261_s0] sm:$0xff]  ;;  %v129_v21 = vld [vmem:[%s262_s3 + $0x8] sm:$0xff] }
   0x5   :  { %v184_v14 = vld [vmem:[%s260_s2] ss:$0 sm:$0xff] }
   0x6   :  { %99 = vmatpush.bf16.msra.mxu0 %v181_v1  ;;  %v128_v18 = vld [vmem:[%s262_s3] sm:$0xff] }
   0x8   :  { %v24_v10 = vld [vmem:[#allocation2] sm:$0xff] }
   0x9   :  { %v25_v13 = vld [vmem:[#allocation2 + $0x8] sm:$0xff] }
   0xa   :  { %100 = vmatpush.bf16.msra.mxu0 %v180_v3 }
   0xe   :  { %101 = vmatpush.bf16.msra.mxu0 %v179_v4 }
  0x12   :  { %102 = vmatpush.bf16.msra.mxu0 %v178_v5 }
  0x16   :  { %103 = vmatpush.bf16.msra.mxu0 %v177_v6 }
  0x1a   :  { %104 = vmatpush.bf16.msra.mxu0 %v176_v7 }
  0x1e   :  { %105 = vmatpush.bf16.msra.mxu0 %v175_v8 }
  0x21   :  { %106 = vmatmul.bf16.vlgmr.msra.gmra.mxu0 %v174_v9 }
  0x9e   :  { %v107_v11 = vpop.f32.mrf.mxu0 }
  0x9f   :  { %v112_v12 = vadd.f32 %v107_v11, %v24_v10 }
  0xa1   :  { %115 = vst.msk [vmem:[#allocation2] sm:$0xff] %vm21_vm0, %v112_v12 }
  0xa6   :  { %v109_v15 = vpop.f32.mrf.mxu0 }
  0xa7   :  { %v113_v16 = vadd.f32 %v109_v15, %v25_v13 }
  0xa8   :  { %v120_v17 = vld [vmem:[#allocation2] sm:$0xff] }
  0xa9   :  { %v126_v19 = vadd.f32 %v184_v14, %v120_v17  ;;  %116 = vst.msk [vmem:[#allocation2 + $0x8] sm:$0xff] %vm21_vm0, %v113_v16 }
  0xab   :  { %v130_v20 = vadd.f32 %v128_v18, %v126_v19 }
  0xad   :  { %132 = vst.msk [vmem:[%s263_s4] sm:$0xff] %vm21_vm0, %v130_v20 }
  0xb0   :  { %v121_v22 = vld [vmem:[#allocation2 + $0x8] sm:$0xff] }
  0xb1   :  { %v127_v23 = vadd.f32 %v184_v14, %v121_v22 }
  0xb3   :  { %v131_v24 = vadd.f32 %v129_v21, %v127_v23 }
  0xb5   :  { %133 = vst.msk [vmem:[%s263_s4 + $0x8] sm:$0xff] %vm21_vm0, %v131_v24 }

// kernel: _lambda_.101
= control target key start
LH: loop header
LB: loop body
LE: loop exit
PB: predicated region body
PF: predicated region fallthrough
CT: control target
= control target key end

     0   :  { %vm19_vm0 = vcmask 89088   ;;  %v126_v1 = vmov 0.0   ;;  %vm53_vm1 = vcmask 261120   ;;  %s180_s1 = inlined_call_operand.vmem [shape: bf16[32,11], index: 1, kind: input, shape index: {}]   ;;  %s181_s0 = inlined_call_operand.vmem [shape: bf16[24,32], index: 0, kind: input, shape index: {}]   ;;  %s182_s2 = inlined_call_operand.vmem [shape: f32[1,11], index: 2, kind: input, shape index: {}]   ;;  %s183_s3 = inlined_call_operand.vmem [shape: f32[24,11], index: 3, kind: output, shape index: {}]  }
   0x1   :  { %v121_v0 = vld [vmem:[%s180_s1 + $0x8] sm:$0xff]  ;;  %20 = vst.msk [vmem:[#allocation2] sm:$0xff] %vm19_vm0, %v126_v1  ;;  %v120_v3 = vld [vmem:[%s180_s1] sm:$0xff] }
   0x2   :  { %v28_v2 = vld [vmem:[%s181_s0 + $0x8] sm:$0xf]  ;;  %21 = vst.msk [vmem:[#allocation2 + $0x8] sm:$0xff] %vm19_vm0, %v126_v1  ;;  %66 = vmatpush.bf16.msra.mxu0 %v121_v0  ;;  %122 = vmatpush.bf16.msra.mxu1 %v121_v0  ;;  %v119_v5 = vld [vmem:[%s181_s0] sm:$0xff] }
   0x3   :  { %v38_v4 = vunpack.c.l.b16 %v28_v2  ;;  %22 = vst.msk [vmem:[#allocation2 + $0x10] sm:$0xff] %vm19_vm0, %v126_v1  ;;  %v125_v14 = vld [vmem:[%s182_s2] ss:$0 sm:$0xff] }
   0x5   :  { %v40_v6 = vpack.c.b16 %v38_v4, %v38_v4 }
   0x6   :  { %67 = vmatpush.bf16.msra.mxu0 %v120_v3  ;;  %123 = vmatpush.bf16.msra.mxu1 %v120_v3 }
   0x8   :  { %v23_v7 = vld [vmem:[#allocation2] sm:$0xff] }
   0x9   :  { %117 = vmatmul.msk.bf16.vlgmr.msra.gmra.mxu0 %vm53_vm1, %v119_v5  ;;  %118 = vmatmul.msk.bf16.vlgmr.msra.gmra.mxu1 %vm53_vm1, %v40_v6  ;;  %v24_v13 = vld [vmem:[#allocation2 + $0x8] sm:$0xff] }
   0xa   :  { %v25_v8 = vld [vmem:[#allocation2 + $0x10] sm:$0xff] }
  0x86   :  { %v69_v9 = vpop.f32.mrf.mxu0  ;;  %v74_v10 = vpop.f32.mrf.mxu1 }
  0x87   :  { %v78_v11 = vadd.f32 %v69_v9, %v23_v7  ;;  %v80_v12 = vadd.f32 %v74_v10, %v25_v8 }
  0x89   :  { %82 = vst.msk [vmem:[#allocation2] sm:$0xff] %vm19_vm0, %v78_v11 }
  0x8a   :  { %84 = vst.msk [vmem:[#allocation2 + $0x10] sm:$0xff] %vm19_vm0, %v80_v12 }
  0x8e   :  { %v71_v15 = vpop.f32.mrf.mxu0  ;;  %v76_v16 = vpop.f32.mrf.mxu1 }
  0x8f   :  { %v79_v17 = vadd.f32 %v71_v15, %v24_v13 }
  0x90   :  { %v88_v18 = vld [vmem:[#allocation2] sm:$0xff] }
  0x91   :  { %v95_v19 = vadd.f32 %v125_v14, %v88_v18  ;;  %v90_v20 = vld [vmem:[#allocation2 + $0x10] sm:$0xff]  ;;  %83 = vst.msk [vmem:[#allocation2 + $0x8] sm:$0xff] %vm19_vm0, %v79_v17 }
  0x92   :  { %v97_v21 = vadd.f32 %v125_v14, %v90_v20 }
  0x93   :  { %98 = vst.msk [vmem:[%s183_s3] sm:$0xff] %vm19_vm0, %v95_v19 }
  0x94   :  { %100 = vst.msk [vmem:[%s183_s3 + $0x10] sm:$0xff] %vm19_vm0, %v97_v21 }
  0x98   :  { %v89_v22 = vld [vmem:[#allocation2 + $0x8] sm:$0xff] }
  0x99   :  { %v96_v23 = vadd.f32 %v125_v14, %v89_v22 }
  0x9b   :  { %99 = vst.msk [vmem:[%s183_s3 + $0x8] sm:$0xff] %vm19_vm0, %v96_v23 }

</bundles_post_ra>
